<compile_context>
chip_gen: v7x
topology: tpu7x:2x2x1
jax: 0.10.0
libtpu: 0.0.40
codegen_flags: <defaults>
</compile_context>

<pallas_src>
import jax
import jax.numpy as jnp
import numpy as np
from jax import lax
from jax.experimental import pallas as pl
from jax.experimental.pallas import tpu as pltpu

ENC_WORD = 16      # encoder vocabulary size
DEC_WORD = 16      # decoder vocabulary size (0 = SOS, 1 = EOS)
EMB = 32
HID = 32
NLAYERS = 2
SEQ = 8
MAXLEN = 50        # matches `for step in range(50)` in the PyTorch module

_HIGHEST = jax.lax.Precision.HIGHEST


def _mm(a, b):
    # full-f32-accuracy MXU matmul (tiny shapes; accuracy > speed here)
    return jnp.dot(a, b, preferred_element_type=jnp.float32, precision=_HIGHEST)


# ------------------------------ fused kernel --------------------------------

def _translate_kernel(
    # encoder inputs
    enc_tok_ref, enc_emb_ref,
    e0_wih_ref, e0_whh_ref, e0_bih_ref, e0_bhh_ref,
    e1_wih_ref, e1_whh_ref, e1_bih_ref, e1_bhh_ref,
    # decoder inputs
    dec_emb_ref,
    d0_wih_ref, d0_whh_ref, d0_bih_ref, d0_bhh_ref,
    d1_wih_ref, d1_whh_ref, d1_bih_ref, d1_bhh_ref,
    out_w_ref, out_b_ref,
    # outputs
    tokens_ref, count_ref, henc_ref,
    # scratch
    seq_ref,
):
    H = HID
    S = enc_tok_ref.shape[0]

    # ---------------- Encoder: embedding as one-hot matmul ----------------
    ids = enc_tok_ref[...]                                          # (S,1) i32
    cols = lax.broadcasted_iota(jnp.int32, (S, ENC_WORD), 1)
    emb = _mm((cols == ids).astype(jnp.float32), enc_emb_ref[...])  # (S,E)

    # ---------------- Encoder GRU layers (h0 = zeros) ----------------------
    def enc_layer(x_seq, wih_t, whh_t, bih, bhh, store_seq):
        # Hoisted input projection: one (S,Din)x(Din,3H) matmul,
        # with b_hh's r/z columns folded in.
        gi = _mm(x_seq, wih_t) + bih                                # (S,3H)
        gi_rz = gi[:, :2 * H] + bhh[:, :2 * H]
        gi_n = gi[:, 2 * H:]
        bhh_n = bhh[:, 2 * H:]
        h = jnp.zeros((1, H), jnp.float32)                          # initHidden()
        for t in range(S):                                          # static unroll
            gh = _mm(h, whh_t)                                      # (1,3H)
            rz = jax.nn.sigmoid(gi_rz[t:t + 1, :] + gh[:, :2 * H])  # fused r|z
            r, z = rz[:, :H], rz[:, H:]
            n = jnp.tanh(gi_n[t:t + 1, :] + r * (gh[:, 2 * H:] + bhh_n))
            h = (1.0 - z) * n + z * h
            if store_seq:
                seq_ref[t:t + 1, :] = h                             # VMEM scratch
        return h

    h0T = enc_layer(emb, e0_wih_ref[...], e0_whh_ref[...],
                    e0_bih_ref[...], e0_bhh_ref[...], store_seq=True)
    x1 = seq_ref[...]                                               # (S,H)
    h1T = enc_layer(x1, e1_wih_ref[...], e1_whh_ref[...],
                    e1_bih_ref[...], e1_bhh_ref[...], store_seq=False)

    henc_ref[0:1, :] = h0T
    henc_ref[1:2, :] = h1T

    # ---------------- Decoder: greedy decode loop --------------------------
    dec_emb = dec_emb_ref[...]
    d0 = (d0_wih_ref[...], d0_whh_ref[...], d0_bih_ref[...], d0_bhh_ref[...])
    d1 = (d1_wih_ref[...], d1_whh_ref[...], d1_bih_ref[...], d1_bhh_ref[...])
    out_w = out_w_ref[...]
    out_b = out_b_ref[...]
    lane_i = lax.broadcasted_iota(jnp.int32, (1, DEC_WORD), 1)
    lane_f = lane_i.astype(jnp.float32)

    def gru_cell(x, h, wih_t, whh_t, bih, bhh):
        gi = _mm(x, wih_t) + bih
        gh = _mm(h, whh_t) + bhh
        rz = jax.nn.sigmoid(gi[:, :2 * H] + gh[:, :2 * H])          # fused r|z
        r, z = rz[:, :H], rz[:, H:]
        n = jnp.tanh(gi[:, 2 * H:] + r * gh[:, 2 * H:])
        return (1.0 - z) * n + z * h

    def dec_step(tok, h0, h1):
        # tok: (1,1) int32; embedding lookup as one-hot matmul.
        x = _mm((lane_i == tok).astype(jnp.float32), dec_emb)       # (1,E)
        h0n = gru_cell(x, h0, *d0)
        h1n = gru_cell(h0n, h1, *d1)
        logits = _mm(h1n, out_w) + out_b                            # (1,Wd)
        # argmax(log_softmax(x)) == argmax(x); lowest index wins ties.
        maxv = jnp.max(logits, axis=1, keepdims=True)
        pred = jnp.min(jnp.where(logits >= maxv, lane_f, float(DEC_WORD)),
                       axis=1, keepdims=True).astype(jnp.int32)     # (1,1)
        return pred, h0n, h1n

    sos = jnp.zeros((1, 1), jnp.int32)
    tok0, h0d, h1d = dec_step(sos, h0T, h1T)     # first prediction: fed back, NOT emitted

    def body(i, carry):
        tok, h0, h1, done, cnt = carry
        pred, h0n, h1n = dec_step(tok, h0, h1)
        done_b = done > 0
        is_eos = pred == 1
        emit = jnp.logical_and(jnp.logical_not(done_b), jnp.logical_not(is_eos))
        tokens_ref[pl.ds(i, 1), :] = jnp.where(emit, pred, -1)
        return (jnp.where(emit, pred, tok),
                jnp.where(done_b, h0, h0n),
                jnp.where(done_b, h1, h1n),
                jnp.logical_or(done_b, is_eos).astype(jnp.int32),
                cnt + emit.astype(jnp.int32))

    carry0 = (tok0, h0d, h1d,
              jnp.zeros((1, 1), jnp.int32), jnp.zeros((1, 1), jnp.int32))
    _, _, _, _, cnt = lax.fori_loop(0, MAXLEN, body, carry0)
    count_ref[...] = cnt


# ------------------------------- wrapper -------------------------------------

def _vmem_spec():
    return pl.BlockSpec(memory_space=pltpu.MemorySpace.VMEM)


@jax.jit
def translate_forward(params, enc_tokens):
    e, d = params["encoder"], params["decoder"]
    inputs = (
        enc_tokens.reshape(SEQ, 1).astype(jnp.int32), e["embedding"],
        *e["layers"][0], *e["layers"][1],
        d["embedding"],
        *d["layers"][0], *d["layers"][1],
        d["out_w_t"], d["out_b"],
    )
    tokens, count, h_enc = pl.pallas_call(
        _translate_kernel,
        out_shape=(jax.ShapeDtypeStruct((MAXLEN, 1), jnp.int32),
                   jax.ShapeDtypeStruct((1, 1), jnp.int32),
                   jax.ShapeDtypeStruct((NLAYERS, HID), jnp.float32)),
        in_specs=[_vmem_spec()] * len(inputs),
        out_specs=(_vmem_spec(), _vmem_spec(), _vmem_spec()),
        scratch_shapes=[pltpu.VMEM((SEQ, HID), jnp.float32)],
    )(*inputs)
    return tokens, count, h_enc


def init_params(key):
    ks = jax.random.split(key, 8)
    bound = 1.0 / np.sqrt(HID)

    def gru_layer_params(k, in_dim):
        k1, k2, k3, k4 = jax.random.split(k, 4)
        # stored PRE-TRANSPOSED: (in_dim,3H) / (H,3H); biases as (1,3H); order [r|z|n]
        w_ih_t = jax.random.uniform(k1, (in_dim, 3 * HID), jnp.float32, -bound, bound)
        w_hh_t = jax.random.uniform(k2, (HID, 3 * HID), jnp.float32, -bound, bound)
        b_ih = jax.random.uniform(k3, (1, 3 * HID), jnp.float32, -bound, bound)
        b_hh = jax.random.uniform(k4, (1, 3 * HID), jnp.float32, -bound, bound)
        return (w_ih_t, w_hh_t, b_ih, b_hh)

    enc = {"embedding": jax.random.normal(ks[0], (ENC_WORD, EMB), jnp.float32),
           "layers": [gru_layer_params(ks[1], EMB), gru_layer_params(ks[2], HID)]}
    dec = {"embedding": jax.random.normal(ks[3], (DEC_WORD, EMB), jnp.float32),
           "layers": [gru_layer_params(ks[4], EMB), gru_layer_params(ks[5], HID)],
           "out_w_t": jax.random.uniform(ks[6], (HID, DEC_WORD), jnp.float32, -bound, bound),
           "out_b": jax.random.uniform(ks[7], (1, DEC_WORD), jnp.float32, -bound, bound)}
    return {"encoder": enc, "decoder": dec}


# ----------------------- float64 numpy reference -----------------------------

def _np64(x):
    return np.asarray(x, dtype=np.float64)


def reference_translate(params, enc_tokens):
    H = HID

    def sigmoid(v):
        return 1.0 / (1.0 + np.exp(-v))

    def cell(x, h, layer):
        wih_t, whh_t, bih, bhh = (_np64(p) for p in layer)
        gi = x @ wih_t + bih
        gh = h @ whh_t + bhh
        r = sigmoid(gi[:, :H] + gh[:, :H])
        z = sigmoid(gi[:, H:2 * H] + gh[:, H:2 * H])
        n = np.tanh(gi[:, 2 * H:] + r * gh[:, 2 * H:])
        return (1.0 - z) * n + z * h

    enc, dec = params["encoder"], params["decoder"]
    x_seq = _np64(enc["embedding"])[np.asarray(enc_tokens)]          # (S,E)
    h_final = []
    for l in range(NLAYERS):
        h = np.zeros((1, H))
        rows = []
        for t in range(SEQ):
            h = cell(x_seq[t:t + 1], h, enc["layers"][l])
            rows.append(h)
        x_seq = np.concatenate(rows, axis=0)
        h_final.append(h)
    h_enc = np.concatenate(h_final, axis=0)                          # (2,H)

    dec_emb = _np64(dec["embedding"])
    out_w, out_b = _np64(dec["out_w_t"]), _np64(dec["out_b"])
    gaps = []

    def dstep(tok, h0, h1):
        x = dec_emb[tok:tok + 1]
        h0 = cell(x, h0, dec["layers"][0])
        h1 = cell(h0, h1, dec["layers"][1])
        logits = (h1 @ out_w + out_b)[0]
        srt = np.sort(logits)
        gaps.append(float(srt[-1] - srt[-2]))
        return int(np.argmax(logits)), h0, h1

    h0, h1 = h_enc[0:1], h_enc[1:2]
    tok, h0, h1 = dstep(0, h0, h1)
    outs = []
    for _ in range(MAXLEN):
        pred, h0, h1 = dstep(tok, h0, h1)
        if pred == 1:
            break
        tok = pred
        outs.append(pred)
    return h_enc, outs, gaps


# --------------------------------- main ---------------------------------------

if __name__ == "__main__":
    key = jax.random.PRNGKey(0)
    k_param, k_x = jax.random.split(key)
    params = init_params(k_param)
    enc_tokens = jax.random.randint(k_x, (SEQ,), 0, ENC_WORD, dtype=jnp.int32)

    tokens, count, h_enc = translate_forward(params, enc_tokens)
    tokens = np.asarray(jax.block_until_ready(tokens)).reshape(-1)
    count = int(np.asarray(jax.block_until_ready(count))[0, 0])
    h_enc = np.asarray(jax.block_until_ready(h_enc))

    ref_h, ref_outs, ref_gaps = reference_translate(params, enc_tokens)

    # Encoder hidden state must match the float64 reference closely.
    np.testing.assert_allclose(h_enc, ref_h, rtol=2e-2, atol=2e-2)

    # Structural invariants of the greedy decode.
    assert 0 <= count <= MAXLEN
    emitted = tokens[:count]
    assert np.all((emitted >= 0) & (emitted < DEC_WORD)) and not np.any(emitted == 1)
    assert np.all(tokens[count:] == -1)

    # Token sequence should match the reference exactly unless the reference
    # itself had a near-tie somewhere (argmax is discontinuous under rounding).
    same = (count == len(ref_outs)
            and np.array_equal(emitted, np.asarray(ref_outs, np.int32)))
    if not same:
        assert min(ref_gaps) < 1e-2, (
            "decoded tokens diverge from reference with clear margins: "
            f"{emitted.tolist()} vs {ref_outs} (min top-2 gap {min(ref_gaps):.3e})")

    print("KERNEL_OK")
</pallas_src>

<mosaic_0001>
module attributes {stable_mosaic.version = 11 : i64} {
  func.func @_translate_kernel(%arg0: memref<8x1xi32, #tpu.memory_space<vmem>>, %arg1: memref<16x32xf32, #tpu.memory_space<vmem>>, %arg2: memref<32x96xf32, #tpu.memory_space<vmem>>, %arg3: memref<32x96xf32, #tpu.memory_space<vmem>>, %arg4: memref<1x96xf32, #tpu.memory_space<vmem>>, %arg5: memref<1x96xf32, #tpu.memory_space<vmem>>, %arg6: memref<32x96xf32, #tpu.memory_space<vmem>>, %arg7: memref<32x96xf32, #tpu.memory_space<vmem>>, %arg8: memref<1x96xf32, #tpu.memory_space<vmem>>, %arg9: memref<1x96xf32, #tpu.memory_space<vmem>>, %arg10: memref<16x32xf32, #tpu.memory_space<vmem>>, %arg11: memref<32x96xf32, #tpu.memory_space<vmem>>, %arg12: memref<32x96xf32, #tpu.memory_space<vmem>>, %arg13: memref<1x96xf32, #tpu.memory_space<vmem>>, %arg14: memref<1x96xf32, #tpu.memory_space<vmem>>, %arg15: memref<32x96xf32, #tpu.memory_space<vmem>>, %arg16: memref<32x96xf32, #tpu.memory_space<vmem>>, %arg17: memref<1x96xf32, #tpu.memory_space<vmem>>, %arg18: memref<1x96xf32, #tpu.memory_space<vmem>>, %arg19: memref<32x16xf32, #tpu.memory_space<vmem>>, %arg20: memref<1x16xf32, #tpu.memory_space<vmem>>, %arg21: memref<50x1xi32, #tpu.memory_space<vmem>>, %arg22: memref<1x1xi32, #tpu.memory_space<vmem>>, %arg23: memref<2x32xf32, #tpu.memory_space<vmem>>, %arg24: memref<8x32xf32, #tpu.memory_space<vmem>>) attributes {dimension_semantics = [], scalar_prefetch = 0 : i64, scratch_operands = 1 : i64, tpu.core_type = #tpu.core_type<tc>} {
    %c0 = arith.constant 0 : index
    %c0_0 = arith.constant 0 : index
    %0 = vector.load %arg0[%c0, %c0_0] : memref<8x1xi32, #tpu.memory_space<vmem>>, vector<8x1xi32>
    %1 = tpu.iota {dimensions = array<i32: 1>} : vector<8x16xi32>
    %2 = vector.broadcast %0 : vector<8x1xi32> to vector<8x16xi32>
    %3 = arith.cmpi eq, %1, %2 : vector<8x16xi32>
    %4 = arith.extui %3 : vector<8x16xi1> to vector<8x16xi32>
    %5 = arith.sitofp %4 : vector<8x16xi32> to vector<8x16xf32>
    %c0_1 = arith.constant 0 : index
    %c0_2 = arith.constant 0 : index
    %6 = vector.load %arg1[%c0_1, %c0_2] : memref<16x32xf32, #tpu.memory_space<vmem>>, vector<16x32xf32>
    %cst = arith.constant dense<0.000000e+00> : vector<8x32xf32>
    %7 = tpu.matmul %5, %6, %cst {dimension_numbers = #tpu.dot_dimension_numbers<[1], [0], [0], [1], [0, 0, 1, 1], [], []>, precision = #tpu.contract_precision<fp32>} : vector<8x16xf32>, vector<16x32xf32>, vector<8x32xf32> -> vector<8x32xf32>
    %c0_3 = arith.constant 0 : index
    %c0_4 = arith.constant 0 : index
    %8 = vector.load %arg2[%c0_3, %c0_4] : memref<32x96xf32, #tpu.memory_space<vmem>>, vector<32x96xf32>
    %c0_5 = arith.constant 0 : index
    %c0_6 = arith.constant 0 : index
    %9 = vector.load %arg3[%c0_5, %c0_6] : memref<32x96xf32, #tpu.memory_space<vmem>>, vector<32x96xf32>
    %c0_7 = arith.constant 0 : index
    %c0_8 = arith.constant 0 : index
    %10 = vector.load %arg4[%c0_7, %c0_8] : memref<1x96xf32, #tpu.memory_space<vmem>>, vector<1x96xf32>
    %c0_9 = arith.constant 0 : index
    %c0_10 = arith.constant 0 : index
    %11 = vector.load %arg5[%c0_9, %c0_10] : memref<1x96xf32, #tpu.memory_space<vmem>>, vector<1x96xf32>
    %cst_11 = arith.constant dense<0.000000e+00> : vector<8x96xf32>
    %12 = tpu.matmul %7, %8, %cst_11 {dimension_numbers = #tpu.dot_dimension_numbers<[1], [0], [0], [1], [0, 0, 1, 1], [], []>, precision = #tpu.contract_precision<fp32>} : vector<8x32xf32>, vector<32x96xf32>, vector<8x96xf32> -> vector<8x96xf32>
    %13 = vector.broadcast %10 : vector<1x96xf32> to vector<8x96xf32>
    %14 = arith.addf %12, %13 : vector<8x96xf32>
    %15 = vector.extract_strided_slice %14 {offsets = [0, 0], sizes = [8, 64], strides = [1, 1]} : vector<8x96xf32> to vector<8x64xf32>
    %16 = vector.extract_strided_slice %11 {offsets = [0, 0], sizes = [1, 64], strides = [1, 1]} : vector<1x96xf32> to vector<1x64xf32>
    %17 = vector.broadcast %16 : vector<1x64xf32> to vector<8x64xf32>
    %18 = arith.addf %15, %17 : vector<8x64xf32>
    %19 = vector.extract_strided_slice %14 {offsets = [0, 64], sizes = [8, 32], strides = [1, 1]} : vector<8x96xf32> to vector<8x32xf32>
    %20 = vector.extract_strided_slice %11 {offsets = [0, 64], sizes = [1, 32], strides = [1, 1]} : vector<1x96xf32> to vector<1x32xf32>
    %cst_12 = arith.constant 0.000000e+00 : f32
    %21 = vector.broadcast %cst_12 : f32 to vector<1x32xf32>
    %cst_13 = arith.constant dense<0.000000e+00> : vector<1x96xf32>
    %22 = tpu.matmul %21, %9, %cst_13 {dimension_numbers = #tpu.dot_dimension_numbers<[1], [0], [0], [1], [0, 0, 1, 1], [], []>, precision = #tpu.contract_precision<fp32>} : vector<1x32xf32>, vector<32x96xf32>, vector<1x96xf32> -> vector<1x96xf32>
    %23 = vector.extract_strided_slice %18 {offsets = [0, 0], sizes = [1, 64], strides = [1, 1]} : vector<8x64xf32> to vector<1x64xf32>
    %24 = vector.extract_strided_slice %22 {offsets = [0, 0], sizes = [1, 64], strides = [1, 1]} : vector<1x96xf32> to vector<1x64xf32>
    %25 = arith.addf %23, %24 : vector<1x64xf32>
    %26 = arith.negf %25 : vector<1x64xf32>
    %27 = math.exp %26 : vector<1x64xf32>
    %cst_14 = arith.constant 1.000000e+00 : f32
    %28 = vector.broadcast %cst_14 : f32 to vector<1x64xf32>
    %29 = arith.addf %28, %27 : vector<1x64xf32>
    %30 = arith.divf %28, %29 : vector<1x64xf32>
    %31 = vector.extract_strided_slice %30 {offsets = [0, 0], sizes = [1, 32], strides = [1, 1]} : vector<1x64xf32> to vector<1x32xf32>
    %32 = vector.extract_strided_slice %30 {offsets = [0, 32], sizes = [1, 32], strides = [1, 1]} : vector<1x64xf32> to vector<1x32xf32>
    %33 = vector.extract_strided_slice %19 {offsets = [0, 0], sizes = [1, 32], strides = [1, 1]} : vector<8x32xf32> to vector<1x32xf32>
    %34 = vector.extract_strided_slice %22 {offsets = [0, 64], sizes = [1, 32], strides = [1, 1]} : vector<1x96xf32> to vector<1x32xf32>
    %35 = arith.addf %34, %20 : vector<1x32xf32>
    %36 = arith.mulf %31, %35 : vector<1x32xf32>
    %37 = arith.addf %33, %36 : vector<1x32xf32>
    %38 = math.tanh %37 : vector<1x32xf32>
    %cst_15 = arith.constant 1.000000e+00 : f32
    %39 = vector.broadcast %cst_15 : f32 to vector<1x32xf32>
    %40 = arith.subf %39, %32 : vector<1x32xf32>
    %41 = arith.mulf %40, %38 : vector<1x32xf32>
    %42 = arith.mulf %32, %21 : vector<1x32xf32>
    %43 = arith.addf %41, %42 : vector<1x32xf32>
    %c0_16 = arith.constant 0 : index
    %c0_17 = arith.constant 0 : index
    %44 = vector.load %arg24[%c0_16, %c0_17] : memref<8x32xf32, #tpu.memory_space<vmem>>, vector<1x32xf32>
    tpu.vector_store %arg24[%c0_16, %c0_17], %43 {strides = array<i32>} : memref<8x32xf32, #tpu.memory_space<vmem>>, vector<1x32xf32>,
    %cst_18 = arith.constant dense<0.000000e+00> : vector<1x96xf32>
    %45 = tpu.matmul %43, %9, %cst_18 {dimension_numbers = #tpu.dot_dimension_numbers<[1], [0], [0], [1], [0, 0, 1, 1], [], []>, precision = #tpu.contract_precision<fp32>} : vector<1x32xf32>, vector<32x96xf32>, vector<1x96xf32> -> vector<1x96xf32>
    %46 = vector.extract_strided_slice %18 {offsets = [1, 0], sizes = [1, 64], strides = [1, 1]} : vector<8x64xf32> to vector<1x64xf32>
    %47 = vector.extract_strided_slice %45 {offsets = [0, 0], sizes = [1, 64], strides = [1, 1]} : vector<1x96xf32> to vector<1x64xf32>
    %48 = arith.addf %46, %47 : vector<1x64xf32>
    %49 = arith.negf %48 : vector<1x64xf32>
    %50 = math.exp %49 : vector<1x64xf32>
    %cst_19 = arith.constant 1.000000e+00 : f32
    %51 = vector.broadcast %cst_19 : f32 to vector<1x64xf32>
    %52 = arith.addf %51, %50 : vector<1x64xf32>
    %53 = arith.divf %51, %52 : vector<1x64xf32>
    %54 = vector.extract_strided_slice %53 {offsets = [0, 0], sizes = [1, 32], strides = [1, 1]} : vector<1x64xf32> to vector<1x32xf32>
    %55 = vector.extract_strided_slice %53 {offsets = [0, 32], sizes = [1, 32], strides = [1, 1]} : vector<1x64xf32> to vector<1x32xf32>
    %56 = vector.extract_strided_slice %19 {offsets = [1, 0], sizes = [1, 32], strides = [1, 1]} : vector<8x32xf32> to vector<1x32xf32>
    %57 = vector.extract_strided_slice %45 {offsets = [0, 64], sizes = [1, 32], strides = [1, 1]} : vector<1x96xf32> to vector<1x32xf32>
    %58 = arith.addf %57, %20 : vector<1x32xf32>
    %59 = arith.mulf %54, %58 : vector<1x32xf32>
    %60 = arith.addf %56, %59 : vector<1x32xf32>
    %61 = math.tanh %60 : vector<1x32xf32>
    %cst_20 = arith.constant 1.000000e+00 : f32
    %62 = vector.broadcast %cst_20 : f32 to vector<1x32xf32>
    %63 = arith.subf %62, %55 : vector<1x32xf32>
    %64 = arith.mulf %63, %61 : vector<1x32xf32>
    %65 = arith.mulf %55, %43 : vector<1x32xf32>
    %66 = arith.addf %64, %65 : vector<1x32xf32>
    %c1 = arith.constant 1 : index
    %c0_21 = arith.constant 0 : index
    %67 = vector.load %arg24[%c1, %c0_21] : memref<8x32xf32, #tpu.memory_space<vmem>>, vector<1x32xf32>
    tpu.vector_store %arg24[%c1, %c0_21], %66 {strides = array<i32>} : memref<8x32xf32, #tpu.memory_space<vmem>>, vector<1x32xf32>,
    %cst_22 = arith.constant dense<0.000000e+00> : vector<1x96xf32>
    %68 = tpu.matmul %66, %9, %cst_22 {dimension_numbers = #tpu.dot_dimension_numbers<[1], [0], [0], [1], [0, 0, 1, 1], [], []>, precision = #tpu.contract_precision<fp32>} : vector<1x32xf32>, vector<32x96xf32>, vector<1x96xf32> -> vector<1x96xf32>
    %69 = vector.extract_strided_slice %18 {offsets = [2, 0], sizes = [1, 64], strides = [1, 1]} : vector<8x64xf32> to vector<1x64xf32>
    %70 = vector.extract_strided_slice %68 {offsets = [0, 0], sizes = [1, 64], strides = [1, 1]} : vector<1x96xf32> to vector<1x64xf32>
    %71 = arith.addf %69, %70 : vector<1x64xf32>
    %72 = arith.negf %71 : vector<1x64xf32>
    %73 = math.exp %72 : vector<1x64xf32>
    %cst_23 = arith.constant 1.000000e+00 : f32
    %74 = vector.broadcast %cst_23 : f32 to vector<1x64xf32>
    %75 = arith.addf %74, %73 : vector<1x64xf32>
    %76 = arith.divf %74, %75 : vector<1x64xf32>
    %77 = vector.extract_strided_slice %76 {offsets = [0, 0], sizes = [1, 32], strides = [1, 1]} : vector<1x64xf32> to vector<1x32xf32>
    %78 = vector.extract_strided_slice %76 {offsets = [0, 32], sizes = [1, 32], strides = [1, 1]} : vector<1x64xf32> to vector<1x32xf32>
    %79 = vector.extract_strided_slice %19 {offsets = [2, 0], sizes = [1, 32], strides = [1, 1]} : vector<8x32xf32> to vector<1x32xf32>
    %80 = vector.extract_strided_slice %68 {offsets = [0, 64], sizes = [1, 32], strides = [1, 1]} : vector<1x96xf32> to vector<1x32xf32>
    %81 = arith.addf %80, %20 : vector<1x32xf32>
    %82 = arith.mulf %77, %81 : vector<1x32xf32>
    %83 = arith.addf %79, %82 : vector<1x32xf32>
    %84 = math.tanh %83 : vector<1x32xf32>
    %cst_24 = arith.constant 1.000000e+00 : f32
    %85 = vector.broadcast %cst_24 : f32 to vector<1x32xf32>
    %86 = arith.subf %85, %78 : vector<1x32xf32>
    %87 = arith.mulf %86, %84 : vector<1x32xf32>
    %88 = arith.mulf %78, %66 : vector<1x32xf32>
    %89 = arith.addf %87, %88 : vector<1x32xf32>
    %c2 = arith.constant 2 : index
    %c0_25 = arith.constant 0 : index
    %90 = vector.load %arg24[%c2, %c0_25] : memref<8x32xf32, #tpu.memory_space<vmem>>, vector<1x32xf32>
    tpu.vector_store %arg24[%c2, %c0_25], %89 {strides = array<i32>} : memref<8x32xf32, #tpu.memory_space<vmem>>, vector<1x32xf32>,
    %cst_26 = arith.constant dense<0.000000e+00> : vector<1x96xf32>
    %91 = tpu.matmul %89, %9, %cst_26 {dimension_numbers = #tpu.dot_dimension_numbers<[1], [0], [0], [1], [0, 0, 1, 1], [], []>, precision = #tpu.contract_precision<fp32>} : vector<1x32xf32>, vector<32x96xf32>, vector<1x96xf32> -> vector<1x96xf32>
    %92 = vector.extract_strided_slice %18 {offsets = [3, 0], sizes = [1, 64], strides = [1, 1]} : vector<8x64xf32> to vector<1x64xf32>
    %93 = vector.extract_strided_slice %91 {offsets = [0, 0], sizes = [1, 64], strides = [1, 1]} : vector<1x96xf32> to vector<1x64xf32>
    %94 = arith.addf %92, %93 : vector<1x64xf32>
    %95 = arith.negf %94 : vector<1x64xf32>
    %96 = math.exp %95 : vector<1x64xf32>
    %cst_27 = arith.constant 1.000000e+00 : f32
    %97 = vector.broadcast %cst_27 : f32 to vector<1x64xf32>
    %98 = arith.addf %97, %96 : vector<1x64xf32>
    %99 = arith.divf %97, %98 : vector<1x64xf32>
    %100 = vector.extract_strided_slice %99 {offsets = [0, 0], sizes = [1, 32], strides = [1, 1]} : vector<1x64xf32> to vector<1x32xf32>
    %101 = vector.extract_strided_slice %99 {offsets = [0, 32], sizes = [1, 32], strides = [1, 1]} : vector<1x64xf32> to vector<1x32xf32>
    %102 = vector.extract_strided_slice %19 {offsets = [3, 0], sizes = [1, 32], strides = [1, 1]} : vector<8x32xf32> to vector<1x32xf32>
    %103 = vector.extract_strided_slice %91 {offsets = [0, 64], sizes = [1, 32], strides = [1, 1]} : vector<1x96xf32> to vector<1x32xf32>
    %104 = arith.addf %103, %20 : vector<1x32xf32>
    %105 = arith.mulf %100, %104 : vector<1x32xf32>
    %106 = arith.addf %102, %105 : vector<1x32xf32>
    %107 = math.tanh %106 : vector<1x32xf32>
    %cst_28 = arith.constant 1.000000e+00 : f32
    %108 = vector.broadcast %cst_28 : f32 to vector<1x32xf32>
    %109 = arith.subf %108, %101 : vector<1x32xf32>
    %110 = arith.mulf %109, %107 : vector<1x32xf32>
    %111 = arith.mulf %101, %89 : vector<1x32xf32>
    %112 = arith.addf %110, %111 : vector<1x32xf32>
    %c3 = arith.constant 3 : index
    %c0_29 = arith.constant 0 : index
    %113 = vector.load %arg24[%c3, %c0_29] : memref<8x32xf32, #tpu.memory_space<vmem>>, vector<1x32xf32>
    tpu.vector_store %arg24[%c3, %c0_29], %112 {strides = array<i32>} : memref<8x32xf32, #tpu.memory_space<vmem>>, vector<1x32xf32>,
    %cst_30 = arith.constant dense<0.000000e+00> : vector<1x96xf32>
    %114 = tpu.matmul %112, %9, %cst_30 {dimension_numbers = #tpu.dot_dimension_numbers<[1], [0], [0], [1], [0, 0, 1, 1], [], []>, precision = #tpu.contract_precision<fp32>} : vector<1x32xf32>, vector<32x96xf32>, vector<1x96xf32> -> vector<1x96xf32>
    %115 = vector.extract_strided_slice %18 {offsets = [4, 0], sizes = [1, 64], strides = [1, 1]} : vector<8x64xf32> to vector<1x64xf32>
    %116 = vector.extract_strided_slice %114 {offsets = [0, 0], sizes = [1, 64], strides = [1, 1]} : vector<1x96xf32> to vector<1x64xf32>
    %117 = arith.addf %115, %116 : vector<1x64xf32>
    %118 = arith.negf %117 : vector<1x64xf32>
    %119 = math.exp %118 : vector<1x64xf32>
    %cst_31 = arith.constant 1.000000e+00 : f32
    %120 = vector.broadcast %cst_31 : f32 to vector<1x64xf32>
    %121 = arith.addf %120, %119 : vector<1x64xf32>
    %122 = arith.divf %120, %121 : vector<1x64xf32>
    %123 = vector.extract_strided_slice %122 {offsets = [0, 0], sizes = [1, 32], strides = [1, 1]} : vector<1x64xf32> to vector<1x32xf32>
    %124 = vector.extract_strided_slice %122 {offsets = [0, 32], sizes = [1, 32], strides = [1, 1]} : vector<1x64xf32> to vector<1x32xf32>
    %125 = vector.extract_strided_slice %19 {offsets = [4, 0], sizes = [1, 32], strides = [1, 1]} : vector<8x32xf32> to vector<1x32xf32>
    %126 = vector.extract_strided_slice %114 {offsets = [0, 64], sizes = [1, 32], strides = [1, 1]} : vector<1x96xf32> to vector<1x32xf32>
    %127 = arith.addf %126, %20 : vector<1x32xf32>
    %128 = arith.mulf %123, %127 : vector<1x32xf32>
    %129 = arith.addf %125, %128 : vector<1x32xf32>
    %130 = math.tanh %129 : vector<1x32xf32>
    %cst_32 = arith.constant 1.000000e+00 : f32
    %131 = vector.broadcast %cst_32 : f32 to vector<1x32xf32>
    %132 = arith.subf %131, %124 : vector<1x32xf32>
    %133 = arith.mulf %132, %130 : vector<1x32xf32>
    %134 = arith.mulf %124, %112 : vector<1x32xf32>
    %135 = arith.addf %133, %134 : vector<1x32xf32>
    %c4 = arith.constant 4 : index
    %c0_33 = arith.constant 0 : index
    %136 = vector.load %arg24[%c4, %c0_33] : memref<8x32xf32, #tpu.memory_space<vmem>>, vector<1x32xf32>
    tpu.vector_store %arg24[%c4, %c0_33], %135 {strides = array<i32>} : memref<8x32xf32, #tpu.memory_space<vmem>>, vector<1x32xf32>,
    %cst_34 = arith.constant dense<0.000000e+00> : vector<1x96xf32>
    %137 = tpu.matmul %135, %9, %cst_34 {dimension_numbers = #tpu.dot_dimension_numbers<[1], [0], [0], [1], [0, 0, 1, 1], [], []>, precision = #tpu.contract_precision<fp32>} : vector<1x32xf32>, vector<32x96xf32>, vector<1x96xf32> -> vector<1x96xf32>
    %138 = vector.extract_strided_slice %18 {offsets = [5, 0], sizes = [1, 64], strides = [1, 1]} : vector<8x64xf32> to vector<1x64xf32>
    %139 = vector.extract_strided_slice %137 {offsets = [0, 0], sizes = [1, 64], strides = [1, 1]} : vector<1x96xf32> to vector<1x64xf32>
    %140 = arith.addf %138, %139 : vector<1x64xf32>
    %141 = arith.negf %140 : vector<1x64xf32>
    %142 = math.exp %141 : vector<1x64xf32>
    %cst_35 = arith.constant 1.000000e+00 : f32
    %143 = vector.broadcast %cst_35 : f32 to vector<1x64xf32>
    %144 = arith.addf %143, %142 : vector<1x64xf32>
    %145 = arith.divf %143, %144 : vector<1x64xf32>
    %146 = vector.extract_strided_slice %145 {offsets = [0, 0], sizes = [1, 32], strides = [1, 1]} : vector<1x64xf32> to vector<1x32xf32>
    %147 = vector.extract_strided_slice %145 {offsets = [0, 32], sizes = [1, 32], strides = [1, 1]} : vector<1x64xf32> to vector<1x32xf32>
    %148 = vector.extract_strided_slice %19 {offsets = [5, 0], sizes = [1, 32], strides = [1, 1]} : vector<8x32xf32> to vector<1x32xf32>
    %149 = vector.extract_strided_slice %137 {offsets = [0, 64], sizes = [1, 32], strides = [1, 1]} : vector<1x96xf32> to vector<1x32xf32>
    %150 = arith.addf %149, %20 : vector<1x32xf32>
    %151 = arith.mulf %146, %150 : vector<1x32xf32>
    %152 = arith.addf %148, %151 : vector<1x32xf32>
    %153 = math.tanh %152 : vector<1x32xf32>
    %cst_36 = arith.constant 1.000000e+00 : f32
    %154 = vector.broadcast %cst_36 : f32 to vector<1x32xf32>
    %155 = arith.subf %154, %147 : vector<1x32xf32>
    %156 = arith.mulf %155, %153 : vector<1x32xf32>
    %157 = arith.mulf %147, %135 : vector<1x32xf32>
    %158 = arith.addf %156, %157 : vector<1x32xf32>
    %c5 = arith.constant 5 : index
    %c0_37 = arith.constant 0 : index
    %159 = vector.load %arg24[%c5, %c0_37] : memref<8x32xf32, #tpu.memory_space<vmem>>, vector<1x32xf32>
    tpu.vector_store %arg24[%c5, %c0_37], %158 {strides = array<i32>} : memref<8x32xf32, #tpu.memory_space<vmem>>, vector<1x32xf32>,
    %cst_38 = arith.constant dense<0.000000e+00> : vector<1x96xf32>
    %160 = tpu.matmul %158, %9, %cst_38 {dimension_numbers = #tpu.dot_dimension_numbers<[1], [0], [0], [1], [0, 0, 1, 1], [], []>, precision = #tpu.contract_precision<fp32>} : vector<1x32xf32>, vector<32x96xf32>, vector<1x96xf32> -> vector<1x96xf32>
    %161 = vector.extract_strided_slice %18 {offsets = [6, 0], sizes = [1, 64], strides = [1, 1]} : vector<8x64xf32> to vector<1x64xf32>
    %162 = vector.extract_strided_slice %160 {offsets = [0, 0], sizes = [1, 64], strides = [1, 1]} : vector<1x96xf32> to vector<1x64xf32>
    %163 = arith.addf %161, %162 : vector<1x64xf32>
    %164 = arith.negf %163 : vector<1x64xf32>
    %165 = math.exp %164 : vector<1x64xf32>
    %cst_39 = arith.constant 1.000000e+00 : f32
    %166 = vector.broadcast %cst_39 : f32 to vector<1x64xf32>
    %167 = arith.addf %166, %165 : vector<1x64xf32>
    %168 = arith.divf %166, %167 : vector<1x64xf32>
    %169 = vector.extract_strided_slice %168 {offsets = [0, 0], sizes = [1, 32], strides = [1, 1]} : vector<1x64xf32> to vector<1x32xf32>
    %170 = vector.extract_strided_slice %168 {offsets = [0, 32], sizes = [1, 32], strides = [1, 1]} : vector<1x64xf32> to vector<1x32xf32>
    %171 = vector.extract_strided_slice %19 {offsets = [6, 0], sizes = [1, 32], strides = [1, 1]} : vector<8x32xf32> to vector<1x32xf32>
    %172 = vector.extract_strided_slice %160 {offsets = [0, 64], sizes = [1, 32], strides = [1, 1]} : vector<1x96xf32> to vector<1x32xf32>
    %173 = arith.addf %172, %20 : vector<1x32xf32>
    %174 = arith.mulf %169, %173 : vector<1x32xf32>
    %175 = arith.addf %171, %174 : vector<1x32xf32>
    %176 = math.tanh %175 : vector<1x32xf32>
    %cst_40 = arith.constant 1.000000e+00 : f32
    %177 = vector.broadcast %cst_40 : f32 to vector<1x32xf32>
    %178 = arith.subf %177, %170 : vector<1x32xf32>
    %179 = arith.mulf %178, %176 : vector<1x32xf32>
    %180 = arith.mulf %170, %158 : vector<1x32xf32>
    %181 = arith.addf %179, %180 : vector<1x32xf32>
    %c6 = arith.constant 6 : index
    %c0_41 = arith.constant 0 : index
    %182 = vector.load %arg24[%c6, %c0_41] : memref<8x32xf32, #tpu.memory_space<vmem>>, vector<1x32xf32>
    tpu.vector_store %arg24[%c6, %c0_41], %181 {strides = array<i32>} : memref<8x32xf32, #tpu.memory_space<vmem>>, vector<1x32xf32>,
    %cst_42 = arith.constant dense<0.000000e+00> : vector<1x96xf32>
    %183 = tpu.matmul %181, %9, %cst_42 {dimension_numbers = #tpu.dot_dimension_numbers<[1], [0], [0], [1], [0, 0, 1, 1], [], []>, precision = #tpu.contract_precision<fp32>} : vector<1x32xf32>, vector<32x96xf32>, vector<1x96xf32> -> vector<1x96xf32>
    %184 = vector.extract_strided_slice %18 {offsets = [7, 0], sizes = [1, 64], strides = [1, 1]} : vector<8x64xf32> to vector<1x64xf32>
    %185 = vector.extract_strided_slice %183 {offsets = [0, 0], sizes = [1, 64], strides = [1, 1]} : vector<1x96xf32> to vector<1x64xf32>
    %186 = arith.addf %184, %185 : vector<1x64xf32>
    %187 = arith.negf %186 : vector<1x64xf32>
    %188 = math.exp %187 : vector<1x64xf32>
    %cst_43 = arith.constant 1.000000e+00 : f32
    %189 = vector.broadcast %cst_43 : f32 to vector<1x64xf32>
    %190 = arith.addf %189, %188 : vector<1x64xf32>
    %191 = arith.divf %189, %190 : vector<1x64xf32>
    %192 = vector.extract_strided_slice %191 {offsets = [0, 0], sizes = [1, 32], strides = [1, 1]} : vector<1x64xf32> to vector<1x32xf32>
    %193 = vector.extract_strided_slice %191 {offsets = [0, 32], sizes = [1, 32], strides = [1, 1]} : vector<1x64xf32> to vector<1x32xf32>
    %194 = vector.extract_strided_slice %19 {offsets = [7, 0], sizes = [1, 32], strides = [1, 1]} : vector<8x32xf32> to vector<1x32xf32>
    %195 = vector.extract_strided_slice %183 {offsets = [0, 64], sizes = [1, 32], strides = [1, 1]} : vector<1x96xf32> to vector<1x32xf32>
    %196 = arith.addf %195, %20 : vector<1x32xf32>
    %197 = arith.mulf %192, %196 : vector<1x32xf32>
    %198 = arith.addf %194, %197 : vector<1x32xf32>
    %199 = math.tanh %198 : vector<1x32xf32>
    %cst_44 = arith.constant 1.000000e+00 : f32
    %200 = vector.broadcast %cst_44 : f32 to vector<1x32xf32>
    %201 = arith.subf %200, %193 : vector<1x32xf32>
    %202 = arith.mulf %201, %199 : vector<1x32xf32>
    %203 = arith.mulf %193, %181 : vector<1x32xf32>
    %204 = arith.addf %202, %203 : vector<1x32xf32>
    %c7 = arith.constant 7 : index
    %c0_45 = arith.constant 0 : index
    %205 = vector.load %arg24[%c7, %c0_45] : memref<8x32xf32, #tpu.memory_space<vmem>>, vector<1x32xf32>
    tpu.vector_store %arg24[%c7, %c0_45], %204 {strides = array<i32>} : memref<8x32xf32, #tpu.memory_space<vmem>>, vector<1x32xf32>,
    %c0_46 = arith.constant 0 : index
    %c0_47 = arith.constant 0 : index
    %206 = vector.load %arg24[%c0_46, %c0_47] : memref<8x32xf32, #tpu.memory_space<vmem>>, vector<8x32xf32>
    %c0_48 = arith.constant 0 : index
    %c0_49 = arith.constant 0 : index
    %207 = vector.load %arg6[%c0_48, %c0_49] : memref<32x96xf32, #tpu.memory_space<vmem>>, vector<32x96xf32>
    %c0_50 = arith.constant 0 : index
    %c0_51 = arith.constant 0 : index
    %208 = vector.load %arg7[%c0_50, %c0_51] : memref<32x96xf32, #tpu.memory_space<vmem>>, vector<32x96xf32>
    %c0_52 = arith.constant 0 : index
    %c0_53 = arith.constant 0 : index
    %209 = vector.load %arg8[%c0_52, %c0_53] : memref<1x96xf32, #tpu.memory_space<vmem>>, vector<1x96xf32>
    %c0_54 = arith.constant 0 : index
    %c0_55 = arith.constant 0 : index
    %210 = vector.load %arg9[%c0_54, %c0_55] : memref<1x96xf32, #tpu.memory_space<vmem>>, vector<1x96xf32>
    %cst_56 = arith.constant dense<0.000000e+00> : vector<8x96xf32>
    %211 = tpu.matmul %206, %207, %cst_56 {dimension_numbers = #tpu.dot_dimension_numbers<[1], [0], [0], [1], [0, 0, 1, 1], [], []>, precision = #tpu.contract_precision<fp32>} : vector<8x32xf32>, vector<32x96xf32>, vector<8x96xf32> -> vector<8x96xf32>
    %212 = vector.broadcast %209 : vector<1x96xf32> to vector<8x96xf32>
    %213 = arith.addf %211, %212 : vector<8x96xf32>
    %214 = vector.extract_strided_slice %213 {offsets = [0, 0], sizes = [8, 64], strides = [1, 1]} : vector<8x96xf32> to vector<8x64xf32>
    %215 = vector.extract_strided_slice %210 {offsets = [0, 0], sizes = [1, 64], strides = [1, 1]} : vector<1x96xf32> to vector<1x64xf32>
    %216 = vector.broadcast %215 : vector<1x64xf32> to vector<8x64xf32>
    %217 = arith.addf %214, %216 : vector<8x64xf32>
    %218 = vector.extract_strided_slice %213 {offsets = [0, 64], sizes = [8, 32], strides = [1, 1]} : vector<8x96xf32> to vector<8x32xf32>
    %219 = vector.extract_strided_slice %210 {offsets = [0, 64], sizes = [1, 32], strides = [1, 1]} : vector<1x96xf32> to vector<1x32xf32>
    %cst_57 = arith.constant 0.000000e+00 : f32
    %220 = vector.broadcast %cst_57 : f32 to vector<1x32xf32>
    %cst_58 = arith.constant dense<0.000000e+00> : vector<1x96xf32>
    %221 = tpu.matmul %220, %208, %cst_58 {dimension_numbers = #tpu.dot_dimension_numbers<[1], [0], [0], [1], [0, 0, 1, 1], [], []>, precision = #tpu.contract_precision<fp32>} : vector<1x32xf32>, vector<32x96xf32>, vector<1x96xf32> -> vector<1x96xf32>
    %222 = vector.extract_strided_slice %217 {offsets = [0, 0], sizes = [1, 64], strides = [1, 1]} : vector<8x64xf32> to vector<1x64xf32>
    %223 = vector.extract_strided_slice %221 {offsets = [0, 0], sizes = [1, 64], strides = [1, 1]} : vector<1x96xf32> to vector<1x64xf32>
    %224 = arith.addf %222, %223 : vector<1x64xf32>
    %225 = arith.negf %224 : vector<1x64xf32>
    %226 = math.exp %225 : vector<1x64xf32>
    %cst_59 = arith.constant 1.000000e+00 : f32
    %227 = vector.broadcast %cst_59 : f32 to vector<1x64xf32>
    %228 = arith.addf %227, %226 : vector<1x64xf32>
    %229 = arith.divf %227, %228 : vector<1x64xf32>
    %230 = vector.extract_strided_slice %229 {offsets = [0, 0], sizes = [1, 32], strides = [1, 1]} : vector<1x64xf32> to vector<1x32xf32>
    %231 = vector.extract_strided_slice %229 {offsets = [0, 32], sizes = [1, 32], strides = [1, 1]} : vector<1x64xf32> to vector<1x32xf32>
    %232 = vector.extract_strided_slice %218 {offsets = [0, 0], sizes = [1, 32], strides = [1, 1]} : vector<8x32xf32> to vector<1x32xf32>
    %233 = vector.extract_strided_slice %221 {offsets = [0, 64], sizes = [1, 32], strides = [1, 1]} : vector<1x96xf32> to vector<1x32xf32>
    %234 = arith.addf %233, %219 : vector<1x32xf32>
    %235 = arith.mulf %230, %234 : vector<1x32xf32>
    %236 = arith.addf %232, %235 : vector<1x32xf32>
    %237 = math.tanh %236 : vector<1x32xf32>
    %cst_60 = arith.constant 1.000000e+00 : f32
    %238 = vector.broadcast %cst_60 : f32 to vector<1x32xf32>
    %239 = arith.subf %238, %231 : vector<1x32xf32>
    %240 = arith.mulf %239, %237 : vector<1x32xf32>
    %241 = arith.mulf %231, %220 : vector<1x32xf32>
    %242 = arith.addf %240, %241 : vector<1x32xf32>
    %cst_61 = arith.constant dense<0.000000e+00> : vector<1x96xf32>
    %243 = tpu.matmul %242, %208, %cst_61 {dimension_numbers = #tpu.dot_dimension_numbers<[1], [0], [0], [1], [0, 0, 1, 1], [], []>, precision = #tpu.contract_precision<fp32>} : vector<1x32xf32>, vector<32x96xf32>, vector<1x96xf32> -> vector<1x96xf32>
    %244 = vector.extract_strided_slice %217 {offsets = [1, 0], sizes = [1, 64], strides = [1, 1]} : vector<8x64xf32> to vector<1x64xf32>
    %245 = vector.extract_strided_slice %243 {offsets = [0, 0], sizes = [1, 64], strides = [1, 1]} : vector<1x96xf32> to vector<1x64xf32>
    %246 = arith.addf %244, %245 : vector<1x64xf32>
    %247 = arith.negf %246 : vector<1x64xf32>
    %248 = math.exp %247 : vector<1x64xf32>
    %cst_62 = arith.constant 1.000000e+00 : f32
    %249 = vector.broadcast %cst_62 : f32 to vector<1x64xf32>
    %250 = arith.addf %249, %248 : vector<1x64xf32>
    %251 = arith.divf %249, %250 : vector<1x64xf32>
    %252 = vector.extract_strided_slice %251 {offsets = [0, 0], sizes = [1, 32], strides = [1, 1]} : vector<1x64xf32> to vector<1x32xf32>
    %253 = vector.extract_strided_slice %251 {offsets = [0, 32], sizes = [1, 32], strides = [1, 1]} : vector<1x64xf32> to vector<1x32xf32>
    %254 = vector.extract_strided_slice %218 {offsets = [1, 0], sizes = [1, 32], strides = [1, 1]} : vector<8x32xf32> to vector<1x32xf32>
    %255 = vector.extract_strided_slice %243 {offsets = [0, 64], sizes = [1, 32], strides = [1, 1]} : vector<1x96xf32> to vector<1x32xf32>
    %256 = arith.addf %255, %219 : vector<1x32xf32>
    %257 = arith.mulf %252, %256 : vector<1x32xf32>
    %258 = arith.addf %254, %257 : vector<1x32xf32>
    %259 = math.tanh %258 : vector<1x32xf32>
    %cst_63 = arith.constant 1.000000e+00 : f32
    %260 = vector.broadcast %cst_63 : f32 to vector<1x32xf32>
    %261 = arith.subf %260, %253 : vector<1x32xf32>
    %262 = arith.mulf %261, %259 : vector<1x32xf32>
    %263 = arith.mulf %253, %242 : vector<1x32xf32>
    %264 = arith.addf %262, %263 : vector<1x32xf32>
    %cst_64 = arith.constant dense<0.000000e+00> : vector<1x96xf32>
    %265 = tpu.matmul %264, %208, %cst_64 {dimension_numbers = #tpu.dot_dimension_numbers<[1], [0], [0], [1], [0, 0, 1, 1], [], []>, precision = #tpu.contract_precision<fp32>} : vector<1x32xf32>, vector<32x96xf32>, vector<1x96xf32> -> vector<1x96xf32>
    %266 = vector.extract_strided_slice %217 {offsets = [2, 0], sizes = [1, 64], strides = [1, 1]} : vector<8x64xf32> to vector<1x64xf32>
    %267 = vector.extract_strided_slice %265 {offsets = [0, 0], sizes = [1, 64], strides = [1, 1]} : vector<1x96xf32> to vector<1x64xf32>
    %268 = arith.addf %266, %267 : vector<1x64xf32>
    %269 = arith.negf %268 : vector<1x64xf32>
    %270 = math.exp %269 : vector<1x64xf32>
    %cst_65 = arith.constant 1.000000e+00 : f32
    %271 = vector.broadcast %cst_65 : f32 to vector<1x64xf32>
    %272 = arith.addf %271, %270 : vector<1x64xf32>
    %273 = arith.divf %271, %272 : vector<1x64xf32>
    %274 = vector.extract_strided_slice %273 {offsets = [0, 0], sizes = [1, 32], strides = [1, 1]} : vector<1x64xf32> to vector<1x32xf32>
    %275 = vector.extract_strided_slice %273 {offsets = [0, 32], sizes = [1, 32], strides = [1, 1]} : vector<1x64xf32> to vector<1x32xf32>
    %276 = vector.extract_strided_slice %218 {offsets = [2, 0], sizes = [1, 32], strides = [1, 1]} : vector<8x32xf32> to vector<1x32xf32>
    %277 = vector.extract_strided_slice %265 {offsets = [0, 64], sizes = [1, 32], strides = [1, 1]} : vector<1x96xf32> to vector<1x32xf32>
    %278 = arith.addf %277, %219 : vector<1x32xf32>
    %279 = arith.mulf %274, %278 : vector<1x32xf32>
    %280 = arith.addf %276, %279 : vector<1x32xf32>
    %281 = math.tanh %280 : vector<1x32xf32>
    %cst_66 = arith.constant 1.000000e+00 : f32
    %282 = vector.broadcast %cst_66 : f32 to vector<1x32xf32>
    %283 = arith.subf %282, %275 : vector<1x32xf32>
    %284 = arith.mulf %283, %281 : vector<1x32xf32>
    %285 = arith.mulf %275, %264 : vector<1x32xf32>
    %286 = arith.addf %284, %285 : vector<1x32xf32>
    %cst_67 = arith.constant dense<0.000000e+00> : vector<1x96xf32>
    %287 = tpu.matmul %286, %208, %cst_67 {dimension_numbers = #tpu.dot_dimension_numbers<[1], [0], [0], [1], [0, 0, 1, 1], [], []>, precision = #tpu.contract_precision<fp32>} : vector<1x32xf32>, vector<32x96xf32>, vector<1x96xf32> -> vector<1x96xf32>
    %288 = vector.extract_strided_slice %217 {offsets = [3, 0], sizes = [1, 64], strides = [1, 1]} : vector<8x64xf32> to vector<1x64xf32>
    %289 = vector.extract_strided_slice %287 {offsets = [0, 0], sizes = [1, 64], strides = [1, 1]} : vector<1x96xf32> to vector<1x64xf32>
    %290 = arith.addf %288, %289 : vector<1x64xf32>
    %291 = arith.negf %290 : vector<1x64xf32>
    %292 = math.exp %291 : vector<1x64xf32>
    %cst_68 = arith.constant 1.000000e+00 : f32
    %293 = vector.broadcast %cst_68 : f32 to vector<1x64xf32>
    %294 = arith.addf %293, %292 : vector<1x64xf32>
    %295 = arith.divf %293, %294 : vector<1x64xf32>
    %296 = vector.extract_strided_slice %295 {offsets = [0, 0], sizes = [1, 32], strides = [1, 1]} : vector<1x64xf32> to vector<1x32xf32>
    %297 = vector.extract_strided_slice %295 {offsets = [0, 32], sizes = [1, 32], strides = [1, 1]} : vector<1x64xf32> to vector<1x32xf32>
    %298 = vector.extract_strided_slice %218 {offsets = [3, 0], sizes = [1, 32], strides = [1, 1]} : vector<8x32xf32> to vector<1x32xf32>
    %299 = vector.extract_strided_slice %287 {offsets = [0, 64], sizes = [1, 32], strides = [1, 1]} : vector<1x96xf32> to vector<1x32xf32>
    %300 = arith.addf %299, %219 : vector<1x32xf32>
    %301 = arith.mulf %296, %300 : vector<1x32xf32>
    %302 = arith.addf %298, %301 : vector<1x32xf32>
    %303 = math.tanh %302 : vector<1x32xf32>
    %cst_69 = arith.constant 1.000000e+00 : f32
    %304 = vector.broadcast %cst_69 : f32 to vector<1x32xf32>
    %305 = arith.subf %304, %297 : vector<1x32xf32>
    %306 = arith.mulf %305, %303 : vector<1x32xf32>
    %307 = arith.mulf %297, %286 : vector<1x32xf32>
    %308 = arith.addf %306, %307 : vector<1x32xf32>
    %cst_70 = arith.constant dense<0.000000e+00> : vector<1x96xf32>
    %309 = tpu.matmul %308, %208, %cst_70 {dimension_numbers = #tpu.dot_dimension_numbers<[1], [0], [0], [1], [0, 0, 1, 1], [], []>, precision = #tpu.contract_precision<fp32>} : vector<1x32xf32>, vector<32x96xf32>, vector<1x96xf32> -> vector<1x96xf32>
    %310 = vector.extract_strided_slice %217 {offsets = [4, 0], sizes = [1, 64], strides = [1, 1]} : vector<8x64xf32> to vector<1x64xf32>
    %311 = vector.extract_strided_slice %309 {offsets = [0, 0], sizes = [1, 64], strides = [1, 1]} : vector<1x96xf32> to vector<1x64xf32>
    %312 = arith.addf %310, %311 : vector<1x64xf32>
    %313 = arith.negf %312 : vector<1x64xf32>
    %314 = math.exp %313 : vector<1x64xf32>
    %cst_71 = arith.constant 1.000000e+00 : f32
    %315 = vector.broadcast %cst_71 : f32 to vector<1x64xf32>
    %316 = arith.addf %315, %314 : vector<1x64xf32>
    %317 = arith.divf %315, %316 : vector<1x64xf32>
    %318 = vector.extract_strided_slice %317 {offsets = [0, 0], sizes = [1, 32], strides = [1, 1]} : vector<1x64xf32> to vector<1x32xf32>
    %319 = vector.extract_strided_slice %317 {offsets = [0, 32], sizes = [1, 32], strides = [1, 1]} : vector<1x64xf32> to vector<1x32xf32>
    %320 = vector.extract_strided_slice %218 {offsets = [4, 0], sizes = [1, 32], strides = [1, 1]} : vector<8x32xf32> to vector<1x32xf32>
    %321 = vector.extract_strided_slice %309 {offsets = [0, 64], sizes = [1, 32], strides = [1, 1]} : vector<1x96xf32> to vector<1x32xf32>
    %322 = arith.addf %321, %219 : vector<1x32xf32>
    %323 = arith.mulf %318, %322 : vector<1x32xf32>
    %324 = arith.addf %320, %323 : vector<1x32xf32>
    %325 = math.tanh %324 : vector<1x32xf32>
    %cst_72 = arith.constant 1.000000e+00 : f32
    %326 = vector.broadcast %cst_72 : f32 to vector<1x32xf32>
    %327 = arith.subf %326, %319 : vector<1x32xf32>
    %328 = arith.mulf %327, %325 : vector<1x32xf32>
    %329 = arith.mulf %319, %308 : vector<1x32xf32>
    %330 = arith.addf %328, %329 : vector<1x32xf32>
    %cst_73 = arith.constant dense<0.000000e+00> : vector<1x96xf32>
    %331 = tpu.matmul %330, %208, %cst_73 {dimension_numbers = #tpu.dot_dimension_numbers<[1], [0], [0], [1], [0, 0, 1, 1], [], []>, precision = #tpu.contract_precision<fp32>} : vector<1x32xf32>, vector<32x96xf32>, vector<1x96xf32> -> vector<1x96xf32>
    %332 = vector.extract_strided_slice %217 {offsets = [5, 0], sizes = [1, 64], strides = [1, 1]} : vector<8x64xf32> to vector<1x64xf32>
    %333 = vector.extract_strided_slice %331 {offsets = [0, 0], sizes = [1, 64], strides = [1, 1]} : vector<1x96xf32> to vector<1x64xf32>
    %334 = arith.addf %332, %333 : vector<1x64xf32>
    %335 = arith.negf %334 : vector<1x64xf32>
    %336 = math.exp %335 : vector<1x64xf32>
    %cst_74 = arith.constant 1.000000e+00 : f32
    %337 = vector.broadcast %cst_74 : f32 to vector<1x64xf32>
    %338 = arith.addf %337, %336 : vector<1x64xf32>
    %339 = arith.divf %337, %338 : vector<1x64xf32>
    %340 = vector.extract_strided_slice %339 {offsets = [0, 0], sizes = [1, 32], strides = [1, 1]} : vector<1x64xf32> to vector<1x32xf32>
    %341 = vector.extract_strided_slice %339 {offsets = [0, 32], sizes = [1, 32], strides = [1, 1]} : vector<1x64xf32> to vector<1x32xf32>
    %342 = vector.extract_strided_slice %218 {offsets = [5, 0], sizes = [1, 32], strides = [1, 1]} : vector<8x32xf32> to vector<1x32xf32>
    %343 = vector.extract_strided_slice %331 {offsets = [0, 64], sizes = [1, 32], strides = [1, 1]} : vector<1x96xf32> to vector<1x32xf32>
    %344 = arith.addf %343, %219 : vector<1x32xf32>
    %345 = arith.mulf %340, %344 : vector<1x32xf32>
    %346 = arith.addf %342, %345 : vector<1x32xf32>
    %347 = math.tanh %346 : vector<1x32xf32>
    %cst_75 = arith.constant 1.000000e+00 : f32
    %348 = vector.broadcast %cst_75 : f32 to vector<1x32xf32>
    %349 = arith.subf %348, %341 : vector<1x32xf32>
    %350 = arith.mulf %349, %347 : vector<1x32xf32>
    %351 = arith.mulf %341, %330 : vector<1x32xf32>
    %352 = arith.addf %350, %351 : vector<1x32xf32>
    %cst_76 = arith.constant dense<0.000000e+00> : vector<1x96xf32>
    %353 = tpu.matmul %352, %208, %cst_76 {dimension_numbers = #tpu.dot_dimension_numbers<[1], [0], [0], [1], [0, 0, 1, 1], [], []>, precision = #tpu.contract_precision<fp32>} : vector<1x32xf32>, vector<32x96xf32>, vector<1x96xf32> -> vector<1x96xf32>
    %354 = vector.extract_strided_slice %217 {offsets = [6, 0], sizes = [1, 64], strides = [1, 1]} : vector<8x64xf32> to vector<1x64xf32>
    %355 = vector.extract_strided_slice %353 {offsets = [0, 0], sizes = [1, 64], strides = [1, 1]} : vector<1x96xf32> to vector<1x64xf32>
    %356 = arith.addf %354, %355 : vector<1x64xf32>
    %357 = arith.negf %356 : vector<1x64xf32>
    %358 = math.exp %357 : vector<1x64xf32>
    %cst_77 = arith.constant 1.000000e+00 : f32
    %359 = vector.broadcast %cst_77 : f32 to vector<1x64xf32>
    %360 = arith.addf %359, %358 : vector<1x64xf32>
    %361 = arith.divf %359, %360 : vector<1x64xf32>
    %362 = vector.extract_strided_slice %361 {offsets = [0, 0], sizes = [1, 32], strides = [1, 1]} : vector<1x64xf32> to vector<1x32xf32>
    %363 = vector.extract_strided_slice %361 {offsets = [0, 32], sizes = [1, 32], strides = [1, 1]} : vector<1x64xf32> to vector<1x32xf32>
    %364 = vector.extract_strided_slice %218 {offsets = [6, 0], sizes = [1, 32], strides = [1, 1]} : vector<8x32xf32> to vector<1x32xf32>
    %365 = vector.extract_strided_slice %353 {offsets = [0, 64], sizes = [1, 32], strides = [1, 1]} : vector<1x96xf32> to vector<1x32xf32>
    %366 = arith.addf %365, %219 : vector<1x32xf32>
    %367 = arith.mulf %362, %366 : vector<1x32xf32>
    %368 = arith.addf %364, %367 : vector<1x32xf32>
    %369 = math.tanh %368 : vector<1x32xf32>
    %cst_78 = arith.constant 1.000000e+00 : f32
    %370 = vector.broadcast %cst_78 : f32 to vector<1x32xf32>
    %371 = arith.subf %370, %363 : vector<1x32xf32>
    %372 = arith.mulf %371, %369 : vector<1x32xf32>
    %373 = arith.mulf %363, %352 : vector<1x32xf32>
    %374 = arith.addf %372, %373 : vector<1x32xf32>
    %cst_79 = arith.constant dense<0.000000e+00> : vector<1x96xf32>
    %375 = tpu.matmul %374, %208, %cst_79 {dimension_numbers = #tpu.dot_dimension_numbers<[1], [0], [0], [1], [0, 0, 1, 1], [], []>, precision = #tpu.contract_precision<fp32>} : vector<1x32xf32>, vector<32x96xf32>, vector<1x96xf32> -> vector<1x96xf32>
    %376 = vector.extract_strided_slice %217 {offsets = [7, 0], sizes = [1, 64], strides = [1, 1]} : vector<8x64xf32> to vector<1x64xf32>
    %377 = vector.extract_strided_slice %375 {offsets = [0, 0], sizes = [1, 64], strides = [1, 1]} : vector<1x96xf32> to vector<1x64xf32>
    %378 = arith.addf %376, %377 : vector<1x64xf32>
    %379 = arith.negf %378 : vector<1x64xf32>
    %380 = math.exp %379 : vector<1x64xf32>
    %cst_80 = arith.constant 1.000000e+00 : f32
    %381 = vector.broadcast %cst_80 : f32 to vector<1x64xf32>
    %382 = arith.addf %381, %380 : vector<1x64xf32>
    %383 = arith.divf %381, %382 : vector<1x64xf32>
    %384 = vector.extract_strided_slice %383 {offsets = [0, 0], sizes = [1, 32], strides = [1, 1]} : vector<1x64xf32> to vector<1x32xf32>
    %385 = vector.extract_strided_slice %383 {offsets = [0, 32], sizes = [1, 32], strides = [1, 1]} : vector<1x64xf32> to vector<1x32xf32>
    %386 = vector.extract_strided_slice %218 {offsets = [7, 0], sizes = [1, 32], strides = [1, 1]} : vector<8x32xf32> to vector<1x32xf32>
    %387 = vector.extract_strided_slice %375 {offsets = [0, 64], sizes = [1, 32], strides = [1, 1]} : vector<1x96xf32> to vector<1x32xf32>
    %388 = arith.addf %387, %219 : vector<1x32xf32>
    %389 = arith.mulf %384, %388 : vector<1x32xf32>
    %390 = arith.addf %386, %389 : vector<1x32xf32>
    %391 = math.tanh %390 : vector<1x32xf32>
    %cst_81 = arith.constant 1.000000e+00 : f32
    %392 = vector.broadcast %cst_81 : f32 to vector<1x32xf32>
    %393 = arith.subf %392, %385 : vector<1x32xf32>
    %394 = arith.mulf %393, %391 : vector<1x32xf32>
    %395 = arith.mulf %385, %374 : vector<1x32xf32>
    %396 = arith.addf %394, %395 : vector<1x32xf32>
    %c0_82 = arith.constant 0 : index
    %c0_83 = arith.constant 0 : index
    %397 = vector.load %arg23[%c0_82, %c0_83] : memref<2x32xf32, #tpu.memory_space<vmem>>, vector<1x32xf32>
    tpu.vector_store %arg23[%c0_82, %c0_83], %204 {strides = array<i32>} : memref<2x32xf32, #tpu.memory_space<vmem>>, vector<1x32xf32>,
    %c1_84 = arith.constant 1 : index
    %c0_85 = arith.constant 0 : index
    %398 = vector.load %arg23[%c1_84, %c0_85] : memref<2x32xf32, #tpu.memory_space<vmem>>, vector<1x32xf32>
    tpu.vector_store %arg23[%c1_84, %c0_85], %396 {strides = array<i32>} : memref<2x32xf32, #tpu.memory_space<vmem>>, vector<1x32xf32>,
    %c0_86 = arith.constant 0 : index
    %c0_87 = arith.constant 0 : index
    %399 = vector.load %arg10[%c0_86, %c0_87] : memref<16x32xf32, #tpu.memory_space<vmem>>, vector<16x32xf32>
    %c0_88 = arith.constant 0 : index
    %c0_89 = arith.constant 0 : index
    %400 = vector.load %arg11[%c0_88, %c0_89] : memref<32x96xf32, #tpu.memory_space<vmem>>, vector<32x96xf32>
    %c0_90 = arith.constant 0 : index
    %c0_91 = arith.constant 0 : index
    %401 = vector.load %arg12[%c0_90, %c0_91] : memref<32x96xf32, #tpu.memory_space<vmem>>, vector<32x96xf32>
    %c0_92 = arith.constant 0 : index
    %c0_93 = arith.constant 0 : index
    %402 = vector.load %arg13[%c0_92, %c0_93] : memref<1x96xf32, #tpu.memory_space<vmem>>, vector<1x96xf32>
    %c0_94 = arith.constant 0 : index
    %c0_95 = arith.constant 0 : index
    %403 = vector.load %arg14[%c0_94, %c0_95] : memref<1x96xf32, #tpu.memory_space<vmem>>, vector<1x96xf32>
    %c0_96 = arith.constant 0 : index
    %c0_97 = arith.constant 0 : index
    %404 = vector.load %arg15[%c0_96, %c0_97] : memref<32x96xf32, #tpu.memory_space<vmem>>, vector<32x96xf32>
    %c0_98 = arith.constant 0 : index
    %c0_99 = arith.constant 0 : index
    %405 = vector.load %arg16[%c0_98, %c0_99] : memref<32x96xf32, #tpu.memory_space<vmem>>, vector<32x96xf32>
    %c0_100 = arith.constant 0 : index
    %c0_101 = arith.constant 0 : index
    %406 = vector.load %arg17[%c0_100, %c0_101] : memref<1x96xf32, #tpu.memory_space<vmem>>, vector<1x96xf32>
    %c0_102 = arith.constant 0 : index
    %c0_103 = arith.constant 0 : index
    %407 = vector.load %arg18[%c0_102, %c0_103] : memref<1x96xf32, #tpu.memory_space<vmem>>, vector<1x96xf32>
    %c0_104 = arith.constant 0 : index
    %c0_105 = arith.constant 0 : index
    %408 = vector.load %arg19[%c0_104, %c0_105] : memref<32x16xf32, #tpu.memory_space<vmem>>, vector<32x16xf32>
    %c0_106 = arith.constant 0 : index
    %c0_107 = arith.constant 0 : index
    %409 = vector.load %arg20[%c0_106, %c0_107] : memref<1x16xf32, #tpu.memory_space<vmem>>, vector<1x16xf32>
    %410 = tpu.iota {dimensions = array<i32: 1>} : vector<1x16xi32>
    %411 = arith.sitofp %410 : vector<1x16xi32> to vector<1x16xf32>
    %c0_i32 = arith.constant 0 : i32
    %412 = vector.broadcast %c0_i32 : i32 to vector<1x1xi32>
    %413 = vector.broadcast %412 : vector<1x1xi32> to vector<1x16xi32>
    %414 = arith.cmpi eq, %410, %413 : vector<1x16xi32>
    %415 = arith.extui %414 : vector<1x16xi1> to vector<1x16xi32>
    %416 = arith.sitofp %415 : vector<1x16xi32> to vector<1x16xf32>
    %cst_108 = arith.constant dense<0.000000e+00> : vector<1x32xf32>
    %417 = tpu.matmul %416, %399, %cst_108 {dimension_numbers = #tpu.dot_dimension_numbers<[1], [0], [0], [1], [0, 0, 1, 1], [], []>, precision = #tpu.contract_precision<fp32>} : vector<1x16xf32>, vector<16x32xf32>, vector<1x32xf32> -> vector<1x32xf32>
    %cst_109 = arith.constant dense<0.000000e+00> : vector<1x96xf32>
    %418 = tpu.matmul %417, %400, %cst_109 {dimension_numbers = #tpu.dot_dimension_numbers<[1], [0], [0], [1], [0, 0, 1, 1], [], []>, precision = #tpu.contract_precision<fp32>} : vector<1x32xf32>, vector<32x96xf32>, vector<1x96xf32> -> vector<1x96xf32>
    %419 = arith.addf %418, %402 : vector<1x96xf32>
    %cst_110 = arith.constant dense<0.000000e+00> : vector<1x96xf32>
    %420 = tpu.matmul %204, %401, %cst_110 {dimension_numbers = #tpu.dot_dimension_numbers<[1], [0], [0], [1], [0, 0, 1, 1], [], []>, precision = #tpu.contract_precision<fp32>} : vector<1x32xf32>, vector<32x96xf32>, vector<1x96xf32> -> vector<1x96xf32>
    %421 = arith.addf %420, %403 : vector<1x96xf32>
    %422 = vector.extract_strided_slice %419 {offsets = [0, 0], sizes = [1, 64], strides = [1, 1]} : vector<1x96xf32> to vector<1x64xf32>
    %423 = vector.extract_strided_slice %421 {offsets = [0, 0], sizes = [1, 64], strides = [1, 1]} : vector<1x96xf32> to vector<1x64xf32>
    %424 = arith.addf %422, %423 : vector<1x64xf32>
    %425 = arith.negf %424 : vector<1x64xf32>
    %426 = math.exp %425 : vector<1x64xf32>
    %cst_111 = arith.constant 1.000000e+00 : f32
    %427 = vector.broadcast %cst_111 : f32 to vector<1x64xf32>
    %428 = arith.addf %427, %426 : vector<1x64xf32>
    %429 = arith.divf %427, %428 : vector<1x64xf32>
    %430 = vector.extract_strided_slice %429 {offsets = [0, 0], sizes = [1, 32], strides = [1, 1]} : vector<1x64xf32> to vector<1x32xf32>
    %431 = vector.extract_strided_slice %429 {offsets = [0, 32], sizes = [1, 32], strides = [1, 1]} : vector<1x64xf32> to vector<1x32xf32>
    %432 = vector.extract_strided_slice %419 {offsets = [0, 64], sizes = [1, 32], strides = [1, 1]} : vector<1x96xf32> to vector<1x32xf32>
    %433 = vector.extract_strided_slice %421 {offsets = [0, 64], sizes = [1, 32], strides = [1, 1]} : vector<1x96xf32> to vector<1x32xf32>
    %434 = arith.mulf %430, %433 : vector<1x32xf32>
    %435 = arith.addf %432, %434 : vector<1x32xf32>
    %436 = math.tanh %435 : vector<1x32xf32>
    %cst_112 = arith.constant 1.000000e+00 : f32
    %437 = vector.broadcast %cst_112 : f32 to vector<1x32xf32>
    %438 = arith.subf %437, %431 : vector<1x32xf32>
    %439 = arith.mulf %438, %436 : vector<1x32xf32>
    %440 = arith.mulf %431, %204 : vector<1x32xf32>
    %441 = arith.addf %439, %440 : vector<1x32xf32>
    %cst_113 = arith.constant dense<0.000000e+00> : vector<1x96xf32>
    %442 = tpu.matmul %441, %404, %cst_113 {dimension_numbers = #tpu.dot_dimension_numbers<[1], [0], [0], [1], [0, 0, 1, 1], [], []>, precision = #tpu.contract_precision<fp32>} : vector<1x32xf32>, vector<32x96xf32>, vector<1x96xf32> -> vector<1x96xf32>
    %443 = arith.addf %442, %406 : vector<1x96xf32>
    %cst_114 = arith.constant dense<0.000000e+00> : vector<1x96xf32>
    %444 = tpu.matmul %396, %405, %cst_114 {dimension_numbers = #tpu.dot_dimension_numbers<[1], [0], [0], [1], [0, 0, 1, 1], [], []>, precision = #tpu.contract_precision<fp32>} : vector<1x32xf32>, vector<32x96xf32>, vector<1x96xf32> -> vector<1x96xf32>
    %445 = arith.addf %444, %407 : vector<1x96xf32>
    %446 = vector.extract_strided_slice %443 {offsets = [0, 0], sizes = [1, 64], strides = [1, 1]} : vector<1x96xf32> to vector<1x64xf32>
    %447 = vector.extract_strided_slice %445 {offsets = [0, 0], sizes = [1, 64], strides = [1, 1]} : vector<1x96xf32> to vector<1x64xf32>
    %448 = arith.addf %446, %447 : vector<1x64xf32>
    %449 = arith.negf %448 : vector<1x64xf32>
    %450 = math.exp %449 : vector<1x64xf32>
    %cst_115 = arith.constant 1.000000e+00 : f32
    %451 = vector.broadcast %cst_115 : f32 to vector<1x64xf32>
    %452 = arith.addf %451, %450 : vector<1x64xf32>
    %453 = arith.divf %451, %452 : vector<1x64xf32>
    %454 = vector.extract_strided_slice %453 {offsets = [0, 0], sizes = [1, 32], strides = [1, 1]} : vector<1x64xf32> to vector<1x32xf32>
    %455 = vector.extract_strided_slice %453 {offsets = [0, 32], sizes = [1, 32], strides = [1, 1]} : vector<1x64xf32> to vector<1x32xf32>
    %456 = vector.extract_strided_slice %443 {offsets = [0, 64], sizes = [1, 32], strides = [1, 1]} : vector<1x96xf32> to vector<1x32xf32>
    %457 = vector.extract_strided_slice %445 {offsets = [0, 64], sizes = [1, 32], strides = [1, 1]} : vector<1x96xf32> to vector<1x32xf32>
    %458 = arith.mulf %454, %457 : vector<1x32xf32>
    %459 = arith.addf %456, %458 : vector<1x32xf32>
    %460 = math.tanh %459 : vector<1x32xf32>
    %cst_116 = arith.constant 1.000000e+00 : f32
    %461 = vector.broadcast %cst_116 : f32 to vector<1x32xf32>
    %462 = arith.subf %461, %455 : vector<1x32xf32>
    %463 = arith.mulf %462, %460 : vector<1x32xf32>
    %464 = arith.mulf %455, %396 : vector<1x32xf32>
    %465 = arith.addf %463, %464 : vector<1x32xf32>
    %cst_117 = arith.constant dense<0.000000e+00> : vector<1x16xf32>
    %466 = tpu.matmul %465, %408, %cst_117 {dimension_numbers = #tpu.dot_dimension_numbers<[1], [0], [0], [1], [0, 0, 1, 1], [], []>, precision = #tpu.contract_precision<fp32>} : vector<1x32xf32>, vector<32x16xf32>, vector<1x16xf32> -> vector<1x16xf32>
    %467 = arith.addf %466, %409 : vector<1x16xf32>
    %cst_118 = arith.constant dense<0xFF800000> : vector<1xf32>
    %468 = vector.multi_reduction <maximumf>, %467, %cst_118 [1] : vector<1x16xf32> to vector<1xf32>
    %469 = vector.shape_cast %468 : vector<1xf32> to vector<1x1xf32>
    %470 = vector.broadcast %469 : vector<1x1xf32> to vector<1x16xf32>
    %471 = arith.cmpf oge, %467, %470 : vector<1x16xf32>
    %cst_119 = arith.constant 1.600000e+01 : f32
    %472 = vector.broadcast %cst_119 : f32 to vector<1x16xf32>
    %473 = arith.select %471, %411, %472 : vector<1x16xi1>, vector<1x16xf32>
    %cst_120 = arith.constant dense<0x7F800000> : vector<1xf32>
    %474 = vector.multi_reduction <minimumf>, %473, %cst_120 [1] : vector<1x16xf32> to vector<1xf32>
    %475 = vector.shape_cast %474 : vector<1xf32> to vector<1x1xf32>
    %476 = arith.fptosi %475 : vector<1x1xf32> to vector<1x1xi32>
    %c0_i32_121 = arith.constant 0 : i32
    %477 = vector.broadcast %c0_i32_121 : i32 to vector<1x1xi32>
    %c0_i32_122 = arith.constant 0 : i32
    %478 = vector.broadcast %c0_i32_122 : i32 to vector<1x1xi32>
    %c0_i32_123 = arith.constant 0 : i32
    %c50_i32 = arith.constant 50 : i32
    %479 = arith.addi %c0_i32_123, %c50_i32 : i32
    %c1_i32 = arith.constant 1 : i32
    %480:5 = scf.for %arg25 = %c0_i32_123 to %479 step %c1_i32 iter_args(%arg26 = %476, %arg27 = %441, %arg28 = %465, %arg29 = %477, %arg30 = %478) -> (vector<1x1xi32>, vector<1x32xf32>, vector<1x32xf32>, vector<1x1xi32>, vector<1x1xi32>)  : i32 {
      %482 = vector.broadcast %arg26 : vector<1x1xi32> to vector<1x16xi32>
      %483 = arith.cmpi eq, %410, %482 : vector<1x16xi32>
      %484 = arith.extui %483 : vector<1x16xi1> to vector<1x16xi32>
      %485 = arith.sitofp %484 : vector<1x16xi32> to vector<1x16xf32>
      %cst_127 = arith.constant dense<0.000000e+00> : vector<1x32xf32>
      %486 = tpu.matmul %485, %399, %cst_127 {dimension_numbers = #tpu.dot_dimension_numbers<[1], [0], [0], [1], [0, 0, 1, 1], [], []>, precision = #tpu.contract_precision<fp32>} : vector<1x16xf32>, vector<16x32xf32>, vector<1x32xf32> -> vector<1x32xf32>
      %cst_128 = arith.constant dense<0.000000e+00> : vector<1x96xf32>
      %487 = tpu.matmul %486, %400, %cst_128 {dimension_numbers = #tpu.dot_dimension_numbers<[1], [0], [0], [1], [0, 0, 1, 1], [], []>, precision = #tpu.contract_precision<fp32>} : vector<1x32xf32>, vector<32x96xf32>, vector<1x96xf32> -> vector<1x96xf32>
      %488 = arith.addf %487, %402 : vector<1x96xf32>
      %cst_129 = arith.constant dense<0.000000e+00> : vector<1x96xf32>
      %489 = tpu.matmul %arg27, %401, %cst_129 {dimension_numbers = #tpu.dot_dimension_numbers<[1], [0], [0], [1], [0, 0, 1, 1], [], []>, precision = #tpu.contract_precision<fp32>} : vector<1x32xf32>, vector<32x96xf32>, vector<1x96xf32> -> vector<1x96xf32>
      %490 = arith.addf %489, %403 : vector<1x96xf32>
      %491 = vector.extract_strided_slice %488 {offsets = [0, 0], sizes = [1, 64], strides = [1, 1]} : vector<1x96xf32> to vector<1x64xf32>
      %492 = vector.extract_strided_slice %490 {offsets = [0, 0], sizes = [1, 64], strides = [1, 1]} : vector<1x96xf32> to vector<1x64xf32>
      %493 = arith.addf %491, %492 : vector<1x64xf32>
      %494 = arith.negf %493 : vector<1x64xf32>
      %495 = math.exp %494 : vector<1x64xf32>
      %cst_130 = arith.constant 1.000000e+00 : f32
      %496 = vector.broadcast %cst_130 : f32 to vector<1x64xf32>
      %497 = arith.addf %496, %495 : vector<1x64xf32>
      %498 = arith.divf %496, %497 : vector<1x64xf32>
      %499 = vector.extract_strided_slice %498 {offsets = [0, 0], sizes = [1, 32], strides = [1, 1]} : vector<1x64xf32> to vector<1x32xf32>
      %500 = vector.extract_strided_slice %498 {offsets = [0, 32], sizes = [1, 32], strides = [1, 1]} : vector<1x64xf32> to vector<1x32xf32>
      %501 = vector.extract_strided_slice %488 {offsets = [0, 64], sizes = [1, 32], strides = [1, 1]} : vector<1x96xf32> to vector<1x32xf32>
      %502 = vector.extract_strided_slice %490 {offsets = [0, 64], sizes = [1, 32], strides = [1, 1]} : vector<1x96xf32> to vector<1x32xf32>
      %503 = arith.mulf %499, %502 : vector<1x32xf32>
      %504 = arith.addf %501, %503 : vector<1x32xf32>
      %505 = math.tanh %504 : vector<1x32xf32>
      %cst_131 = arith.constant 1.000000e+00 : f32
      %506 = vector.broadcast %cst_131 : f32 to vector<1x32xf32>
      %507 = arith.subf %506, %500 : vector<1x32xf32>
      %508 = arith.mulf %507, %505 : vector<1x32xf32>
      %509 = arith.mulf %500, %arg27 : vector<1x32xf32>
      %510 = arith.addf %508, %509 : vector<1x32xf32>
      %cst_132 = arith.constant dense<0.000000e+00> : vector<1x96xf32>
      %511 = tpu.matmul %510, %404, %cst_132 {dimension_numbers = #tpu.dot_dimension_numbers<[1], [0], [0], [1], [0, 0, 1, 1], [], []>, precision = #tpu.contract_precision<fp32>} : vector<1x32xf32>, vector<32x96xf32>, vector<1x96xf32> -> vector<1x96xf32>
      %512 = arith.addf %511, %406 : vector<1x96xf32>
      %cst_133 = arith.constant dense<0.000000e+00> : vector<1x96xf32>
      %513 = tpu.matmul %arg28, %405, %cst_133 {dimension_numbers = #tpu.dot_dimension_numbers<[1], [0], [0], [1], [0, 0, 1, 1], [], []>, precision = #tpu.contract_precision<fp32>} : vector<1x32xf32>, vector<32x96xf32>, vector<1x96xf32> -> vector<1x96xf32>
      %514 = arith.addf %513, %407 : vector<1x96xf32>
      %515 = vector.extract_strided_slice %512 {offsets = [0, 0], sizes = [1, 64], strides = [1, 1]} : vector<1x96xf32> to vector<1x64xf32>
      %516 = vector.extract_strided_slice %514 {offsets = [0, 0], sizes = [1, 64], strides = [1, 1]} : vector<1x96xf32> to vector<1x64xf32>
      %517 = arith.addf %515, %516 : vector<1x64xf32>
      %518 = arith.negf %517 : vector<1x64xf32>
      %519 = math.exp %518 : vector<1x64xf32>
      %cst_134 = arith.constant 1.000000e+00 : f32
      %520 = vector.broadcast %cst_134 : f32 to vector<1x64xf32>
      %521 = arith.addf %520, %519 : vector<1x64xf32>
      %522 = arith.divf %520, %521 : vector<1x64xf32>
      %523 = vector.extract_strided_slice %522 {offsets = [0, 0], sizes = [1, 32], strides = [1, 1]} : vector<1x64xf32> to vector<1x32xf32>
      %524 = vector.extract_strided_slice %522 {offsets = [0, 32], sizes = [1, 32], strides = [1, 1]} : vector<1x64xf32> to vector<1x32xf32>
      %525 = vector.extract_strided_slice %512 {offsets = [0, 64], sizes = [1, 32], strides = [1, 1]} : vector<1x96xf32> to vector<1x32xf32>
      %526 = vector.extract_strided_slice %514 {offsets = [0, 64], sizes = [1, 32], strides = [1, 1]} : vector<1x96xf32> to vector<1x32xf32>
      %527 = arith.mulf %523, %526 : vector<1x32xf32>
      %528 = arith.addf %525, %527 : vector<1x32xf32>
      %529 = math.tanh %528 : vector<1x32xf32>
      %cst_135 = arith.constant 1.000000e+00 : f32
      %530 = vector.broadcast %cst_135 : f32 to vector<1x32xf32>
      %531 = arith.subf %530, %524 : vector<1x32xf32>
      %532 = arith.mulf %531, %529 : vector<1x32xf32>
      %533 = arith.mulf %524, %arg28 : vector<1x32xf32>
      %534 = arith.addf %532, %533 : vector<1x32xf32>
      %cst_136 = arith.constant dense<0.000000e+00> : vector<1x16xf32>
      %535 = tpu.matmul %534, %408, %cst_136 {dimension_numbers = #tpu.dot_dimension_numbers<[1], [0], [0], [1], [0, 0, 1, 1], [], []>, precision = #tpu.contract_precision<fp32>} : vector<1x32xf32>, vector<32x16xf32>, vector<1x16xf32> -> vector<1x16xf32>
      %536 = arith.addf %535, %409 : vector<1x16xf32>
      %cst_137 = arith.constant dense<0xFF800000> : vector<1xf32>
      %537 = vector.multi_reduction <maximumf>, %536, %cst_137 [1] : vector<1x16xf32> to vector<1xf32>
      %538 = vector.shape_cast %537 : vector<1xf32> to vector<1x1xf32>
      %539 = vector.broadcast %538 : vector<1x1xf32> to vector<1x16xf32>
      %540 = arith.cmpf oge, %536, %539 : vector<1x16xf32>
      %cst_138 = arith.constant 1.600000e+01 : f32
      %541 = vector.broadcast %cst_138 : f32 to vector<1x16xf32>
      %542 = arith.select %540, %411, %541 : vector<1x16xi1>, vector<1x16xf32>
      %cst_139 = arith.constant dense<0x7F800000> : vector<1xf32>
      %543 = vector.multi_reduction <minimumf>, %542, %cst_139 [1] : vector<1x16xf32> to vector<1xf32>
      %544 = vector.shape_cast %543 : vector<1xf32> to vector<1x1xf32>
      %545 = arith.fptosi %544 : vector<1x1xf32> to vector<1x1xi32>
      %c0_i32_140 = arith.constant 0 : i32
      %546 = vector.broadcast %c0_i32_140 : i32 to vector<1x1xi32>
      %547 = arith.cmpi sgt, %arg29, %546 : vector<1x1xi32>
      %c1_i32_141 = arith.constant 1 : i32
      %548 = vector.broadcast %c1_i32_141 : i32 to vector<1x1xi32>
      %549 = arith.cmpi eq, %545, %548 : vector<1x1xi32>
      %cst_142 = arith.constant dense<true> : vector<1x1xi1>
      %550 = arith.xori %547, %cst_142 : vector<1x1xi1>
      %cst_143 = arith.constant dense<true> : vector<1x1xi1>
      %551 = arith.xori %549, %cst_143 : vector<1x1xi1>
      %552 = arith.andi %550, %551 : vector<1x1xi1>
      %c-1_i32 = arith.constant -1 : i32
      %553 = vector.broadcast %c-1_i32 : i32 to vector<1x1xi32>
      %554 = arith.select %552, %545, %553 : vector<1x1xi1>, vector<1x1xi32>
      %555 = arith.index_cast %arg25 : i32 to index
      %c0_144 = arith.constant 0 : index
      %556 = vector.load %arg21[%555, %c0_144] : memref<50x1xi32, #tpu.memory_space<vmem>>, vector<1x1xi32>
      tpu.vector_store %arg21[%555, %c0_144], %554 {strides = array<i32>} : memref<50x1xi32, #tpu.memory_space<vmem>>, vector<1x1xi32>,
      %557 = arith.select %552, %545, %arg26 : vector<1x1xi1>, vector<1x1xi32>
      %558 = vector.shape_cast %547 : vector<1x1xi1> to vector<1x1xi1>
      %559 = vector.broadcast %558 : vector<1x1xi1> to vector<1x32xi1>
      %560 = arith.select %559, %arg27, %510 : vector<1x32xi1>, vector<1x32xf32>
      %561 = vector.shape_cast %547 : vector<1x1xi1> to vector<1x1xi1>
      %562 = vector.broadcast %561 : vector<1x1xi1> to vector<1x32xi1>
      %563 = arith.select %562, %arg28, %534 : vector<1x32xi1>, vector<1x32xf32>
      %564 = arith.ori %547, %549 : vector<1x1xi1>
      %565 = arith.extui %564 : vector<1x1xi1> to vector<1x1xi32>
      %566 = arith.extui %552 : vector<1x1xi1> to vector<1x1xi32>
      %567 = arith.addi %arg30, %566 : vector<1x1xi32>
      scf.yield %557, %560, %563, %565, %567 : vector<1x1xi32>, vector<1x32xf32>, vector<1x32xf32>, vector<1x1xi32>, vector<1x1xi32>
    }
    %c50_i32_124 = arith.constant 50 : i32
    %c0_125 = arith.constant 0 : index
    %c0_126 = arith.constant 0 : index
    %481 = vector.load %arg22[%c0_125, %c0_126] : memref<1x1xi32, #tpu.memory_space<vmem>>, vector<1x1xi32>
    tpu.vector_store %arg22[%c0_125, %c0_126], %480#4 {strides = array<i32>} : memref<1x1xi32, #tpu.memory_space<vmem>>, vector<1x1xi32>,
    return
  }
}

</mosaic_0001>

<bundles_post_ra>
// kernel: translate_forward.1
= control target key start
LH: loop header
LB: loop body
LE: loop exit
PB: predicated region body
PF: predicated region fallthrough
CT: control target
= control target key end

     0   :  { %s23186_s0 = inlined_call_operand.vmem [shape: s32[8,1], index: 0, kind: input, shape index: {}]   ;;  %s23187_s1 = inlined_call_operand.hbm [shape: f32[16,32], index: 1, kind: input, shape index: {}]   ;;  %s23188_s2 = inlined_call_operand.vmem [shape: f32[32,96], index: 2, kind: input, shape index: {}]   ;;  %s23189_s3 = inlined_call_operand.vmem [shape: f32[32,96], index: 3, kind: input, shape index: {}]   ;;  %s23190_s4 = inlined_call_operand.vmem [shape: f32[1,96], index: 4, kind: input, shape index: {}]   ;;  %s23191_s5 = inlined_call_operand.vmem [shape: f32[1,96], index: 5, kind: input, shape index: {}]   ;;  %s23192_s6 = inlined_call_operand.vmem [shape: f32[32,96], index: 6, kind: input, shape index: {}]   ;;  %s23193_s7 = inlined_call_operand.hbm [shape: f32[32,96], index: 7, kind: input, shape index: {}]   ;;  %s23194_s8 = inlined_call_operand.vmem [shape: f32[1,96], index: 8, kind: input, shape index: {}]   ;;  %s23195_s9 = inlined_call_operand.vmem [shape: f32[1,96], index: 9, kind: input, shape index: {}]   ;;  %s23196_s10 = inlined_call_operand.hbm [shape: f32[16,32], index: 10, kind: input, shape index: {}]   ;;  %s23197_s11 = inlined_call_operand.hbm [shape: f32[32,96], index: 11, kind: input, shape index: {}]   ;;  %s23198_s12 = inlined_call_operand.hbm [shape: f32[32,96], index: 12, kind: input, shape index: {}]   ;;  %s23199_s13 = inlined_call_operand.hbm [shape: f32[1,96], index: 13, kind: input, shape index: {}]   ;;  %s23200_s14 = inlined_call_operand.hbm [shape: f32[1,96], index: 14, kind: input, shape index: {}]   ;;  %s23201_s15 = inlined_call_operand.hbm [shape: f32[32,96], index: 15, kind: input, shape index: {}]   ;;  %s23202_s16 = inlined_call_operand.hbm [shape: f32[32,96], index: 16, kind: input, shape index: {}]   ;;  %s23203_s17 = inlined_call_operand.hbm [shape: f32[1,96], index: 17, kind: input, shape index: {}]   ;;  %s23204_s18 = inlined_call_operand.hbm [shape: f32[1,96], index: 18, kind: input, shape index: {}]   ;;  %s23205_s19 = inlined_call_operand.vmem [shape: f32[32,16], index: 19, kind: input, shape index: {}]   ;;  %s23206_s20 = inlined_call_operand.hbm [shape: f32[1,16], index: 20, kind: input, shape index: {}]   ;;  %s23207_s21 = inlined_call_operand.vmem [shape: s32[50,1], index: 21, kind: output, shape index: {0}]   ;;  %s23208_s22 = inlined_call_operand.hbm [shape: s32[1,1], index: 22, kind: output, shape index: {1}]   ;;  %s23209_s23 = inlined_call_operand.hbm [shape: f32[2,32], index: 23, kind: output, shape index: {2}]  }
   0x1   :  { %23234 = sst [smem:[#allocation44_spill]] %s23186_s0 }
   0x2   :  { %23235 = sst [smem:[#allocation45_spill]] %s23187_s1 }
   0x3   :  { %23236 = sst [smem:[#allocation46_spill]] %s23188_s2 }
   0x4   :  { %23237 = sst [smem:[#allocation47_spill]] %s23189_s3 }
   0x5   :  { %23238 = sst [smem:[#allocation48_spill]] %s23190_s4 }
   0x6   :  { %23239 = sst [smem:[#allocation49_spill]] %s23191_s5 }
   0x7   :  { %23240 = sst [smem:[#allocation50_spill]] %s23192_s6 }
   0x8   :  { %23241 = sst [smem:[#allocation51_spill]] %s23193_s7 }
   0x9   :  { %23242 = sst [smem:[#allocation52_spill]] %s23209_s23 }
   0xa   :  { %29 = vsyncpa [#allocation4], 0 }
   0xb   :  { %30 = vsyncpa [#allocation7], 0 }
   0xc   :  { %31 = vsyncpa [#allocation10], 0 }
   0xd   :  { %32 = vsyncpa [#allocation13], 0 }
   0xe   :  { %33 = vsyncpa [#allocation16], 0 }
   0xf   :  { %34 = vsyncpa [#allocation19], 0 }
  0x10   :  { %35 = vsyncpa [#allocation22], 0 }
  0x11   :  { %36 = vsyncpa [#allocation5], 0 }
  0x12   :  { %37 = vsyncpa [#allocation25], 0  ;;  %s21061_s4 = smov [#allocation6]   ;;  %s21062_s24 = smov [#allocation9]  }
  0x13   :  { %s67_s30 = sshll.u32 %s21061_s4, 4  ;;  %s95_s25 = sshll.u32 %s21062_s24, 4  ;;  %s68_s30 = int_to_ptr.vmem [resolvable:$true] %s67_s30  ;;  %s21210_s25 = int_to_ptr.vmem [resolvable:$true] %s95_s25 }
  0x14   :  { %s23243_s26 = sld [smem:[#allocation51_spill]] }
  0x1a   :  { %s20687_s2 = scalar_lea.hbm %s23243_s26, 512 }
  0x1b   :  { %p20688_p0 = scmp.ne.s32.totalorder %s23243_s26, %s20687_s2  ;;  %p20691_p1 = scmp.lt.u32.totalorder %s20687_s2, %s23243_s26 }
  0x1d   :  { %p20693_p2 = pnand %p20691_p1, %p20688_p0 }
  0x1f   :  { %20696 = shalt.err (!%p20693_p2)
}
  0x20   :  { %s20697_s29 = scalar_lea.vmem %s68_s30, 512  ;;  %p20702_p4 = scmp.lt.s32.totalorder %s68_s30, %s68_s30 }
  0x21   :  { %p20698_p3 = scmp.ne.s32.totalorder %s68_s30, %s20697_s29  ;;  %p20703_p5 = scmp.lt.s32.totalorder %s20697_s29, %s20697_s29 }
  0x23   :  { %p20704_p6 = por %p20703_p5, %p20702_p4 }
  0x25   :  { %p20705_p7 = pnand %p20704_p6, %p20698_p3 }
  0x27   :  { %20708 = shalt.err (!%p20705_p7)
}
  0x28   :  { %s21063_s3 = smov 128   ;;  %s21064_s0 = smov 8  }
  0x29   :  { %73 = dma.hbm_to_vmem [thread:$0]  %s23243_s26, 512, %s68_s30, [#allocation7], %s21063_s3, %s21063_s3, %s21064_s0  }
  0x2a   :  { %s20709_s2 = scalar_lea.hbm %s23197_s11, 512 }
  0x2b   :  { %p20710_p8 = scmp.ne.s32.totalorder %s23197_s11, %s20709_s2  ;;  %p20713_p9 = scmp.lt.u32.totalorder %s20709_s2, %s23197_s11 }
  0x2d   :  { %p20715_p10 = pnand %p20713_p9, %p20710_p8 }
  0x2f   :  { %20718 = shalt.err (!%p20715_p10)
}
  0x30   :  { %s20719_s29 = scalar_lea.vmem %s21210_s25, 512  ;;  %p20724_p12 = scmp.lt.s32.totalorder %s21210_s25, %s21210_s25 }
  0x31   :  { %p20720_p11 = scmp.ne.s32.totalorder %s21210_s25, %s20719_s29  ;;  %p20725_p13 = scmp.lt.s32.totalorder %s20719_s29, %s20719_s29 }
  0x33   :  { %p20726_p0 = por %p20725_p13, %p20724_p12 }
  0x35   :  { %p20727_p1 = pnand %p20726_p0, %p20720_p11 }
  0x37   :  { %20730 = shalt.err (!%p20727_p1)
}
  0x38   :  { %101 = dma.hbm_to_vmem [thread:$0]  %s23197_s11, 512, %s21210_s25, [#allocation10], %s21063_s3, %s21063_s3, %s21064_s0  }
  0x39   :  { %s21065_s4 = smov [#allocation12]   ;;  %s21066_s5 = smov [#allocation15]  }
  0x3a   :  { %s120_s24 = sshll.u32 %s21065_s4, 4  ;;  %s139_s1 = sshll.u32 %s21066_s5, 4  ;;  %s121_s24 = int_to_ptr.vmem [resolvable:$true] %s120_s24  ;;  %s21247_s1 = int_to_ptr.vmem [resolvable:$true] %s139_s1 }
  0x3b   :  { %s20731_s27 = scalar_lea.hbm %s23199_s13, 16 }
  0x3c   :  { %p20732_p2 = scmp.ne.s32.totalorder %s23199_s13, %s20731_s27  ;;  %p20735_p3 = scmp.lt.u32.totalorder %s20731_s27, %s23199_s13 }
  0x3e   :  { %p20737_p4 = pnand %p20735_p3, %p20732_p2 }
  0x40   :  { %20740 = shalt.err (!%p20737_p4)
}
  0x41   :  { %s20741_s11 = scalar_lea.vmem %s121_s24, 16  ;;  %s20745_s25 = scalar_lea.vmem %s121_s24, 32 }
  0x42   :  { %p20742_p5 = scmp.ne.s32.totalorder %s121_s24, %s20741_s11  ;;  %p20746_p6 = scmp.lt.s32.totalorder %s121_s24, %s121_s24 }
  0x43   :  { %p20747_p7 = scmp.lt.s32.totalorder %s20745_s25, %s20741_s11 }
  0x45   :  { %p20748_p8 = por %p20747_p7, %p20746_p6 }
  0x47   :  { %p20749_p9 = pnand %p20748_p8, %p20742_p5 }
  0x49   :  { %20752 = shalt.err (!%p20749_p9)
}
  0x4a   :  { %123 = dma.hbm_to_vmem [thread:$0]  %s23199_s13, 16, %s121_s24, [#allocation13]  }
  0x4b   :  { %s20753_s2 = scalar_lea.hbm %s23201_s15, 512 }
  0x4c   :  { %p20754_p10 = scmp.ne.s32.totalorder %s23201_s15, %s20753_s2  ;;  %p20757_p11 = scmp.lt.u32.totalorder %s20753_s2, %s23201_s15 }
  0x4e   :  { %p20759_p12 = pnand %p20757_p11, %p20754_p10 }
  0x50   :  { %20762 = shalt.err (!%p20759_p12)
}
  0x51   :  { %s20763_s28 = scalar_lea.vmem %s21247_s1, 512  ;;  %p20768_p0 = scmp.lt.s32.totalorder %s21247_s1, %s21247_s1 }
  0x52   :  { %p20764_p13 = scmp.ne.s32.totalorder %s21247_s1, %s20763_s28  ;;  %p20769_p1 = scmp.lt.s32.totalorder %s20763_s28, %s20763_s28 }
  0x54   :  { %p20770_p2 = por %p20769_p1, %p20768_p0 }
  0x56   :  { %p20771_p3 = pnand %p20770_p2, %p20764_p13 }
  0x58   :  { %20774 = shalt.err (!%p20771_p3)
}
  0x59   :  { %145 = dma.hbm_to_vmem [thread:$0]  %s23201_s15, 512, %s21247_s1, [#allocation16], %s21063_s3, %s21063_s3, %s21064_s0  }
  0x5a   :  { %s21067_s29 = smov [#allocation18]   ;;  %s21068_s25 = smov [#allocation3]  }
  0x5b   :  { %s164_s11 = sshll.u32 %s21067_s29, 4  ;;  %s45_s30 = sshll.u32 %s21068_s25, 4  ;;  %s165_s11 = int_to_ptr.vmem [resolvable:$true] %s164_s11  ;;  %s21281_s30 = int_to_ptr.vmem [resolvable:$true] %s45_s30 }
  0x5c   :  { %s20775_s5 = scalar_lea.hbm %s23203_s17, 16 }
  0x5d   :  { %p20776_p4 = scmp.ne.s32.totalorder %s23203_s17, %s20775_s5  ;;  %p20779_p5 = scmp.lt.u32.totalorder %s20775_s5, %s23203_s17 }
  0x5f   :  { %p20781_p6 = pnand %p20779_p5, %p20776_p4 }
  0x61   :  { %20784 = shalt.err (!%p20781_p6)
}
  0x62   :  { %s20785_s15 = scalar_lea.vmem %s165_s11, 16  ;;  %s20789_s1 = scalar_lea.vmem %s165_s11, 32 }
  0x63   :  { %p20786_p7 = scmp.ne.s32.totalorder %s165_s11, %s20785_s15  ;;  %p20790_p8 = scmp.lt.s32.totalorder %s165_s11, %s165_s11 }
  0x64   :  { %p20791_p9 = scmp.lt.s32.totalorder %s20789_s1, %s20785_s15 }
  0x66   :  { %p20792_p10 = por %p20791_p9, %p20790_p8 }
  0x68   :  { %p20793_p11 = pnand %p20792_p10, %p20786_p7 }
  0x6a   :  { %20796 = shalt.err (!%p20793_p11)
}
  0x6b   :  { %167 = dma.hbm_to_vmem [thread:$0]  %s23203_s17, 16, %s165_s11, [#allocation19]  }
  0x6c   :  { %s23244_s29 = sld [smem:[#allocation45_spill]] }
  0x72   :  { %s20797_s25 = scalar_lea.hbm %s23244_s29, 256 }
  0x73   :  { %p20798_p12 = scmp.ne.s32.totalorder %s23244_s29, %s20797_s25  ;;  %p20801_p13 = scmp.lt.u32.totalorder %s20797_s25, %s23244_s29 }
  0x75   :  { %p20803_p0 = pnand %p20801_p13, %p20798_p12 }
  0x77   :  { %20806 = shalt.err (!%p20803_p0)
}
  0x78   :  { %s20807_s23 = scalar_lea.vmem %s21281_s30, 256  ;;  %p20812_p2 = scmp.lt.s32.totalorder %s21281_s30, %s21281_s30 }
  0x79   :  { %p20808_p1 = scmp.ne.s32.totalorder %s21281_s30, %s20807_s23  ;;  %p20813_p3 = scmp.lt.s32.totalorder %s20807_s23, %s20807_s23 }
  0x7b   :  { %p20814_p4 = por %p20813_p3, %p20812_p2 }
  0x7d   :  { %p20815_p5 = pnand %p20814_p4, %p20808_p1 }
  0x7f   :  { %20818 = shalt.err (!%p20815_p5)
}
  0x80   :  { %51 = dma.hbm_to_vmem [thread:$0]  %s23244_s29, 256, %s21281_s30, [#allocation4], %s21063_s3, %s21063_s3, %s21064_s0  }
  0x81   :  { %s21069_s6 = smov [#allocation8]   ;;  %s21070_s15 = smov [#allocation11]  }
  0x82   :  { %s83_s27 = sshll.u32 %s21069_s6, 4  ;;  %s107_s1 = sshll.u32 %s21070_s15, 4  ;;  %s84_s27 = int_to_ptr.vmem [resolvable:$true] %s83_s27  ;;  %s21315_s1 = int_to_ptr.vmem [resolvable:$true] %s107_s1 }
  0x83   :  { %s20819_s13 = scalar_lea.hbm %s23196_s10, 256 }
  0x84   :  { %p20820_p6 = scmp.ne.s32.totalorder %s23196_s10, %s20819_s13  ;;  %p20823_p7 = scmp.lt.u32.totalorder %s20819_s13, %s23196_s10 }
  0x86   :  { %p20825_p8 = pnand %p20823_p7, %p20820_p6 }
  0x88   :  { %20828 = shalt.err (!%p20825_p8)
}
  0x89   :  { %s20829_s30 = scalar_lea.vmem %s84_s27, 256  ;;  %p20834_p10 = scmp.lt.s32.totalorder %s84_s27, %s84_s27 }
  0x8a   :  { %p20830_p9 = scmp.ne.s32.totalorder %s84_s27, %s20829_s30  ;;  %p20835_p11 = scmp.lt.s32.totalorder %s20829_s30, %s20829_s30 }
  0x8c   :  { %p20836_p12 = por %p20835_p11, %p20834_p10 }
  0x8e   :  { %p20837_p13 = pnand %p20836_p12, %p20830_p9 }
  0x90   :  { %20840 = shalt.err (!%p20837_p13)
}
  0x91   :  { %89 = dma.hbm_to_vmem [thread:$0]  %s23196_s10, 256, %s84_s27, [#allocation7], %s21063_s3, %s21063_s3, %s21064_s0  }
  0x92   :  { %s20841_s17 = scalar_lea.hbm %s23198_s12, 512 }
  0x93   :  { %p20842_p0 = scmp.ne.s32.totalorder %s23198_s12, %s20841_s17  ;;  %p20845_p1 = scmp.lt.u32.totalorder %s20841_s17, %s23198_s12 }
  0x95   :  { %p20847_p2 = pnand %p20845_p1, %p20842_p0 }
  0x97   :  { %20850 = shalt.err (!%p20847_p2)
}
  0x98   :  { %s20851_s28 = scalar_lea.vmem %s21315_s1, 512  ;;  %p20856_p4 = scmp.lt.s32.totalorder %s21315_s1, %s21315_s1 }
  0x99   :  { %p20852_p3 = scmp.ne.s32.totalorder %s21315_s1, %s20851_s28  ;;  %p20857_p5 = scmp.lt.s32.totalorder %s20851_s28, %s20851_s28 }
  0x9b   :  { %p20858_p6 = por %p20857_p5, %p20856_p4 }
  0x9d   :  { %p20859_p7 = pnand %p20858_p6, %p20852_p3 }
  0x9f   :  { %20862 = shalt.err (!%p20859_p7)
}
  0xa0   :  { %113 = dma.hbm_to_vmem [thread:$0]  %s23198_s12, 512, %s21315_s1, [#allocation10], %s21063_s3, %s21063_s3, %s21064_s0  }
  0xa1   :  { %s21071_s13 = smov [#allocation14]   ;;  %s21072_s25 = smov [#allocation17]  }
  0xa2   :  { %s130_s24 = sshll.u32 %s21071_s13, 4  ;;  %s151_s26 = sshll.u32 %s21072_s25, 4  ;;  %s131_s24 = int_to_ptr.vmem [resolvable:$true] %s130_s24  ;;  %s21352_s26 = int_to_ptr.vmem [resolvable:$true] %s151_s26 }
  0xa3   :  { %s20863_s29 = scalar_lea.hbm %s23200_s14, 16 }
  0xa4   :  { %p20864_p8 = scmp.ne.s32.totalorder %s23200_s14, %s20863_s29  ;;  %p20867_p9 = scmp.lt.u32.totalorder %s20863_s29, %s23200_s14 }
  0xa6   :  { %p20869_p10 = pnand %p20867_p9, %p20864_p8 }
  0xa8   :  { %20872 = shalt.err (!%p20869_p10)
}
  0xa9   :  { %s20873_s12 = scalar_lea.vmem %s131_s24, 16  ;;  %s20877_s1 = scalar_lea.vmem %s131_s24, 32 }
  0xaa   :  { %p20874_p11 = scmp.ne.s32.totalorder %s131_s24, %s20873_s12  ;;  %p20878_p12 = scmp.lt.s32.totalorder %s131_s24, %s131_s24 }
  0xab   :  { %p20879_p13 = scmp.lt.s32.totalorder %s20877_s1, %s20873_s12 }
  0xad   :  { %p20880_p0 = por %p20879_p13, %p20878_p12 }
  0xaf   :  { %p20881_p1 = pnand %p20880_p0, %p20874_p11 }
  0xb1   :  { %20884 = shalt.err (!%p20881_p1)
}
  0xb2   :  { %133 = dma.hbm_to_vmem [thread:$0]  %s23200_s14, 16, %s131_s24, [#allocation13]  }
  0xb3   :  { %s20885_s28 = scalar_lea.hbm %s23202_s16, 512 }
  0xb4   :  { %p20886_p2 = scmp.ne.s32.totalorder %s23202_s16, %s20885_s28  ;;  %p20889_p3 = scmp.lt.u32.totalorder %s20885_s28, %s23202_s16 }
  0xb6   :  { %p20891_p4 = pnand %p20889_p3, %p20886_p2 }
  0xb8   :  { %20894 = shalt.err (!%p20891_p4)
}
  0xb9   :  { %s20895_s4 = scalar_lea.vmem %s21352_s26, 512  ;;  %p20900_p6 = scmp.lt.s32.totalorder %s21352_s26, %s21352_s26 }
  0xba   :  { %p20896_p5 = scmp.ne.s32.totalorder %s21352_s26, %s20895_s4  ;;  %p20901_p7 = scmp.lt.s32.totalorder %s20895_s4, %s20895_s4 }
  0xbc   :  { %p20902_p8 = por %p20901_p7, %p20900_p6 }
  0xbe   :  { %p20903_p9 = pnand %p20902_p8, %p20896_p5 }
  0xc0   :  { %20906 = shalt.err (!%p20903_p9)
}
  0xc1   :  { %157 = dma.hbm_to_vmem [thread:$0]  %s23202_s16, 512, %s21352_s26, [#allocation16], %s21063_s3, %s21063_s3, %s21064_s0  }
  0xc2   :  { %s21073_s30 = smov [#allocation20]   ;;  %s21074_s5 = smov [#allocation21]  }
  0xc3   :  { %s174_s29 = sshll.u32 %s21073_s30, 4  ;;  %s186_s2 = sshll.u32 %s21074_s5, 4  ;;  %s175_s29 = int_to_ptr.vmem [resolvable:$true] %s174_s29  ;;  %s187_s2 = int_to_ptr.vmem [resolvable:$true] %s186_s2 }
  0xc4   :  { %s20907_s12 = scalar_lea.hbm %s23204_s18, 16 }
  0xc5   :  { %p20908_p10 = scmp.ne.s32.totalorder %s23204_s18, %s20907_s12  ;;  %p20911_p11 = scmp.lt.u32.totalorder %s20907_s12, %s23204_s18 }
  0xc7   :  { %p20913_p12 = pnand %p20911_p11, %p20908_p10 }
  0xc9   :  { %20916 = shalt.err (!%p20913_p12)
}
  0xca   :  { %s20917_s16 = scalar_lea.vmem %s175_s29, 16  ;;  %s20921_s3 = scalar_lea.vmem %s175_s29, 32 }
  0xcb   :  { %p20918_p13 = scmp.ne.s32.totalorder %s175_s29, %s20917_s16  ;;  %p20922_p0 = scmp.lt.s32.totalorder %s175_s29, %s175_s29 }
  0xcc   :  { %p20923_p1 = scmp.lt.s32.totalorder %s20921_s3, %s20917_s16 }
  0xce   :  { %p20924_p2 = por %p20923_p1, %p20922_p0 }
  0xd0   :  { %p20925_p3 = pnand %p20924_p2, %p20918_p13 }
  0xd2   :  { %20928 = shalt.err (!%p20925_p3)
}
  0xd3   :  { %177 = dma.hbm_to_vmem [thread:$0]  %s23204_s18, 16, %s175_s29, [#allocation19]  }
  0xd4   :  { %s20929_s10 = scalar_lea.hbm %s23206_s20, 16 }
  0xd5   :  { %p20930_p4 = scmp.ne.s32.totalorder %s23206_s20, %s20929_s10  ;;  %p20933_p5 = scmp.lt.u32.totalorder %s20929_s10, %s23206_s20 }
  0xd7   :  { %p20935_p6 = pnand %p20933_p5, %p20930_p4 }
  0xd9   :  { %20938 = shalt.err (!%p20935_p6)
}
  0xda   :  { %s20939_s14 = scalar_lea.vmem %s187_s2, 16  ;;  %s20943_s24 = scalar_lea.vmem %s187_s2, 32 }
  0xdb   :  { %p20940_p7 = scmp.ne.s32.totalorder %s187_s2, %s20939_s14  ;;  %p20944_p8 = scmp.lt.s32.totalorder %s187_s2, %s187_s2 }
  0xdc   :  { %p20945_p9 = scmp.lt.s32.totalorder %s20943_s24, %s20939_s14 }
  0xde   :  { %p20946_p10 = por %p20945_p9, %p20944_p8 }
  0xe0   :  { %p20947_p11 = pnand %p20946_p10, %p20940_p7 }
  0xe2   :  { %20950 = shalt.err (!%p20947_p11)
}
  0xe3   :  { %189 = dma.hbm_to_vmem [thread:$0]  %s23206_s20, 16, %s187_s2, [#allocation22]  }
  0xe4   :  { %21019 = dma.done.wait [#allocation4], 256  }
  0xe5   :  { %21020 = vsyncadd [#allocation4], 4294967040 }
  0xe6   :  { %21021 = dma.done.wait [#allocation7], 768  }
  0xe7   :  { %21022 = vsyncadd [#allocation7], 4294966528 }
  0xe8   :  { %21023 = dma.done.wait [#allocation10], 1024  }
  0xe9   :  { %21024 = vsyncadd [#allocation10], 4294966272 }
  0xea   :  { %21025 = dma.done.wait [#allocation13], 32  }
  0xeb   :  { %21026 = vsyncadd [#allocation13], 4294967264 }
  0xec   :  { %21027 = dma.done.wait [#allocation16], 1024  }
  0xed   :  { %21028 = vsyncadd [#allocation16], 4294966272 }
  0xee   :  { %21029 = dma.done.wait [#allocation19], 32  }
  0xef   :  { %21030 = vsyncadd [#allocation19], 4294967264 }
  0xf0   :  { %21031 = dma.done.wait [#allocation22], 16  }
  0xf1   :  { %21032 = vsyncadd [#allocation22], 4294967280  ;;  %v21075_v0 = vmov 0   ;;  %s23245_s23 = sld [smem:[#allocation44_spill]]  ;;  %v235_v2 = vld [vmem:[#allocation3] sm:$0xff]  ;;  %v236_v3 = vld [vmem:[#allocation3 + $0x8] sm:$0xff]  ;;  %v227_v20 = vlaneseq }
  0xf2   :  { %20565 = vset.pattern.permute.xlu0 %v21075_v0  ;;  %v23224_v4 = vmov 0.0|0.0   ;;  %v242_v5 = vand.u32 4294901760, %v235_v2  ;;  %v245_v6 = vand.u32 4294901760, %v236_v3  ;;  %vm21077_vm0 = vmmov 0   ;;  %s23246_s17 = sld [smem:[#allocation46_spill]]  ;;  %s23247_s26 = sld [smem:[#allocation47_spill]] }
  0xf3   :  { %19102 = vmatprep.subr.bf16.mxu0 %v23224_v4  ;;  %v23216_v7 = vmov 0.0   ;;  %19120 = vmatprep.subr.bf16.mxu1 %v23224_v4  ;;  %v21421_v21 = vand.u32 127, %v227_v20  ;;  %vm237_vm1 = vcmask 130048   ;;  %vm716_vm3 = vcmask 261120   ;;  %s23248_s24 = sld [smem:[#allocation49_spill]]  ;;  %s21079_s18 = smov 64  }
  0xf4   :  { %17132 = vmatprep.mubr.msk.f32.mxu0 %vm21077_vm0, %v23216_v7  ;;  %17178 = vmatprep.mubr.msk.f32.mxu1 %vm21077_vm0, %v23216_v7  ;;  %v19103_v8 = vpack.c.bf16 %v245_v6, %v242_v5  ;;  %v320_v9 = vsub.f32 %v235_v2, %v242_v5  ;;  %v327_v10 = vsub.f32 %v236_v3, %v245_v6  ;;  %s23249_s5 = sld [smem:[#allocation48_spill]]  ;;  %vm1731_vm4 = vcmask 253952  }
  0xf5   :  { %vm2257_vm5 = vcmask 254977   ;;  %vm3315_vm6 = vcmask 257027   ;;  %vm4373_vm7 = vcmask 259077   ;;  %vm2786_vm8 = vcmask 256002  }
  0xf6   :  { %19104 = vmatpush3.bf16.msra.mxu0 %v19103_v8  ;;  %v321_v11 = vand.u32 4294901760, %v320_v9  ;;  %v328_v12 = vand.u32 4294901760, %v327_v10  ;;  %v19109_v18 = vpack.c.bf16 %v327_v10, %v320_v9  ;;  %vm3844_vm9 = vcmask 258052  }
  0xf7   :  { %v226_v1 = vld [vmem:[%s23245_s23] sm:$0xff]  ;;  %19105 = vmatprep.subr.bf16.mxu0 %v23224_v4  ;;  %s21080_s23 = smov 96   ;;  %vm4902_vm10 = vcmask 260102   ;;  %vm5431_vm11 = vcmask 261127   ;;  %vm10158_vm12 = vcmp.eq.s32.totalorder %v21421_v21, 0  ;;  %vm13125_vm13 = vcmask 122880  }
  0xf8   :  { %230 = vperm.xlu0 %20565, %v226_v1   ;;  %v322_v13 = vsub.f32 %v320_v9, %v321_v11  ;;  %v329_v14 = vsub.f32 %v327_v10, %v328_v12  ;;  %v19115_v19 = vpack.c.bf16 %v328_v12, %v321_v11  ;;  %v700_v29 = vld [vmem:[%s23246_s17] sm:$0xff]  ;;  %v701_v30 = vld [vmem:[%s23246_s17 + $0x8] sm:$0xff]  ;;  %v702_v36 = vld [vmem:[%s23246_s17 + $0x10] sm:$0xff] }
  0xf9   :  { %v721_v31 = vand.u32 4294901760, %v700_v29  ;;  %v724_v32 = vand.u32 4294901760, %v701_v30  ;;  %v703_v37 = vld [vmem:[%s23246_s17 + $0x18] sm:$0xff]  ;;  %v727_v38 = vand.u32 4294901760, %v702_v36  ;;  %v704_v59 = vld [vmem:[%s23247_s26] sm:$0xff]  ;;  %v705_v60 = vld [vmem:[%s23247_s26 + $0x8] sm:$0xff] }
  0xfa   :  { %v323_v15 = vand.u32 4294901760, %v322_v13  ;;  %v330_v16 = vand.u32 4294901760, %v329_v14  ;;  %v730_v39 = vand.u32 4294901760, %v703_v37  ;;  %v1216_v61 = vand.u32 4294901760, %v704_v59  ;;  %v706_v1 = vld [vmem:[%s23247_s26 + $0x10] sm:$0xff]  ;;  %v707_v2 = vld [vmem:[%s23247_s26 + $0x18] sm:$0xff] }
  0xfb   :  { %v21452_v33 = vpack.c.bf16 %v724_v32, %v721_v31  ;;  %v21454_v34 = vsub.f32 %v700_v29, %v721_v31  ;;  %v21456_v35 = vsub.f32 %v701_v30, %v724_v32  ;;  %v21470_v43 = vsub.f32 %v702_v36, %v727_v38  ;;  %s23250_s17 = sld [smem:[#allocation50_spill]] }
  0xfc   :  { %v19106_v17 = vpack.c.bf16 %v330_v16, %v323_v15  ;;  %v21468_v42 = vpack.c.bf16 %v730_v39, %v727_v38  ;;  %v21472_v44 = vsub.f32 %v703_v37, %v730_v39  ;;  %v1219_v62 = vand.u32 4294901760, %v705_v60 }
  0xfd   :  { %19122 = vmatpush3.bf16.msra.mxu1 %v21452_v33  ;;  %v802_v40 = vand.u32 4294901760, %v21454_v34  ;;  %v809_v41 = vand.u32 4294901760, %v21456_v35  ;;  %v816_v49 = vand.u32 4294901760, %v21470_v43  ;;  %v19133_v57 = vpack.c.bf16 %v21456_v35, %v21454_v34 }
  0xfe   :  { %19123 = vmatprep.subr.bf16.mxu1 %v23224_v4  ;;  %v823_v50 = vand.u32 4294901760, %v21472_v44  ;;  %v19136_v58 = vpack.c.bf16 %v21472_v44, %v21470_v43  ;;  %v21496_v63 = vpack.c.bf16 %v1219_v62, %v1216_v61  ;;  %v1222_v3 = vand.u32 4294901760, %v706_v1 }
  0xff   :  { %v803_v45 = vsub.f32 %v21454_v34, %v802_v40  ;;  %v810_v46 = vsub.f32 %v21456_v35, %v809_v41  ;;  %v817_v52 = vsub.f32 %v21470_v43, %v816_v49  ;;  %v21498_v0 = vpack.c.bf16 %v809_v41, %v802_v40 }
 0x100   :  { %v824_v53 = vsub.f32 %v21472_v44, %v823_v50  ;;  %v1225_v5 = vand.u32 4294901760, %v707_v2  ;;  %v21508_v6 = vpack.c.bf16 %v823_v50, %v816_v49  ;;  %v1296_v9 = vsub.f32 %v704_v59, %v1216_v61 }
 0x101   :  { %19125 = vmatpush3.bf16.msra.mxu1 %v21468_v42  ;;  %v804_v47 = vand.u32 4294901760, %v803_v45  ;;  %v811_v48 = vand.u32 4294901760, %v810_v46  ;;  %v818_v54 = vand.u32 4294901760, %v817_v52  ;;  %v1303_v10 = vsub.f32 %v705_v60, %v1219_v62  ;;  %v16204_v52 = vld [vmem:[%s23249_s5] ss:$0 sm:$0xff] }
 0x102   :  { %19126 = vmatprep.subr.bf16.mxu1 %v23224_v4  ;;  %v825_v55 = vand.u32 4294901760, %v824_v53  ;;  %v1297_v11 = vand.u32 4294901760, %v1296_v9  ;;  %v1310_v14 = vsub.f32 %v706_v1, %v1222_v3  ;;  %v1317_v15 = vsub.f32 %v707_v2, %v1225_v5 }
 0x103   :  { %v21480_v51 = vpack.c.bf16 %v811_v48, %v804_v47  ;;  %v1304_v12 = vand.u32 4294901760, %v1303_v10  ;;  %v21543_v31 = vpack.c.bf16 %v1303_v10, %v1296_v9  ;;  %v21612_v48 = vld [vmem:[%s23248_s24] sm:$0x1]  ;;  %v21617_v50 = vshrl.u32 %v227_v20, 7 }
 0x104   :  { %v21484_v56 = vpack.c.bf16 %v825_v55, %v818_v54  ;;  %v1311_v16 = vand.u32 4294901760, %v1310_v14  ;;  %v21545_v32 = vpack.c.bf16 %v1317_v15, %v1310_v14 }
 0x105   :  { %v21514_v13 = vpack.c.bf16 %v1304_v12, %v1297_v11 }
 0x177   :  { %v231_v22 = vpop.permute.xlu0 %230 }
 0x178   :  { %vm232_vm2 = vcmp.eq.s32.totalorder %v21421_v21, %v231_v22  ;;  %v1305_v22 = vsub.f32 %v1303_v10, %v1304_v12 }
 0x179   :  { %v16200_v23 = vsel %vm232_vm2, 1.0, %v23216_v7 }
 0x17a   :  { %v239_v24 = vsel %vm237_vm1, %v16200_v23, 0 }
 0x17b   :  { %v309_v25 = vsub.f32 %v239_v24, %v239_v24  ;;  %v1306_v24 = vand.u32 4294901760, %v1305_v22 }
 0x17d   :  { %v310_v26 = vand.u32 4294901760, %v309_v25 }
 0x17f   :  { %v311_v27 = vsub.f32 %v309_v25, %v310_v26 }
 0x181   :  { %v312_v28 = vand.u32 4294901760, %v311_v27 }
 0x183   :  { %17133 = vmatmul.mubr.f32.vlgmr.msra.gmra.mrb[0].mxu0 %v312_v28 }
 0x184   :  { %19107 = vmatpush3.bf16.msra.mxu0 %v19106_v17  ;;  %17139 = vmatprep.mubr.msk.f32.mxu0 %vm21077_vm0, %v23216_v7  ;;  %v1318_v17 = vand.u32 4294901760, %v1317_v15 }
 0x185   :  { %19108 = vmatprep.subr.bf16.mxu0 %v23224_v4 }
 0x186   :  { %v1319_v27 = vsub.f32 %v1317_v15, %v1318_v17 }
 0x188   :  { %v1320_v29 = vand.u32 4294901760, %v1319_v27 }
 0x18b   :  { %17140 = vmatmul.mubr.msk.f32.vlgmr.msra.gmra.mrb[0].mxu0 %vm237_vm1, %v16200_v23 }
 0x18c   :  { %19110 = vmatpush3.bf16.msra.mxu0 %v19109_v18  ;;  %17146 = vmatprep.mubr.msk.f32.mxu0 %vm21077_vm0, %v23216_v7  ;;  %v21521_v18 = vpack.c.bf16 %v1318_v17, %v1311_v16 }
 0x18d   :  { %19111 = vmatprep.subr.bf16.mxu0 %v23224_v4 }
 0x193   :  { %17147 = vmatmul.mubr.f32.vlgmr.msra.gmra.mrb[0].mxu0 %v309_v25 }
 0x194   :  { %19113 = vmatpush3.bf16.msra.mxu0 %v19103_v8  ;;  %17153 = vmatprep.mubr.msk.f32.mxu0 %vm21077_vm0, %v23216_v7 }
 0x195   :  { %19114 = vmatprep.subr.bf16.mxu0 %v23224_v4 }
 0x19b   :  { %17154 = vmatmul.mubr.f32.vlgmr.msra.gmra.mrb[0].mxu0 %v310_v26  ;;  %v1312_v26 = vsub.f32 %v1310_v14, %v1311_v16 }
 0x19c   :  { %19116 = vmatpush3.bf16.msra.mxu0 %v19115_v19  ;;  %17160 = vmatprep.mubr.msk.f32.mxu0 %vm21077_vm0, %v23216_v7  ;;  %v1298_v19 = vsub.f32 %v1296_v9, %v1297_v11 }
 0x19d   :  { %19117 = vmatprep.subr.bf16.mxu0 %v23224_v4  ;;  %v1313_v28 = vand.u32 4294901760, %v1312_v26 }
 0x19f   :  { %v21539_v30 = vpack.c.bf16 %v1320_v29, %v1313_v28 }
 0x1a3   :  { %17161 = vmatmul.mubr.msk.f32.vlgmr.msra.gmra.mrb[0].mxu0 %vm237_vm1, %v16200_v23 }
 0x1a4   :  { %19119 = vmatpush3.bf16.msra.mxu0 %v19103_v8  ;;  %17167 = vmatprep.mubr.msk.f32.mxu0 %vm21077_vm0, %v23216_v7  ;;  %v21510_v8 = vpack.c.bf16 %v1225_v5, %v1222_v3 }
 0x1a5   :  { %19174 = vmatprep.subr.bf16.mxu0 %v23224_v4 }
 0x1ab   :  { %17168 = vmatmul.mubr.msk.f32.vlgmr.msra.gmra.mrb[0].mxu0 %vm237_vm1, %v16200_v23  ;;  %v1299_v23 = vand.u32 4294901760, %v1298_v19 }
 0x1ac   :  { %17277 = vmatprep.mubr.msk.f32.mxu0 %vm21077_vm0, %v23216_v7  ;;  %19176 = vmatpush3.bf16.msra.mxu0 %v21496_v63 }
 0x1ad   :  { %19177 = vmatprep.subr.bf16.mxu0 %v23224_v4  ;;  %v21533_v25 = vpack.c.bf16 %v1306_v24, %v1299_v23 }
 0x1b0   :  { %19179 = vmatpush3.bf16.msra.mxu0 %v21510_v8 }
 0x1b1   :  { %19180 = vmatprep.subr.bf16.mxu0 %v23224_v4 }
 0x1b3   :  { %17278 = vmatmul.mubr.f32.vlgmr.msra.gmra.mrb[2].mxu0 %v23216_v7 }
 0x1b4   :  { %19182 = vmatpush3.bf16.msra.mxu0 %v21514_v13  ;;  %17288 = vmatprep.mubr.msk.f32.mxu0 %vm21077_vm0, %v23216_v7 }
 0x1b5   :  { %19183 = vmatprep.subr.bf16.mxu0 %v23224_v4 }
 0x1b8   :  { %19185 = vmatpush3.bf16.msra.mxu0 %v21521_v18 }
 0x1b9   :  { %19186 = vmatprep.subr.bf16.mxu0 %v23224_v4 }
 0x1bb   :  { %17289 = vmatmul.mubr.f32.vlgmr.msra.gmra.mrb[2].mxu0 %v23216_v7 }
 0x1bc   :  { %19188 = vmatpush3.bf16.msra.mxu0 %v21496_v63  ;;  %17299 = vmatprep.mubr.msk.f32.mxu0 %vm21077_vm0, %v23216_v7 }
 0x1bd   :  { %19189 = vmatprep.subr.bf16.mxu0 %v23224_v4 }
 0x1c0   :  { %19191 = vmatpush3.bf16.msra.mxu0 %v21510_v8 }
 0x1c1   :  { %19228 = vmatprep.subr.bf16.mxu0 %v23224_v4 }
 0x1c3   :  { %17300 = vmatmul.mubr.f32.vlgmr.msra.gmra.mrb[2].mxu0 %v23216_v7 }
 0x1c4   :  { %19230 = vmatpush3.bf16.msra.mxu0 %v21496_v63  ;;  %17376 = vmatprep.mubr.msk.f32.mxu0 %vm21077_vm0, %v23216_v7 }
 0x1c5   :  { %19231 = vmatprep.subr.bf16.mxu0 %v23224_v4 }
 0x1c8   :  { %19233 = vmatpush3.bf16.msra.mxu0 %v21510_v8 }
 0x1c9   :  { %19234 = vmatprep.subr.bf16.mxu0 %v23224_v4 }
 0x27e   :  { %v696_v36 = vpop.f32.mrb[0].mxu0 }
 0x27f   :  { %v718_v37 = vsel %vm716_vm3, %v696_v36, 0  ;;  %v17169_v38 = vpop.f32.mrb[1].mxu0 }
 0x280   :  { %v789_v39 = vand.u32 4294901760, %v718_v37 }
 0x282   :  { %v790_v40 = vsub.f32 %v718_v37, %v789_v39 }
 0x284   :  { %v791_v41 = vand.u32 4294901760, %v790_v40 }
 0x286   :  { %v792_v45 = vsub.f32 %v790_v40, %v791_v41 }
 0x288   :  { %v793_v46 = vand.u32 4294901760, %v792_v45 }
 0x28a   :  { %17179 = vmatmul.mubr.f32.vlgmr.msra.gmra.mrb[0].mxu1 %v793_v46 }
 0x28b   :  { %19128 = vmatpush3.bf16.msra.mxu1 %v21480_v51  ;;  %17189 = vmatprep.mubr.msk.f32.mxu1 %vm21077_vm0, %v23216_v7  ;;  %v1208_v51 = vsub.s32 0, %v21617_v50 }
 0x28c   :  { %19129 = vmatprep.subr.bf16.mxu1 %v23224_v4 }
 0x28d   :  { %v1209_v53 = vrot.slane %v21612_v48, %v1208_v51 }
 0x28f   :  { %19131 = vmatpush3.bf16.msra.mxu1 %v21484_v56 }
 0x290   :  { %19132 = vmatprep.subr.bf16.mxu1 %v23224_v4 }
 0x292   :  { %17190 = vmatmul.mubr.f32.vlgmr.msra.gmra.mrb[0].mxu1 %v789_v39 }
 0x293   :  { %19134 = vmatpush3.bf16.msra.mxu1 %v19133_v57  ;;  %17200 = vmatprep.mubr.msk.f32.mxu1 %vm21077_vm0, %v23216_v7 }
 0x294   :  { %19135 = vmatprep.subr.bf16.mxu1 %v23224_v4 }
 0x297   :  { %19137 = vmatpush3.bf16.msra.mxu1 %v19136_v58 }
 0x298   :  { %19138 = vmatprep.subr.bf16.mxu1 %v23224_v4 }
 0x29a   :  { %17201 = vmatmul.mubr.f32.vlgmr.msra.gmra.mrb[0].mxu1 %v790_v40 }
 0x29b   :  { %19140 = vmatpush3.bf16.msra.mxu1 %v21452_v33  ;;  %17211 = vmatprep.mubr.msk.f32.mxu1 %vm21077_vm0, %v23216_v7 }
 0x29c   :  { %19141 = vmatprep.subr.bf16.mxu1 %v23224_v4 }
 0x29f   :  { %19143 = vmatpush3.bf16.msra.mxu1 %v21468_v42 }
 0x2a0   :  { %19144 = vmatprep.subr.bf16.mxu1 %v23224_v4 }
 0x2a2   :  { %17212 = vmatmul.mubr.f32.vlgmr.msra.gmra.mrb[0].mxu1 %v791_v41 }
 0x2a3   :  { %19146 = vmatpush3.bf16.msra.mxu1 %v21498_v0  ;;  %17222 = vmatprep.mubr.msk.f32.mxu1 %vm21077_vm0, %v23216_v7 }
 0x2a4   :  { %19147 = vmatprep.subr.bf16.mxu1 %v23224_v4 }
 0x2a7   :  { %19149 = vmatpush3.bf16.msra.mxu1 %v21508_v6 }
 0x2a8   :  { %19150 = vmatprep.subr.bf16.mxu1 %v23224_v4 }
 0x2aa   :  { %17223 = vmatmul.mubr.f32.vlgmr.msra.gmra.mrb[0].mxu1 %v789_v39 }
 0x2ab   :  { %19152 = vmatpush3.bf16.msra.mxu1 %v21452_v33  ;;  %17233 = vmatprep.mubr.msk.f32.mxu1 %vm21077_vm0, %v23216_v7  ;;  %v1696_v33 = vpop.f32.mrb[2].mxu0 }
 0x2ac   :  { %19153 = vmatprep.subr.bf16.mxu1 %v23224_v4  ;;  %v17301_v34 = vpop.f32.mrb[3].mxu0 }
 0x2af   :  { %19155 = vmatpush3.bf16.msra.mxu1 %v21468_v42 }
 0x2b0   :  { %19156 = vmatprep.subr.bf16.mxu1 %v23224_v4 }
 0x2b2   :  { %17234 = vmatmul.mubr.f32.vlgmr.msra.gmra.mrb[0].mxu1 %v789_v39 }
 0x2b3   :  { %19158 = vmatpush3.bf16.msra.mxu1 %v21496_v63  ;;  %17244 = vmatprep.mubr.msk.f32.mxu1 %vm21077_vm0, %v23216_v7 }
 0x2b4   :  { %19159 = vmatprep.subr.bf16.mxu1 %v23224_v4 }
 0x2b7   :  { %19161 = vmatpush3.bf16.msra.mxu1 %v21510_v8 }
 0x2b8   :  { %19162 = vmatprep.subr.bf16.mxu1 %v23224_v4 }
 0x2ba   :  { %17245 = vmatmul.mubr.f32.vlgmr.msra.gmra.mrb[2].mxu1 %v23216_v7 }
 0x2bb   :  { %19164 = vmatpush3.bf16.msra.mxu1 %v21533_v25  ;;  %17255 = vmatprep.mubr.msk.f32.mxu1 %vm21077_vm0, %v23216_v7 }
 0x2bc   :  { %19165 = vmatprep.subr.bf16.mxu1 %v23224_v4 }
 0x2bf   :  { %19167 = vmatpush3.bf16.msra.mxu1 %v21539_v30 }
 0x2c0   :  { %19168 = vmatprep.subr.bf16.mxu1 %v23224_v4 }
 0x2c2   :  { %17256 = vmatmul.mubr.f32.vlgmr.msra.gmra.mrb[2].mxu1 %v23216_v7 }
 0x2c3   :  { %19170 = vmatpush3.bf16.msra.mxu1 %v21543_v31  ;;  %17266 = vmatprep.mubr.msk.f32.mxu1 %vm21077_vm0, %v23216_v7 }
 0x2c4   :  { %19171 = vmatprep.subr.bf16.mxu1 %v23224_v4 }
 0x2c7   :  { %19173 = vmatpush3.bf16.msra.mxu1 %v21545_v32 }
 0x2c8   :  { %19192 = vmatprep.subr.bf16.mxu1 %v23224_v4 }
 0x2ca   :  { %17267 = vmatmul.mubr.f32.vlgmr.msra.gmra.mrb[2].mxu1 %v23216_v7 }
 0x2cb   :  { %19194 = vmatpush3.bf16.msra.mxu1 %v21496_v63  ;;  %17310 = vmatprep.mubr.msk.f32.mxu1 %vm21077_vm0, %v23216_v7 }
 0x2cc   :  { %19195 = vmatprep.subr.bf16.mxu1 %v23224_v4 }
 0x2cf   :  { %19197 = vmatpush3.bf16.msra.mxu1 %v21510_v8 }
 0x2d0   :  { %19198 = vmatprep.subr.bf16.mxu1 %v23224_v4 }
 0x385   :  { %v1201_v35 = vpop.f32.mrb[0].mxu1 }
 0x386   :  { %v17235_v42 = vpop.f32.mrb[1].mxu1  ;;  %v21626_v54 = vadd.f32 %v16204_v52, %v1201_v35 }
 0x388   :  { %v21629_v55 = vadd.f32 %v21626_v54, %v1209_v53 }
 0x39d   :  { %v1461_v43 = vpop.f32.mrb[2].mxu1 }
 0x39e   :  { %v20165_v44 = vadd.f32 %v1696_v33, %v1461_v43  ;;  %v17268_v47 = vpop.f32.mrb[3].mxu1 }
 0x3a0   :  { %v1707_v49 = vadd.f32 %v20165_v44, %v21612_v48  ;;  %v1700_v56 = vadd.f32 %v20165_v44, %v21629_v55 }
 0x3a2   :  { %1709 = vrot.lane.b32.xlu0 %v1707_v49, %s21079_s18  ;;  %v16205_v57 = vmul.f32 -1.442695, %v1700_v56 }
 0x3a4   :  { %20566 = vpow2.f32 %v16205_v57 }
 0x3ae   :  { %v20567_v20 = vpop.eup %20566 }
 0x3af   :  { %v1704_v58 = vadd.f32 1.0, %v20567_v20 }
 0x3b1   :  { %20568 = vrcp.f32 %v1704_v58 }
 0x3bb   :  { %v20569_v59 = vpop.eup %20568 }
 0x3bc   :  { %v1719_v2 = vsub.f32 1.0, %v20569_v59  ;;  %v1725_v5 = vmul.f32 0.0, %v20569_v59 }
 0x414   :  { %v1710_v60 = vpop.permute.xlu0 %1709 }
 0x415   :  { %v1712_v61 = vmul.f32 %v20569_v59, %v1710_v60 }
 0x417   :  { %1714 = vrot.lane.b32.xlu1 %v1712_v61, %s21079_s18 }
 0x489   :  { %v1715_v62 = vpop.permute.xlu1 %1714 }
 0x48a   :  { %v1717_v0 = vadd.f32 %v21626_v54, %v1715_v62 }
 0x48c   :  { %20570 = vtanh.f32 %v1717_v0 }
 0x496   :  { %v20571_v1 = vpop.eup %20570 }
 0x497   :  { %1721 = vrot.lane.b32.xlu1 %v20571_v1, %s21080_s23 }
 0x509   :  { %v1722_v3 = vpop.permute.xlu1 %1721 }
 0x50a   :  { %v1724_v6 = vmul.f32 %v1722_v3, %v1719_v2 }
 0x50c   :  { %v21635_v9 = vadd.f32 %v1725_v5, %v1724_v6 }
 0x50e   :  { %1728 = vrot.lane.b32.xlu0 %v21635_v9, %s21080_s23  ;;  %v2249_v46 = vrot.slane %v21635_v9, 7 }
 0x580   :  { %v1729_v10 = vpop.permute.xlu0 %1728 }
 0x581   :  { %1732 = vst.msk [vmem:[#allocation2] sm:$0x1] %vm1731_vm4, %v1729_v10  ;;  %v1733_v11 = vsel %vm716_vm3, %v1729_v10, 0 }
 0x582   :  { %v1804_v12 = vand.u32 4294901760, %v1733_v11 }
 0x584   :  { %v1805_v14 = vsub.f32 %v1733_v11, %v1804_v12 }
 0x586   :  { %v1806_v15 = vand.u32 4294901760, %v1805_v14 }
 0x588   :  { %v1807_v16 = vsub.f32 %v1805_v14, %v1806_v15 }
 0x58a   :  { %v1808_v17 = vand.u32 4294901760, %v1807_v16 }
 0x58c   :  { %17311 = vmatmul.mubr.f32.vlgmr.msra.gmra.mrb[4].mxu1 %v1808_v17 }
 0x58d   :  { %19200 = vmatpush3.bf16.msra.mxu1 %v21533_v25  ;;  %17321 = vmatprep.mubr.msk.f32.mxu1 %vm21077_vm0, %v23216_v7 }
 0x58e   :  { %19201 = vmatprep.subr.bf16.mxu1 %v23224_v4 }
 0x591   :  { %19203 = vmatpush3.bf16.msra.mxu1 %v21539_v30 }
 0x592   :  { %19204 = vmatprep.subr.bf16.mxu1 %v23224_v4 }
 0x594   :  { %17322 = vmatmul.mubr.f32.vlgmr.msra.gmra.mrb[4].mxu1 %v1804_v12 }
 0x595   :  { %19206 = vmatpush3.bf16.msra.mxu1 %v21543_v31  ;;  %17332 = vmatprep.mubr.msk.f32.mxu1 %vm21077_vm0, %v23216_v7 }
 0x596   :  { %19207 = vmatprep.subr.bf16.mxu1 %v23224_v4 }
 0x599   :  { %19209 = vmatpush3.bf16.msra.mxu1 %v21545_v32 }
 0x59a   :  { %19210 = vmatprep.subr.bf16.mxu1 %v23224_v4 }
 0x59c   :  { %17333 = vmatmul.mubr.f32.vlgmr.msra.gmra.mrb[4].mxu1 %v1805_v14 }
 0x59d   :  { %19212 = vmatpush3.bf16.msra.mxu1 %v21496_v63  ;;  %17343 = vmatprep.mubr.msk.f32.mxu1 %vm21077_vm0, %v23216_v7 }
 0x59e   :  { %19213 = vmatprep.subr.bf16.mxu1 %v23224_v4 }
 0x5a1   :  { %19215 = vmatpush3.bf16.msra.mxu1 %v21510_v8 }
 0x5a2   :  { %19216 = vmatprep.subr.bf16.mxu1 %v23224_v4 }
 0x5a4   :  { %17344 = vmatmul.mubr.f32.vlgmr.msra.gmra.mrb[4].mxu1 %v1806_v15 }
 0x5a5   :  { %19218 = vmatpush3.bf16.msra.mxu1 %v21514_v13  ;;  %17354 = vmatprep.mubr.msk.f32.mxu1 %vm21077_vm0, %v23216_v7 }
 0x5a6   :  { %19219 = vmatprep.subr.bf16.mxu1 %v23224_v4 }
 0x5a9   :  { %19221 = vmatpush3.bf16.msra.mxu1 %v21521_v18 }
 0x5aa   :  { %19222 = vmatprep.subr.bf16.mxu1 %v23224_v4 }
 0x5ac   :  { %17355 = vmatmul.mubr.f32.vlgmr.msra.gmra.mrb[4].mxu1 %v1804_v12 }
 0x5ad   :  { %19224 = vmatpush3.bf16.msra.mxu1 %v21496_v63  ;;  %17365 = vmatprep.mubr.msk.f32.mxu1 %vm21077_vm0, %v23216_v7 }
 0x5ae   :  { %19225 = vmatprep.subr.bf16.mxu1 %v23224_v4 }
 0x5b1   :  { %19227 = vmatpush3.bf16.msra.mxu1 %v21510_v8 }
 0x5b2   :  { %19264 = vmatprep.subr.bf16.mxu1 %v23224_v4 }
 0x5b4   :  { %17366 = vmatmul.mubr.f32.vlgmr.msra.gmra.mrb[4].mxu1 %v1804_v12 }
 0x5b5   :  { %19266 = vmatpush3.bf16.msra.mxu1 %v21496_v63  ;;  %17442 = vmatprep.mubr.msk.f32.mxu1 %vm21077_vm0, %v23216_v7 }
 0x5b6   :  { %19267 = vmatprep.subr.bf16.mxu1 %v23224_v4 }
 0x5b9   :  { %19269 = vmatpush3.bf16.msra.mxu1 %v21510_v8 }
 0x5ba   :  { %19270 = vmatprep.subr.bf16.mxu1 %v23224_v4 }
 0x687   :  { %v2216_v19 = vpop.f32.mrb[4].mxu1 }
 0x688   :  { %v2230_v22 = vadd.f32 %v2216_v19, %v21612_v48  ;;  %v17367_v23 = vpop.f32.mrb[5].mxu1  ;;  %v2221_v26 = vrot.slane %v2216_v19, 7 }
 0x68a   :  { %v2232_v24 = vrot.slane %v2230_v22, 7  ;;  %v2223_v27 = vadd.f32 %v2221_v26, %v21629_v55 }
 0x68c   :  { %2233 = vrot.lane.b32.xlu1 %v2232_v24, %s21079_s18  ;;  %v16206_v28 = vmul.f32 -1.442695, %v2223_v27 }
 0x68e   :  { %20572 = vpow2.f32 %v16206_v28 }
 0x698   :  { %v20573_v29 = vpop.eup %20572 }
 0x699   :  { %v2227_v36 = vadd.f32 1.0, %v20573_v29 }
 0x69b   :  { %20574 = vrcp.f32 %v2227_v36 }
 0x6a5   :  { %v20575_v37 = vpop.eup %20574 }
 0x6a6   :  { %v2243_v33 = vsub.f32 1.0, %v20575_v37  ;;  %v2251_v42 = vmul.f32 %v20575_v37, %v2249_v46 }
 0x6fe   :  { %v2234_v38 = vpop.permute.xlu1 %2233 }
 0x6ff   :  { %v2236_v39 = vmul.f32 %v20575_v37, %v2234_v38 }
 0x701   :  { %2238 = vrot.lane.b32.xlu0 %v2236_v39, %s21079_s18 }
 0x773   :  { %v2239_v40 = vpop.permute.xlu0 %2238 }
 0x774   :  { %v2241_v41 = vadd.f32 %v21626_v54, %v2239_v40 }
 0x776   :  { %20576 = vtanh.f32 %v2241_v41 }
 0x780   :  { %v20577_v45 = vpop.eup %20576 }
 0x781   :  { %2245 = vrot.lane.b32.xlu1 %v20577_v45, %s21080_s23 }
 0x7f3   :  { %v2246_v34 = vpop.permute.xlu1 %2245 }
 0x7f4   :  { %v2248_v35 = vmul.f32 %v2246_v34, %v2243_v33 }
 0x7f6   :  { %v21683_v43 = vadd.f32 %v2251_v42, %v2248_v35 }
 0x7f8   :  { %v2259_v44 = vrot.slane %v21683_v43, 1  ;;  %v2778_v15 = vrot.slane %v21683_v43, 7 }
 0x7fa   :  { %2260 = vrot.lane.b32.xlu0 %v2259_v44, %s21080_s23 }
 0x86c   :  { %v2261_v47 = vpop.permute.xlu0 %2260 }
 0x86d   :  { %v2262_v49 = vsel %vm716_vm3, %v2261_v47, 0 }
 0x86e   :  { %v2333_v52 = vand.u32 4294901760, %v2262_v49 }
 0x870   :  { %v2334_v53 = vsub.f32 %v2262_v49, %v2333_v52 }
 0x872   :  { %v2335_v56 = vand.u32 4294901760, %v2334_v53 }
 0x874   :  { %v2336_v57 = vsub.f32 %v2334_v53, %v2335_v56 }
 0x876   :  { %v2337_v20 = vand.u32 4294901760, %v2336_v57 }
 0x878   :  { %17377 = vmatmul.mubr.f32.vlgmr.msra.gmra.mrb[4].mxu0 %v2337_v20 }
 0x879   :  { %19236 = vmatpush3.bf16.msra.mxu0 %v21533_v25  ;;  %17387 = vmatprep.mubr.msk.f32.mxu0 %vm21077_vm0, %v23216_v7 }
 0x87a   :  { %19237 = vmatprep.subr.bf16.mxu0 %v23224_v4 }
 0x87d   :  { %19239 = vmatpush3.bf16.msra.mxu0 %v21539_v30 }
 0x87e   :  { %19240 = vmatprep.subr.bf16.mxu0 %v23224_v4 }
 0x880   :  { %17388 = vmatmul.mubr.f32.vlgmr.msra.gmra.mrb[4].mxu0 %v2333_v52 }
 0x881   :  { %19242 = vmatpush3.bf16.msra.mxu0 %v21543_v31  ;;  %17398 = vmatprep.mubr.msk.f32.mxu0 %vm21077_vm0, %v23216_v7 }
 0x882   :  { %19243 = vmatprep.subr.bf16.mxu0 %v23224_v4 }
 0x885   :  { %19245 = vmatpush3.bf16.msra.mxu0 %v21545_v32 }
 0x886   :  { %19246 = vmatprep.subr.bf16.mxu0 %v23224_v4 }
 0x888   :  { %17399 = vmatmul.mubr.f32.vlgmr.msra.gmra.mrb[4].mxu0 %v2334_v53 }
 0x889   :  { %19248 = vmatpush3.bf16.msra.mxu0 %v21496_v63  ;;  %17409 = vmatprep.mubr.msk.f32.mxu0 %vm21077_vm0, %v23216_v7 }
 0x88a   :  { %19249 = vmatprep.subr.bf16.mxu0 %v23224_v4 }
 0x88d   :  { %19251 = vmatpush3.bf16.msra.mxu0 %v21510_v8 }
 0x88e   :  { %19252 = vmatprep.subr.bf16.mxu0 %v23224_v4 }
 0x890   :  { %17410 = vmatmul.mubr.f32.vlgmr.msra.gmra.mrb[4].mxu0 %v2335_v56 }
 0x891   :  { %19254 = vmatpush3.bf16.msra.mxu0 %v21514_v13  ;;  %17420 = vmatprep.mubr.msk.f32.mxu0 %vm21077_vm0, %v23216_v7 }
 0x892   :  { %19255 = vmatprep.subr.bf16.mxu0 %v23224_v4 }
 0x895   :  { %19257 = vmatpush3.bf16.msra.mxu0 %v21521_v18 }
 0x896   :  { %19258 = vmatprep.subr.bf16.mxu0 %v23224_v4 }
 0x898   :  { %17421 = vmatmul.mubr.f32.vlgmr.msra.gmra.mrb[4].mxu0 %v2333_v52 }
 0x899   :  { %19260 = vmatpush3.bf16.msra.mxu0 %v21496_v63  ;;  %17431 = vmatprep.mubr.msk.f32.mxu0 %vm21077_vm0, %v23216_v7 }
 0x89a   :  { %19261 = vmatprep.subr.bf16.mxu0 %v23224_v4 }
 0x89d   :  { %19263 = vmatpush3.bf16.msra.mxu0 %v21510_v8 }
 0x89e   :  { %19300 = vmatprep.subr.bf16.mxu0 %v23224_v4 }
 0x8a0   :  { %17432 = vmatmul.mubr.f32.vlgmr.msra.gmra.mrb[4].mxu0 %v2333_v52 }
 0x8a1   :  { %19302 = vmatpush3.bf16.msra.mxu0 %v21496_v63  ;;  %17508 = vmatprep.mubr.msk.f32.mxu0 %vm21077_vm0, %v23216_v7 }
 0x8a2   :  { %19303 = vmatprep.subr.bf16.mxu0 %v23224_v4 }
 0x8a5   :  { %19305 = vmatpush3.bf16.msra.mxu0 %v21510_v8 }
 0x8a6   :  { %19306 = vmatprep.subr.bf16.mxu0 %v23224_v4 }
 0x973   :  { %v2745_v58 = vpop.f32.mrb[4].mxu0 }
 0x974   :  { %v2759_v59 = vadd.f32 %v2745_v58, %v21612_v48  ;;  %v17433_v60 = vpop.f32.mrb[5].mxu0  ;;  %v2750_v62 = vrot.slane %v2745_v58, 6 }
 0x976   :  { %v2761_v61 = vrot.slane %v2759_v59, 6  ;;  %v2752_v0 = vadd.f32 %v2750_v62, %v21629_v55 }
 0x978   :  { %2762 = vrot.lane.b32.xlu1 %v2761_v61, %s21079_s18  ;;  %v16207_v1 = vmul.f32 -1.442695, %v2752_v0 }
 0x97a   :  { %20578 = vpow2.f32 %v16207_v1 }
 0x984   :  { %v20579_v2 = vpop.eup %20578 }
 0x985   :  { %v2756_v3 = vadd.f32 1.0, %v20579_v2 }
 0x987   :  { %20580 = vrcp.f32 %v2756_v3 }
 0x991   :  { %v20581_v5 = vpop.eup %20580 }
 0x992   :  { %v2772_v14 = vsub.f32 1.0, %v20581_v5  ;;  %v2780_v17 = vmul.f32 %v20581_v5, %v2778_v15 }
 0x9ea   :  { %v2763_v6 = vpop.permute.xlu1 %2762 }
 0x9eb   :  { %v2765_v9 = vmul.f32 %v20581_v5, %v2763_v6 }
 0x9ed   :  { %2767 = vrot.lane.b32.xlu0 %v2765_v9, %s21079_s18 }
 0xa5f   :  { %v2768_v10 = vpop.permute.xlu0 %2767 }
 0xa60   :  { %v2770_v11 = vadd.f32 %v21626_v54, %v2768_v10 }
 0xa62   :  { %20582 = vtanh.f32 %v2770_v11 }
 0xa6c   :  { %v20583_v12 = vpop.eup %20582 }
 0xa6d   :  { %2774 = vrot.lane.b32.xlu1 %v20583_v12, %s21080_s23 }
 0xadf   :  { %v2775_v16 = vpop.permute.xlu1 %2774 }
 0xae0   :  { %v2777_v19 = vmul.f32 %v2775_v16, %v2772_v14 }
 0xae2   :  { %v21731_v22 = vadd.f32 %v2780_v17, %v2777_v19 }
 0xae4   :  { %v2788_v23 = vrot.slane %v21731_v22, 2  ;;  %v3307_v57 = vrot.slane %v21731_v22, 7 }
 0xae6   :  { %2789 = vrot.lane.b32.xlu0 %v2788_v23, %s21080_s23 }
 0xb58   :  { %v2790_v24 = vpop.permute.xlu0 %2789 }
 0xb59   :  { %v2791_v26 = vsel %vm716_vm3, %v2790_v24, 0 }
 0xb5a   :  { %v2862_v27 = vand.u32 4294901760, %v2791_v26 }
 0xb5c   :  { %v2863_v28 = vsub.f32 %v2791_v26, %v2862_v27 }
 0xb5e   :  { %v2864_v29 = vand.u32 4294901760, %v2863_v28 }
 0xb60   :  { %v2865_v36 = vsub.f32 %v2863_v28, %v2864_v29 }
 0xb62   :  { %v2866_v37 = vand.u32 4294901760, %v2865_v36 }
 0xb64   :  { %17443 = vmatmul.mubr.f32.vlgmr.msra.gmra.mrb[6].mxu1 %v2866_v37 }
 0xb65   :  { %19272 = vmatpush3.bf16.msra.mxu1 %v21533_v25  ;;  %17453 = vmatprep.mubr.msk.f32.mxu1 %vm21077_vm0, %v23216_v7 }
 0xb66   :  { %19273 = vmatprep.subr.bf16.mxu1 %v23224_v4 }
 0xb69   :  { %19275 = vmatpush3.bf16.msra.mxu1 %v21539_v30 }
 0xb6a   :  { %19276 = vmatprep.subr.bf16.mxu1 %v23224_v4 }
 0xb6c   :  { %17454 = vmatmul.mubr.f32.vlgmr.msra.gmra.mrb[6].mxu1 %v2862_v27 }
 0xb6d   :  { %19278 = vmatpush3.bf16.msra.mxu1 %v21543_v31  ;;  %17464 = vmatprep.mubr.msk.f32.mxu1 %vm21077_vm0, %v23216_v7 }
 0xb6e   :  { %19279 = vmatprep.subr.bf16.mxu1 %v23224_v4 }
 0xb71   :  { %19281 = vmatpush3.bf16.msra.mxu1 %v21545_v32 }
 0xb72   :  { %19282 = vmatprep.subr.bf16.mxu1 %v23224_v4 }
 0xb74   :  { %17465 = vmatmul.mubr.f32.vlgmr.msra.gmra.mrb[6].mxu1 %v2863_v28 }
 0xb75   :  { %19284 = vmatpush3.bf16.msra.mxu1 %v21496_v63  ;;  %17475 = vmatprep.mubr.msk.f32.mxu1 %vm21077_vm0, %v23216_v7 }
 0xb76   :  { %19285 = vmatprep.subr.bf16.mxu1 %v23224_v4 }
 0xb79   :  { %19287 = vmatpush3.bf16.msra.mxu1 %v21510_v8 }
 0xb7a   :  { %19288 = vmatprep.subr.bf16.mxu1 %v23224_v4 }
 0xb7c   :  { %17476 = vmatmul.mubr.f32.vlgmr.msra.gmra.mrb[6].mxu1 %v2864_v29 }
 0xb7d   :  { %19290 = vmatpush3.bf16.msra.mxu1 %v21514_v13  ;;  %17486 = vmatprep.mubr.msk.f32.mxu1 %vm21077_vm0, %v23216_v7 }
 0xb7e   :  { %19291 = vmatprep.subr.bf16.mxu1 %v23224_v4 }
 0xb81   :  { %19293 = vmatpush3.bf16.msra.mxu1 %v21521_v18 }
 0xb82   :  { %19294 = vmatprep.subr.bf16.mxu1 %v23224_v4 }
 0xb84   :  { %17487 = vmatmul.mubr.f32.vlgmr.msra.gmra.mrb[6].mxu1 %v2862_v27 }
 0xb85   :  { %19296 = vmatpush3.bf16.msra.mxu1 %v21496_v63  ;;  %17497 = vmatprep.mubr.msk.f32.mxu1 %vm21077_vm0, %v23216_v7 }
 0xb86   :  { %19297 = vmatprep.subr.bf16.mxu1 %v23224_v4 }
 0xb89   :  { %19299 = vmatpush3.bf16.msra.mxu1 %v21510_v8 }
 0xb8a   :  { %19336 = vmatprep.subr.bf16.mxu1 %v23224_v4 }
 0xb8c   :  { %17498 = vmatmul.mubr.f32.vlgmr.msra.gmra.mrb[6].mxu1 %v2862_v27 }
 0xb8d   :  { %19338 = vmatpush3.bf16.msra.mxu1 %v21496_v63  ;;  %17574 = vmatprep.mubr.msk.f32.mxu1 %vm21077_vm0, %v23216_v7 }
 0xb8e   :  { %19339 = vmatprep.subr.bf16.mxu1 %v23224_v4 }
 0xb91   :  { %19341 = vmatpush3.bf16.msra.mxu1 %v21510_v8 }
 0xb92   :  { %19342 = vmatprep.subr.bf16.mxu1 %v23224_v4 }
 0xc5f   :  { %v3274_v38 = vpop.f32.mrb[6].mxu1 }
 0xc60   :  { %v3288_v39 = vadd.f32 %v3274_v38, %v21612_v48  ;;  %v17499_v40 = vpop.f32.mrb[7].mxu1  ;;  %v3279_v45 = vrot.slane %v3274_v38, 5 }
 0xc62   :  { %v3290_v41 = vrot.slane %v3288_v39, 5  ;;  %v3281_v46 = vadd.f32 %v3279_v45, %v21629_v55 }
 0xc64   :  { %3291 = vrot.lane.b32.xlu1 %v3290_v41, %s21079_s18  ;;  %v16208_v33 = vmul.f32 -1.442695, %v3281_v46 }
 0xc66   :  { %20584 = vpow2.f32 %v16208_v33 }
 0xc70   :  { %v20585_v34 = vpop.eup %20584 }
 0xc71   :  { %v3285_v35 = vadd.f32 1.0, %v20585_v34 }
 0xc73   :  { %20586 = vrcp.f32 %v3285_v35 }
 0xc7d   :  { %v20587_v42 = vpop.eup %20586 }
 0xc7e   :  { %v3301_v56 = vsub.f32 1.0, %v20587_v42  ;;  %v3309_v58 = vmul.f32 %v20587_v42, %v3307_v57 }
 0xcd6   :  { %v3292_v44 = vpop.permute.xlu1 %3291 }
 0xcd7   :  { %v3294_v47 = vmul.f32 %v20587_v42, %v3292_v44 }
 0xcd9   :  { %3296 = vrot.lane.b32.xlu0 %v3294_v47, %s21079_s18 }
 0xd4b   :  { %v3297_v49 = vpop.permute.xlu0 %3296 }
 0xd4c   :  { %v3299_v52 = vadd.f32 %v21626_v54, %v3297_v49 }
 0xd4e   :  { %20588 = vtanh.f32 %v3299_v52 }
 0xd58   :  { %v20589_v53 = vpop.eup %20588 }
 0xd59   :  { %3303 = vrot.lane.b32.xlu1 %v20589_v53, %s21080_s23 }
 0xdcb   :  { %v3304_v20 = vpop.permute.xlu1 %3303 }
 0xdcc   :  { %v3306_v59 = vmul.f32 %v3304_v20, %v3301_v56 }
 0xdce   :  { %v21779_v60 = vadd.f32 %v3309_v58, %v3306_v59 }
 0xdd0   :  { %v3317_v61 = vrot.slane %v21779_v60, 3  ;;  %v3836_v37 = vrot.slane %v21779_v60, 7 }
 0xdd2   :  { %3318 = vrot.lane.b32.xlu0 %v3317_v61, %s21080_s23 }
 0xe44   :  { %v3319_v62 = vpop.permute.xlu0 %3318 }
 0xe45   :  { %v3320_v0 = vsel %vm716_vm3, %v3319_v62, 0 }
 0xe46   :  { %v3391_v1 = vand.u32 4294901760, %v3320_v0 }
 0xe48   :  { %v3392_v2 = vsub.f32 %v3320_v0, %v3391_v1 }
 0xe4a   :  { %v3393_v3 = vand.u32 4294901760, %v3392_v2 }
 0xe4c   :  { %v3394_v5 = vsub.f32 %v3392_v2, %v3393_v3 }
 0xe4e   :  { %v3395_v6 = vand.u32 4294901760, %v3394_v5 }
 0xe50   :  { %17509 = vmatmul.mubr.f32.vlgmr.msra.gmra.mrb[6].mxu0 %v3395_v6 }
 0xe51   :  { %19308 = vmatpush3.bf16.msra.mxu0 %v21533_v25  ;;  %17519 = vmatprep.mubr.msk.f32.mxu0 %vm21077_vm0, %v23216_v7 }
 0xe52   :  { %19309 = vmatprep.subr.bf16.mxu0 %v23224_v4 }
 0xe55   :  { %19311 = vmatpush3.bf16.msra.mxu0 %v21539_v30 }
 0xe56   :  { %19312 = vmatprep.subr.bf16.mxu0 %v23224_v4 }
 0xe58   :  { %17520 = vmatmul.mubr.f32.vlgmr.msra.gmra.mrb[6].mxu0 %v3391_v1 }
 0xe59   :  { %19314 = vmatpush3.bf16.msra.mxu0 %v21543_v31  ;;  %17530 = vmatprep.mubr.msk.f32.mxu0 %vm21077_vm0, %v23216_v7 }
 0xe5a   :  { %19315 = vmatprep.subr.bf16.mxu0 %v23224_v4 }
 0xe5d   :  { %19317 = vmatpush3.bf16.msra.mxu0 %v21545_v32 }
 0xe5e   :  { %19318 = vmatprep.subr.bf16.mxu0 %v23224_v4 }
 0xe60   :  { %17531 = vmatmul.mubr.f32.vlgmr.msra.gmra.mrb[6].mxu0 %v3392_v2 }
 0xe61   :  { %19320 = vmatpush3.bf16.msra.mxu0 %v21496_v63  ;;  %17541 = vmatprep.mubr.msk.f32.mxu0 %vm21077_vm0, %v23216_v7 }
 0xe62   :  { %19321 = vmatprep.subr.bf16.mxu0 %v23224_v4 }
 0xe65   :  { %19323 = vmatpush3.bf16.msra.mxu0 %v21510_v8 }
 0xe66   :  { %19324 = vmatprep.subr.bf16.mxu0 %v23224_v4 }
 0xe68   :  { %17542 = vmatmul.mubr.f32.vlgmr.msra.gmra.mrb[6].mxu0 %v3393_v3 }
 0xe69   :  { %19326 = vmatpush3.bf16.msra.mxu0 %v21514_v13  ;;  %17552 = vmatprep.mubr.msk.f32.mxu0 %vm21077_vm0, %v23216_v7 }
 0xe6a   :  { %19327 = vmatprep.subr.bf16.mxu0 %v23224_v4 }
 0xe6d   :  { %19329 = vmatpush3.bf16.msra.mxu0 %v21521_v18 }
 0xe6e   :  { %19330 = vmatprep.subr.bf16.mxu0 %v23224_v4 }
 0xe70   :  { %17553 = vmatmul.mubr.f32.vlgmr.msra.gmra.mrb[6].mxu0 %v3391_v1 }
 0xe71   :  { %19332 = vmatpush3.bf16.msra.mxu0 %v21496_v63  ;;  %17563 = vmatprep.mubr.msk.f32.mxu0 %vm21077_vm0, %v23216_v7 }
 0xe72   :  { %19333 = vmatprep.subr.bf16.mxu0 %v23224_v4 }
 0xe75   :  { %19335 = vmatpush3.bf16.msra.mxu0 %v21510_v8 }
 0xe76   :  { %19372 = vmatprep.subr.bf16.mxu0 %v23224_v4 }
 0xe78   :  { %17564 = vmatmul.mubr.f32.vlgmr.msra.gmra.mrb[6].mxu0 %v3391_v1 }
 0xe79   :  { %19374 = vmatpush3.bf16.msra.mxu0 %v21496_v63  ;;  %17640 = vmatprep.mubr.msk.f32.mxu0 %vm21077_vm0, %v23216_v7 }
 0xe7a   :  { %19375 = vmatprep.subr.bf16.mxu0 %v23224_v4 }
 0xe7d   :  { %19377 = vmatpush3.bf16.msra.mxu0 %v21510_v8 }
 0xe7e   :  { %19378 = vmatprep.subr.bf16.mxu0 %v23224_v4 }
 0xf4b   :  { %v3803_v9 = vpop.f32.mrb[6].mxu0 }
 0xf4c   :  { %v3817_v10 = vadd.f32 %v3803_v9, %v21612_v48  ;;  %v17565_v11 = vpop.f32.mrb[7].mxu0  ;;  %v3808_v14 = vrot.slane %v3803_v9, 4 }
 0xf4e   :  { %v3819_v12 = vrot.slane %v3817_v10, 4  ;;  %v3810_v15 = vadd.f32 %v3808_v14, %v21629_v55 }
 0xf50   :  { %3820 = vrot.lane.b32.xlu1 %v3819_v12, %s21079_s18  ;;  %v16209_v16 = vmul.f32 -1.442695, %v3810_v15 }
 0xf52   :  { %20590 = vpow2.f32 %v16209_v16 }
 0xf5c   :  { %v20591_v17 = vpop.eup %20590 }
 0xf5d   :  { %v3814_v19 = vadd.f32 1.0, %v20591_v17 }
 0xf5f   :  { %20592 = vrcp.f32 %v3814_v19 }
 0xf69   :  { %v20593_v23 = vpop.eup %20592 }
 0xf6a   :  { %v3830_v36 = vsub.f32 1.0, %v20593_v23  ;;  %v3838_v39 = vmul.f32 %v20593_v23, %v3836_v37 }
 0xfc2   :  { %v3821_v24 = vpop.permute.xlu1 %3820 }
 0xfc3   :  { %v3823_v26 = vmul.f32 %v20593_v23, %v3821_v24 }
 0xfc5   :  { %3825 = vrot.lane.b32.xlu0 %v3823_v26, %s21079_s18 }
0x1037   :  { %v3826_v27 = vpop.permute.xlu0 %3825 }
0x1038   :  { %v3828_v28 = vadd.f32 %v21626_v54, %v3826_v27 }
0x103a   :  { %20594 = vtanh.f32 %v3828_v28 }
0x1044   :  { %v20595_v29 = vpop.eup %20594 }
0x1045   :  { %3832 = vrot.lane.b32.xlu1 %v20595_v29, %s21080_s23 }
0x10b7   :  { %v3833_v38 = vpop.permute.xlu1 %3832 }
0x10b8   :  { %v3835_v40 = vmul.f32 %v3833_v38, %v3830_v36 }
0x10ba   :  { %v21827_v41 = vadd.f32 %v3838_v39, %v3835_v40 }
0x10bc   :  { %v3846_v45 = vrot.slane %v21827_v41, 4  ;;  %v4365_v9 = vrot.slane %v21827_v41, 7 }
0x10be   :  { %3847 = vrot.lane.b32.xlu0 %v3846_v45, %s21080_s23 }
0x1130   :  { %v3848_v46 = vpop.permute.xlu0 %3847 }
0x1131   :  { %v3849_v33 = vsel %vm716_vm3, %v3848_v46, 0 }
0x1132   :  { %v3920_v34 = vand.u32 4294901760, %v3849_v33 }
0x1134   :  { %v3921_v35 = vsub.f32 %v3849_v33, %v3920_v34 }
0x1136   :  { %v3922_v42 = vand.u32 4294901760, %v3921_v35 }
0x1138   :  { %v3923_v44 = vsub.f32 %v3921_v35, %v3922_v42 }
0x113a   :  { %v3924_v47 = vand.u32 4294901760, %v3923_v44 }
0x113c   :  { %17575 = vmatmul.mubr.f32.vlgmr.msra.gmra.mrb[8].mxu1 %v3924_v47 }
0x113d   :  { %19344 = vmatpush3.bf16.msra.mxu1 %v21533_v25  ;;  %17585 = vmatprep.mubr.msk.f32.mxu1 %vm21077_vm0, %v23216_v7 }
0x113e   :  { %19345 = vmatprep.subr.bf16.mxu1 %v23224_v4 }
0x1141   :  { %19347 = vmatpush3.bf16.msra.mxu1 %v21539_v30 }
0x1142   :  { %19348 = vmatprep.subr.bf16.mxu1 %v23224_v4 }
0x1144   :  { %17586 = vmatmul.mubr.f32.vlgmr.msra.gmra.mrb[8].mxu1 %v3920_v34 }
0x1145   :  { %19350 = vmatpush3.bf16.msra.mxu1 %v21543_v31  ;;  %17596 = vmatprep.mubr.msk.f32.mxu1 %vm21077_vm0, %v23216_v7 }
0x1146   :  { %19351 = vmatprep.subr.bf16.mxu1 %v23224_v4 }
0x1149   :  { %19353 = vmatpush3.bf16.msra.mxu1 %v21545_v32 }
0x114a   :  { %19354 = vmatprep.subr.bf16.mxu1 %v23224_v4 }
0x114c   :  { %17597 = vmatmul.mubr.f32.vlgmr.msra.gmra.mrb[8].mxu1 %v3921_v35 }
0x114d   :  { %19356 = vmatpush3.bf16.msra.mxu1 %v21496_v63  ;;  %17607 = vmatprep.mubr.msk.f32.mxu1 %vm21077_vm0, %v23216_v7 }
0x114e   :  { %19357 = vmatprep.subr.bf16.mxu1 %v23224_v4 }
0x1151   :  { %19359 = vmatpush3.bf16.msra.mxu1 %v21510_v8 }
0x1152   :  { %19360 = vmatprep.subr.bf16.mxu1 %v23224_v4 }
0x1154   :  { %17608 = vmatmul.mubr.f32.vlgmr.msra.gmra.mrb[8].mxu1 %v3922_v42 }
0x1155   :  { %19362 = vmatpush3.bf16.msra.mxu1 %v21514_v13  ;;  %17618 = vmatprep.mubr.msk.f32.mxu1 %vm21077_vm0, %v23216_v7 }
0x1156   :  { %19363 = vmatprep.subr.bf16.mxu1 %v23224_v4 }
0x1159   :  { %19365 = vmatpush3.bf16.msra.mxu1 %v21521_v18 }
0x115a   :  { %19366 = vmatprep.subr.bf16.mxu1 %v23224_v4 }
0x115c   :  { %17619 = vmatmul.mubr.f32.vlgmr.msra.gmra.mrb[8].mxu1 %v3920_v34 }
0x115d   :  { %19368 = vmatpush3.bf16.msra.mxu1 %v21496_v63  ;;  %17629 = vmatprep.mubr.msk.f32.mxu1 %vm21077_vm0, %v23216_v7 }
0x115e   :  { %19369 = vmatprep.subr.bf16.mxu1 %v23224_v4 }
0x1161   :  { %19371 = vmatpush3.bf16.msra.mxu1 %v21510_v8 }
0x1162   :  { %19408 = vmatprep.subr.bf16.mxu1 %v23224_v4 }
0x1164   :  { %17630 = vmatmul.mubr.f32.vlgmr.msra.gmra.mrb[8].mxu1 %v3920_v34 }
0x1165   :  { %19410 = vmatpush3.bf16.msra.mxu1 %v21496_v63  ;;  %17706 = vmatprep.mubr.msk.f32.mxu1 %vm21077_vm0, %v23216_v7 }
0x1166   :  { %19411 = vmatprep.subr.bf16.mxu1 %v23224_v4 }
0x1169   :  { %19413 = vmatpush3.bf16.msra.mxu1 %v21510_v8 }
0x116a   :  { %19414 = vmatprep.subr.bf16.mxu1 %v23224_v4 }
0x1237   :  { %v4332_v49 = vpop.f32.mrb[8].mxu1 }
0x1238   :  { %v4346_v52 = vadd.f32 %v4332_v49, %v21612_v48  ;;  %v17631_v53 = vpop.f32.mrb[9].mxu1  ;;  %v4337_v57 = vrot.slane %v4332_v49, 3 }
0x123a   :  { %v4348_v56 = vrot.slane %v4346_v52, 3  ;;  %v4339_v20 = vadd.f32 %v4337_v57, %v21629_v55 }
0x123c   :  { %4349 = vrot.lane.b32.xlu1 %v4348_v56, %s21079_s18  ;;  %v16210_v58 = vmul.f32 -1.442695, %v4339_v20 }
0x123e   :  { %20596 = vpow2.f32 %v16210_v58 }
0x1248   :  { %v20597_v59 = vpop.eup %20596 }
0x1249   :  { %v4343_v61 = vadd.f32 1.0, %v20597_v59 }
0x124b   :  { %20598 = vrcp.f32 %v4343_v61 }
0x1255   :  { %v20599_v62 = vpop.eup %20598 }
0x1256   :  { %v4359_v6 = vsub.f32 1.0, %v20599_v62  ;;  %v4367_v11 = vmul.f32 %v20599_v62, %v4365_v9 }
0x12ae   :  { %v4350_v0 = vpop.permute.xlu1 %4349 }
0x12af   :  { %v4352_v1 = vmul.f32 %v20599_v62, %v4350_v0 }
0x12b1   :  { %4354 = vrot.lane.b32.xlu0 %v4352_v1, %s21079_s18 }
0x1323   :  { %v4355_v2 = vpop.permute.xlu0 %4354 }
0x1324   :  { %v4357_v3 = vadd.f32 %v21626_v54, %v4355_v2 }
0x1326   :  { %20600 = vtanh.f32 %v4357_v3 }
0x1330   :  { %v20601_v5 = vpop.eup %20600 }
0x1331   :  { %4361 = vrot.lane.b32.xlu1 %v20601_v5, %s21080_s23 }
0x13a3   :  { %v4362_v10 = vpop.permute.xlu1 %4361 }
0x13a4   :  { %v4364_v12 = vmul.f32 %v4362_v10, %v4359_v6 }
0x13a6   :  { %v21875_v14 = vadd.f32 %v4367_v11, %v4364_v12  ;;  %v5438_v11 = vld [vmem:[#allocation6] sm:$0xff]  ;;  %v5439_v12 = vld [vmem:[#allocation6 + $0x8] sm:$0xff] }
0x13a8   :  { %v4375_v15 = vrot.slane %v21875_v14, 5  ;;  %v4894_v52 = vrot.slane %v21875_v14, 7 }
0x13aa   :  { %4376 = vrot.lane.b32.xlu0 %v4375_v15, %s21080_s23  ;;  %v5946_v15 = vand.u32 4294901760, %v5438_v11 }
0x141c   :  { %v4377_v16 = vpop.permute.xlu0 %4376 }
0x141d   :  { %v4378_v17 = vsel %vm716_vm3, %v4377_v16, 0  ;;  %v5949_v16 = vand.u32 4294901760, %v5439_v12 }
0x141e   :  { %v4449_v19 = vand.u32 4294901760, %v4378_v17 }
0x1420   :  { %v4450_v23 = vsub.f32 %v4378_v17, %v4449_v19 }
0x1422   :  { %v4451_v24 = vand.u32 4294901760, %v4450_v23 }
0x1424   :  { %v4452_v26 = vsub.f32 %v4450_v23, %v4451_v24 }
0x1426   :  { %v4453_v27 = vand.u32 4294901760, %v4452_v26 }
0x1428   :  { %17641 = vmatmul.mubr.f32.vlgmr.msra.gmra.mrb[8].mxu0 %v4453_v27 }
0x1429   :  { %19380 = vmatpush3.bf16.msra.mxu0 %v21533_v25  ;;  %17651 = vmatprep.mubr.msk.f32.mxu0 %vm21077_vm0, %v23216_v7 }
0x142a   :  { %19381 = vmatprep.subr.bf16.mxu0 %v23224_v4 }
0x142d   :  { %19383 = vmatpush3.bf16.msra.mxu0 %v21539_v30 }
0x142e   :  { %19384 = vmatprep.subr.bf16.mxu0 %v23224_v4 }
0x1430   :  { %17652 = vmatmul.mubr.f32.vlgmr.msra.gmra.mrb[8].mxu0 %v4449_v19 }
0x1431   :  { %19386 = vmatpush3.bf16.msra.mxu0 %v21543_v31  ;;  %17662 = vmatprep.mubr.msk.f32.mxu0 %vm21077_vm0, %v23216_v7 }
0x1432   :  { %19387 = vmatprep.subr.bf16.mxu0 %v23224_v4 }
0x1435   :  { %19389 = vmatpush3.bf16.msra.mxu0 %v21545_v32 }
0x1436   :  { %19390 = vmatprep.subr.bf16.mxu0 %v23224_v4 }
0x1438   :  { %17663 = vmatmul.mubr.f32.vlgmr.msra.gmra.mrb[8].mxu0 %v4450_v23  ;;  %v6026_v23 = vsub.f32 %v5438_v11, %v5946_v15 }
0x1439   :  { %19392 = vmatpush3.bf16.msra.mxu0 %v21496_v63  ;;  %17673 = vmatprep.mubr.msk.f32.mxu0 %vm21077_vm0, %v23216_v7 }
0x143a   :  { %19393 = vmatprep.subr.bf16.mxu0 %v23224_v4 }
0x143d   :  { %19395 = vmatpush3.bf16.msra.mxu0 %v21510_v8 }
0x143e   :  { %19396 = vmatprep.subr.bf16.mxu0 %v23224_v4 }
0x1440   :  { %17674 = vmatmul.mubr.f32.vlgmr.msra.gmra.mrb[8].mxu0 %v4451_v24  ;;  %v5441_v24 = vld [vmem:[#allocation6 + $0x18] sm:$0xff] }
0x1441   :  { %19398 = vmatpush3.bf16.msra.mxu0 %v21514_v13  ;;  %17684 = vmatprep.mubr.msk.f32.mxu0 %vm21077_vm0, %v23216_v7  ;;  %v5955_v26 = vand.u32 4294901760, %v5441_v24 }
0x1442   :  { %19399 = vmatprep.subr.bf16.mxu0 %v23224_v4 }
0x1445   :  { %19401 = vmatpush3.bf16.msra.mxu0 %v21521_v18 }
0x1446   :  { %19402 = vmatprep.subr.bf16.mxu0 %v23224_v4 }
0x1448   :  { %17685 = vmatmul.mubr.f32.vlgmr.msra.gmra.mrb[8].mxu0 %v4449_v19 }
0x1449   :  { %19404 = vmatpush3.bf16.msra.mxu0 %v21496_v63  ;;  %17695 = vmatprep.mubr.msk.f32.mxu0 %vm21077_vm0, %v23216_v7 }
0x144a   :  { %19405 = vmatprep.subr.bf16.mxu0 %v23224_v4 }
0x144d   :  { %19407 = vmatpush3.bf16.msra.mxu0 %v21510_v8 }
0x144e   :  { %19444 = vmatprep.subr.bf16.mxu0 %v23224_v4 }
0x1450   :  { %17696 = vmatmul.mubr.f32.vlgmr.msra.gmra.mrb[8].mxu0 %v4449_v19  ;;  %v21970_v19 = vpack.c.bf16 %v5949_v16, %v5946_v15 }
0x1451   :  { %17772 = vmatprep.mubr.msk.f32.mxu0 %vm21077_vm0, %v23216_v7 }
0x1523   :  { %v4861_v28 = vpop.f32.mrb[8].mxu0 }
0x1524   :  { %v4875_v29 = vadd.f32 %v4861_v28, %v21612_v48  ;;  %v17697_v36 = vpop.f32.mrb[9].mxu0  ;;  %v4866_v38 = vrot.slane %v4861_v28, 2 }
0x1526   :  { %v4877_v37 = vrot.slane %v4875_v29, 2  ;;  %v4868_v39 = vadd.f32 %v4866_v38, %v21629_v55 }
0x1528   :  { %4878 = vrot.lane.b32.xlu1 %v4877_v37, %s21079_s18  ;;  %v16211_v40 = vmul.f32 -1.442695, %v4868_v39  ;;  %v6047_v39 = vsub.f32 %v5441_v24, %v5955_v26 }
0x152a   :  { %20602 = vpow2.f32 %v16211_v40 }
0x1534   :  { %v20603_v45 = vpop.eup %20602 }
0x1535   :  { %v4872_v46 = vadd.f32 1.0, %v20603_v45 }
0x1537   :  { %20604 = vrcp.f32 %v4872_v46 }
0x1541   :  { %v20605_v33 = vpop.eup %20604 }
0x1542   :  { %v4888_v49 = vsub.f32 1.0, %v20605_v33  ;;  %v4896_v56 = vmul.f32 %v20605_v33, %v4894_v52 }
0x159a   :  { %v4879_v34 = vpop.permute.xlu1 %4878 }
0x159b   :  { %v4881_v35 = vmul.f32 %v20605_v33, %v4879_v34  ;;  %v6048_v33 = vand.u32 4294901760, %v6047_v39 }
0x159d   :  { %4883 = vrot.lane.b32.xlu0 %v4881_v35, %s21079_s18 }
0x160f   :  { %v4884_v42 = vpop.permute.xlu0 %4883 }
0x1610   :  { %v4886_v44 = vadd.f32 %v21626_v54, %v4884_v42 }
0x1612   :  { %20606 = vtanh.f32 %v4886_v44 }
0x161c   :  { %v20607_v47 = vpop.eup %20606 }
0x161d   :  { %4890 = vrot.lane.b32.xlu1 %v20607_v47, %s21080_s23  ;;  %v6049_v47 = vsub.f32 %v6047_v39, %v6048_v33 }
0x161f   :  { %v6050_v52 = vand.u32 4294901760, %v6049_v47 }
0x168f   :  { %v4891_v53 = vpop.permute.xlu1 %4890 }
0x1690   :  { %v4893_v57 = vmul.f32 %v4891_v53, %v4888_v49 }
0x1692   :  { %v21919_v20 = vadd.f32 %v4896_v56, %v4893_v57 }
0x1694   :  { %v4904_v58 = vrot.slane %v21919_v20, 6 }
0x1696   :  { %4905 = vrot.lane.b32.xlu0 %v4904_v58, %s21080_s23  ;;  %v5434_v58 = vld [vmem:[%s23250_s17] sm:$0xff] }
0x1708   :  { %v4906_v59 = vpop.permute.xlu0 %4905 }
0x1709   :  { %v4907_v61 = vsel %vm716_vm3, %v4906_v59, 0  ;;  %v5435_v59 = vld [vmem:[%s23250_s17 + $0x8] sm:$0xff] }
0x170a   :  { %v4978_v62 = vand.u32 4294901760, %v4907_v61 }
0x170c   :  { %v4979_v0 = vsub.f32 %v4907_v61, %v4978_v62  ;;  %v5436_v61 = vld [vmem:[%s23250_s17 + $0x10] sm:$0xff] }
0x170e   :  { %v4980_v1 = vand.u32 4294901760, %v4979_v0 }
0x1710   :  { %v4981_v2 = vsub.f32 %v4979_v0, %v4980_v1 }
0x1712   :  { %v4982_v3 = vand.u32 4294901760, %v4981_v2  ;;  %v5460_v2 = vand.u32 4294901760, %v5436_v61 }
0x1714   :  { %17707 = vmatmul.mubr.f32.vlgmr.msra.gmra.mrb[10].mxu1 %v4982_v3 }
0x1715   :  { %19416 = vmatpush3.bf16.msra.mxu1 %v21533_v25  ;;  %17717 = vmatprep.mubr.msk.f32.mxu1 %vm21077_vm0, %v23216_v7 }
0x1716   :  { %19417 = vmatprep.subr.bf16.mxu1 %v23224_v4 }
0x1719   :  { %19419 = vmatpush3.bf16.msra.mxu1 %v21539_v30 }
0x171a   :  { %19420 = vmatprep.subr.bf16.mxu1 %v23224_v4 }
0x171c   :  { %17718 = vmatmul.mubr.f32.vlgmr.msra.gmra.mrb[10].mxu1 %v4978_v62 }
0x171d   :  { %19422 = vmatpush3.bf16.msra.mxu1 %v21543_v31  ;;  %17728 = vmatprep.mubr.msk.f32.mxu1 %vm21077_vm0, %v23216_v7 }
0x171e   :  { %19423 = vmatprep.subr.bf16.mxu1 %v23224_v4 }
0x1721   :  { %19425 = vmatpush3.bf16.msra.mxu1 %v21545_v32 }
0x1722   :  { %19426 = vmatprep.subr.bf16.mxu1 %v23224_v4 }
0x1724   :  { %17729 = vmatmul.mubr.f32.vlgmr.msra.gmra.mrb[10].mxu1 %v4979_v0  ;;  %v5457_v0 = vand.u32 4294901760, %v5435_v59 }
0x1725   :  { %19428 = vmatpush3.bf16.msra.mxu1 %v21496_v63  ;;  %17739 = vmatprep.mubr.msk.f32.mxu1 %vm21077_vm0, %v23216_v7 }
0x1726   :  { %19429 = vmatprep.subr.bf16.mxu1 %v23224_v4 }
0x1729   :  { %19431 = vmatpush3.bf16.msra.mxu1 %v21510_v8 }
0x172a   :  { %19432 = vmatprep.subr.bf16.mxu1 %v23224_v4 }
0x172c   :  { %17740 = vmatmul.mubr.f32.vlgmr.msra.gmra.mrb[10].mxu1 %v4980_v1  ;;  %v5437_v1 = vld [vmem:[%s23250_s17 + $0x18] sm:$0xff] }
0x172d   :  { %19434 = vmatpush3.bf16.msra.mxu1 %v21514_v13  ;;  %17750 = vmatprep.mubr.msk.f32.mxu1 %vm21077_vm0, %v23216_v7  ;;  %v5463_v3 = vand.u32 4294901760, %v5437_v1 }
0x172e   :  { %19435 = vmatprep.subr.bf16.mxu1 %v23224_v4 }
0x1731   :  { %19437 = vmatpush3.bf16.msra.mxu1 %v21521_v18 }
0x1732   :  { %19438 = vmatprep.subr.bf16.mxu1 %v23224_v4 }
0x1734   :  { %17751 = vmatmul.mubr.f32.vlgmr.msra.gmra.mrb[10].mxu1 %v4978_v62 }
0x1735   :  { %19440 = vmatpush3.bf16.msra.mxu1 %v21496_v63  ;;  %17761 = vmatprep.mubr.msk.f32.mxu1 %vm21077_vm0, %v23216_v7 }
0x1736   :  { %19441 = vmatprep.subr.bf16.mxu1 %v23224_v4 }
0x1739   :  { %19443 = vmatpush3.bf16.msra.mxu1 %v21510_v8 }
0x173a   :  { %19480 = vmatprep.subr.bf16.mxu1 %v23224_v4 }
0x173c   :  { %17762 = vmatmul.mubr.f32.vlgmr.msra.gmra.mrb[10].mxu1 %v4978_v62  ;;  %v5454_v62 = vand.u32 4294901760, %v5434_v58 }
0x173d   :  { %17838 = vmatprep.mubr.msk.f32.mxu1 %vm21077_vm0, %v23216_v7  ;;  %19482 = vmatpush3.bf16.msra.mxu1 %v21970_v19 }
0x173e   :  { %19483 = vmatprep.subr.bf16.mxu1 %v23224_v4 }
0x180f   :  { %v5390_v13 = vpop.f32.mrb[10].mxu1 }
0x1810   :  { %v5404_v18 = vadd.f32 %v5390_v13, %v21612_v48  ;;  %v17763_v25 = vpop.f32.mrb[11].mxu1  ;;  %v5395_v63 = vrot.slane %v5390_v13, 1  ;;  %v22051_v13 = vpack.c.bf16 %v5457_v0, %v5454_v62 }
0x1811   :  { %v22055_v25 = vsub.f32 %v5435_v59, %v5457_v0 }
0x1812   :  { %v5406_v30 = vrot.slane %v5404_v18, 1  ;;  %v5397_v31 = vadd.f32 %v5395_v63, %v21629_v55  ;;  %v22053_v18 = vsub.f32 %v5434_v58, %v5454_v62  ;;  %v22059_v63 = vsub.f32 %v5437_v1, %v5463_v3  ;;  %19446 = vmatpush3.bf16.msra.mxu0 %v22051_v13 }
0x1813   :  { %19447 = vmatprep.subr.bf16.mxu0 %v23224_v4 }
0x1814   :  { %5407 = vrot.lane.b32.xlu1 %v5406_v30, %s21079_s18  ;;  %v16212_v32 = vmul.f32 -1.442695, %v5397_v31  ;;  %v22057_v30 = vsub.f32 %v5436_v61, %v5460_v2  ;;  %v22062_v31 = vpack.c.bf16 %v5463_v3, %v5460_v2  ;;  %v5535_v11 = vand.u32 4294901760, %v22053_v18  ;;  %v16213_v61 = vld [vmem:[%s23194_s8] ss:$0 sm:$0xff] }
0x1816   :  { %20608 = vpow2.f32 %v16212_v32  ;;  %19449 = vmatpush3.bf16.msra.mxu0 %v22062_v31 }
0x1817   :  { %19450 = vmatprep.subr.bf16.mxu0 %v23224_v4 }
0x1820   :  { %v20609_v5 = vpop.eup %20608 }
0x1821   :  { %v5401_v8 = vadd.f32 1.0, %v20609_v5  ;;  %v5423_v5 = vrot.slane %v21919_v20, 7 }
0x1823   :  { %20610 = vrcp.f32 %v5401_v8 }
0x182d   :  { %v21959_v6 = vpop.eup %20610 }
0x182e   :  { %v5417_v32 = vsub.f32 1.0, %v21959_v6 }
0x1886   :  { %v5408_v9 = vpop.permute.xlu1 %5407 }
0x1887   :  { %v5410_v10 = vmul.f32 %v21959_v6, %v5408_v9  ;;  %v5425_v9 = vmul.f32 %v21959_v6, %v5423_v5 }
0x1889   :  { %5412 = vrot.lane.b32.xlu0 %v5410_v10, %s21079_s18 }
0x188d   :  { %2254 = vrot.lane.b32.xlu0 %v21683_v43, %s21080_s23  ;;  %v6033_v43 = vsub.f32 %v5439_v12, %v5949_v16  ;;  %v5542_v12 = vand.u32 4294901760, %v22055_v25 }
0x188f   :  { %v6034_v27 = vand.u32 4294901760, %v6033_v43  ;;  %v21991_v56 = vpack.c.bf16 %v6033_v43, %v6026_v23  ;;  %v5543_v6 = vsub.f32 %v22055_v25, %v5542_v12 }
0x1891   :  { %3312 = vrot.lane.b32.xlu0 %v21779_v60, %s21080_s23  ;;  %v5440_v60 = vld [vmem:[#allocation6 + $0x10] sm:$0xff]  ;;  %v6035_v37 = vsub.f32 %v6033_v43, %v6034_v27  ;;  %v5556_v43 = vand.u32 4294901760, %v22059_v63 }
0x1893   :  { %v6036_v45 = vand.u32 4294901760, %v6035_v37  ;;  %v19460_v37 = vpack.c.bf16 %v22059_v63, %v22057_v30 }
0x1895   :  { %4370 = vrot.lane.b32.xlu0 %v21875_v14, %s21080_s23  ;;  %v5952_v14 = vand.u32 4294901760, %v5440_v60 }
0x1897   :  { %v21974_v29 = vpack.c.bf16 %v5955_v26, %v5952_v14  ;;  %v6040_v38 = vsub.f32 %v5440_v60, %v5952_v14  ;;  %v5557_v14 = vsub.f32 %v22059_v63, %v5556_v43 }
0x1899   :  { %19485 = vmatpush3.bf16.msra.mxu1 %v21974_v29  ;;  %v6041_v46 = vand.u32 4294901760, %v6040_v38  ;;  %v21998_v57 = vpack.c.bf16 %v6047_v39, %v6040_v38 }
0x189a   :  { %19486 = vmatprep.subr.bf16.mxu1 %v23224_v4 }
0x189b   :  { %v6042_v42 = vsub.f32 %v6040_v38, %v6041_v46  ;;  %v19469_v38 = vpack.c.bf16 %v5542_v12, %v5535_v11 }
0x189c   :  { %17839 = vmatmul.mubr.f32.vlgmr.msra.gmra.mrb[12].mxu1 %v23216_v7 }
0x189d   :  { %v6043_v49 = vand.u32 4294901760, %v6042_v42  ;;  %17849 = vmatprep.mubr.msk.f32.mxu1 %vm21077_vm0, %v23216_v7 }
0x189f   :  { %v21986_v53 = vpack.c.bf16 %v6050_v52, %v6043_v49 }
0x18fb   :  { %v5413_v48 = vpop.permute.xlu0 %5412 }
0x18fc   :  { %v5415_v55 = vadd.f32 %v21626_v54, %v5413_v48  ;;  %v6027_v54 = vand.u32 4294901760, %v6026_v23 }
0x18fe   :  { %20612 = vtanh.f32 %v5415_v55  ;;  %v6028_v36 = vsub.f32 %v6026_v23, %v6027_v54  ;;  %v5549_v23 = vand.u32 4294901760, %v22057_v30 }
0x18ff   :  { %v2255_v17 = vpop.permute.xlu0 %2254 }
0x1900   :  { %2258 = vst.msk [vmem:[#allocation2] sm:$0x2] %vm2257_vm5, %v2255_v17  ;;  %v6029_v40 = vand.u32 4294901760, %v6028_v36  ;;  %v5544_v17 = vand.u32 4294901760, %v5543_v6  ;;  %v5550_v24 = vsub.f32 %v22057_v30, %v5549_v23  ;;  %v19457_v36 = vpack.c.bf16 %v22055_v25, %v22053_v18 }
0x1901   :  { %v19472_v39 = vpack.c.bf16 %v5556_v43, %v5549_v23 }
0x1902   :  { %v21978_v35 = vpack.c.bf16 %v6036_v45, %v6029_v40 }
0x1903   :  { %v3313_v28 = vpop.permute.xlu0 %3312 }
0x1904   :  { %3316 = vst.msk [vmem:[#allocation2] sm:$0x8] %vm3315_vm6, %v3313_v28  ;;  %19488 = vmatpush3.bf16.msra.mxu1 %v21978_v35 }
0x1905   :  { %19489 = vmatprep.subr.bf16.mxu1 %v23224_v4 }
0x1907   :  { %v4371_v34 = vpop.permute.xlu0 %4370 }
0x1908   :  { %v20613_v44 = vpop.eup %20612  ;;  %4374 = vst.msk [vmem:[#allocation2] sm:$0x20] %vm4373_vm7, %v4371_v34  ;;  %19491 = vmatpush3.bf16.msra.mxu1 %v21986_v53 }
0x1909   :  { %5419 = vrot.lane.b32.xlu1 %v20613_v44, %s21080_s23  ;;  %19492 = vmatprep.subr.bf16.mxu1 %v23224_v4  ;;  %v22092_v44 = vld [vmem:[%s23195_s9] sm:$0x1] }
0x190a   :  { %v5942_v62 = vrot.slane %v22092_v44, %v1208_v51 }
0x190b   :  { %17850 = vmatmul.mubr.f32.vlgmr.msra.gmra.mrb[12].mxu1 %v23216_v7 }
0x190c   :  { %19494 = vmatpush3.bf16.msra.mxu1 %v21991_v56  ;;  %17860 = vmatprep.mubr.msk.f32.mxu1 %vm21077_vm0, %v23216_v7 }
0x190d   :  { %2783 = vrot.lane.b32.xlu1 %v21731_v22, %s21080_s23  ;;  %19495 = vmatprep.subr.bf16.mxu1 %v23224_v4  ;;  %v22013_v22 = vpack.c.bf16 %v6034_v27, %v6027_v54  ;;  %v5551_v54 = vand.u32 4294901760, %v5550_v24  ;;  %v5558_v27 = vand.u32 4294901760, %v5557_v14 }
0x190f   :  { %v19454_v28 = vpack.c.bf16 %v5558_v27, %v5551_v54 }
0x1910   :  { %19497 = vmatpush3.bf16.msra.mxu1 %v21998_v57 }
0x1911   :  { %3841 = vrot.lane.b32.xlu1 %v21827_v41, %s21080_s23  ;;  %19498 = vmatprep.subr.bf16.mxu1 %v23224_v4  ;;  %v22018_v41 = vpack.c.bf16 %v6048_v33, %v6041_v46 }
0x1913   :  { %17861 = vmatmul.mubr.f32.vlgmr.msra.gmra.mrb[12].mxu1 %v23216_v7 }
0x1914   :  { %19500 = vmatpush3.bf16.msra.mxu1 %v21970_v19  ;;  %17871 = vmatprep.mubr.msk.f32.mxu1 %vm21077_vm0, %v23216_v7 }
0x1915   :  { %4899 = vrot.lane.b32.xlu1 %v21919_v20, %s21080_s23  ;;  %19501 = vmatprep.subr.bf16.mxu1 %v23224_v4  ;;  %v5536_v20 = vsub.f32 %v22053_v18, %v5535_v11 }
0x1917   :  { %v5537_v16 = vand.u32 4294901760, %v5536_v20 }
0x1918   :  { %19503 = vmatpush3.bf16.msra.mxu1 %v21974_v29 }
0x1919   :  { %19504 = vmatprep.subr.bf16.mxu1 %v23224_v4  ;;  %v19451_v60 = vpack.c.bf16 %v5544_v17, %v5537_v16 }
0x191b   :  { %17872 = vmatmul.mubr.f32.vlgmr.msra.gmra.mrb[12].mxu1 %v23216_v7 }
0x191c   :  { %19506 = vmatpush3.bf16.msra.mxu1 %v22013_v22  ;;  %17882 = vmatprep.mubr.msk.f32.mxu1 %vm21077_vm0, %v23216_v7 }
0x191d   :  { %19507 = vmatprep.subr.bf16.mxu1 %v23224_v4 }
0x1920   :  { %19509 = vmatpush3.bf16.msra.mxu1 %v22018_v41 }
0x1921   :  { %19510 = vmatprep.subr.bf16.mxu1 %v23224_v4 }
0x1923   :  { %17883 = vmatmul.mubr.f32.vlgmr.msra.gmra.mrb[12].mxu1 %v23216_v7 }
0x1924   :  { %19512 = vmatpush3.bf16.msra.mxu1 %v21970_v19  ;;  %17893 = vmatprep.mubr.msk.f32.mxu1 %vm21077_vm0, %v23216_v7 }
0x1925   :  { %19513 = vmatprep.subr.bf16.mxu1 %v23224_v4 }
0x1928   :  { %19515 = vmatpush3.bf16.msra.mxu1 %v21974_v29 }
0x1929   :  { %19552 = vmatprep.subr.bf16.mxu1 %v23224_v4 }
0x192b   :  { %17894 = vmatmul.mubr.f32.vlgmr.msra.gmra.mrb[12].mxu1 %v23216_v7 }
0x192c   :  { %19554 = vmatpush3.bf16.msra.mxu1 %v21970_v19  ;;  %17970 = vmatprep.mubr.msk.f32.mxu1 %vm21077_vm0, %v23216_v7 }
0x192d   :  { %19555 = vmatprep.subr.bf16.mxu1 %v23224_v4 }
0x1930   :  { %19557 = vmatpush3.bf16.msra.mxu1 %v21974_v29 }
0x1931   :  { %19558 = vmatprep.subr.bf16.mxu1 %v23224_v4 }
0x197b   :  { %v5420_v8 = vpop.permute.xlu1 %5419 }
0x197c   :  { %v5422_v10 = vmul.f32 %v5420_v8, %v5417_v32 }
0x197e   :  { %v22070_v48 = vadd.f32 %v5425_v9, %v5422_v10 }
0x197f   :  { %v2784_v55 = vpop.permute.xlu1 %2783 }
0x1980   :  { %2787 = vst.msk [vmem:[#allocation2] sm:$0x4] %vm2786_vm8, %v2784_v55  ;;  %5428 = vrot.lane.b32.xlu0 %v22070_v48, %s21080_s23 }
0x1983   :  { %v3842_v15 = vpop.permute.xlu1 %3841 }
0x1984   :  { %3845 = vst.msk [vmem:[#allocation2] sm:$0x10] %vm3844_vm9, %v3842_v15 }
0x1987   :  { %v4900_v26 = vpop.permute.xlu1 %4899 }
0x1988   :  { %4903 = vst.msk [vmem:[#allocation2] sm:$0x40] %vm4902_vm10, %v4900_v26 }
0x19f2   :  { %v5429_v40 = vpop.permute.xlu0 %5428 }
0x19f3   :  { %5432 = vst.msk [vmem:[#allocation2] sm:$0x80] %vm5431_vm11, %v5429_v40  ;;  %10124 = vst.msk [vmem:[#allocation24 - $0x7] sm:$0x80] %vm5431_vm11, %v5429_v40 }
0x19fa   :  { %v5433_v45 = vld [vmem:[#allocation2] sm:$0xff] }
0x19fb   :  { %v5451_v46 = vsel %vm716_vm3, %v5433_v45, 0 }
0x19fc   :  { %v5522_v33 = vand.u32 4294901760, %v5451_v46 }
0x19fe   :  { %v5523_v34 = vsub.f32 %v5451_v46, %v5522_v33  ;;  %v6426_v52 = vpop.f32.mrb[12].mxu1 }
0x19ff   :  { %v6437_v58 = vadd.f32 %v6426_v52, %v22092_v44  ;;  %v17895_v59 = vpop.f32.mrb[13].mxu1 }
0x1a00   :  { %v5524_v42 = vand.u32 4294901760, %v5523_v34 }
0x1a01   :  { %6439 = vrot.lane.b32.xlu1 %v6437_v58, %s21079_s18 }
0x1a02   :  { %v5525_v47 = vsub.f32 %v5523_v34, %v5524_v42 }
0x1a04   :  { %v5526_v49 = vand.u32 4294901760, %v5525_v47 }
0x1a06   :  { %17773 = vmatmul.mubr.f32.vlgmr.msra.gmra.mrb[10].mxu0 %v5526_v49 }
0x1a07   :  { %19452 = vmatpush3.bf16.msra.mxu0 %v19451_v60  ;;  %17783 = vmatprep.mubr.msk.f32.mxu0 %vm21077_vm0, %v23216_v7 }
0x1a08   :  { %19453 = vmatprep.subr.bf16.mxu0 %v23224_v4 }
0x1a0b   :  { %19455 = vmatpush3.bf16.msra.mxu0 %v19454_v28 }
0x1a0c   :  { %19456 = vmatprep.subr.bf16.mxu0 %v23224_v4 }
0x1a0e   :  { %17784 = vmatmul.mubr.f32.vlgmr.msra.gmra.mrb[10].mxu0 %v5522_v33 }
0x1a0f   :  { %19458 = vmatpush3.bf16.msra.mxu0 %v19457_v36  ;;  %17794 = vmatprep.mubr.msk.f32.mxu0 %vm21077_vm0, %v23216_v7 }
0x1a10   :  { %19459 = vmatprep.subr.bf16.mxu0 %v23224_v4 }
0x1a13   :  { %19461 = vmatpush3.bf16.msra.mxu0 %v19460_v37 }
0x1a14   :  { %19462 = vmatprep.subr.bf16.mxu0 %v23224_v4 }
0x1a16   :  { %17795 = vmatmul.mubr.f32.vlgmr.msra.gmra.mrb[10].mxu0 %v5523_v34 }
0x1a17   :  { %19464 = vmatpush3.bf16.msra.mxu0 %v22051_v13  ;;  %17805 = vmatprep.mubr.msk.f32.mxu0 %vm21077_vm0, %v23216_v7 }
0x1a18   :  { %19465 = vmatprep.subr.bf16.mxu0 %v23224_v4 }
0x1a1b   :  { %19467 = vmatpush3.bf16.msra.mxu0 %v22062_v31 }
0x1a1c   :  { %19468 = vmatprep.subr.bf16.mxu0 %v23224_v4 }
0x1a1e   :  { %17806 = vmatmul.mubr.f32.vlgmr.msra.gmra.mrb[10].mxu0 %v5524_v42 }
0x1a1f   :  { %19470 = vmatpush3.bf16.msra.mxu0 %v19469_v38  ;;  %17816 = vmatprep.mubr.msk.f32.mxu0 %vm21077_vm0, %v23216_v7 }
0x1a20   :  { %19471 = vmatprep.subr.bf16.mxu0 %v23224_v4 }
0x1a23   :  { %19473 = vmatpush3.bf16.msra.mxu0 %v19472_v39 }
0x1a24   :  { %19474 = vmatprep.subr.bf16.mxu0 %v23224_v4 }
0x1a26   :  { %17817 = vmatmul.mubr.f32.vlgmr.msra.gmra.mrb[10].mxu0 %v5522_v33 }
0x1a27   :  { %19476 = vmatpush3.bf16.msra.mxu0 %v22051_v13  ;;  %17827 = vmatprep.mubr.msk.f32.mxu0 %vm21077_vm0, %v23216_v7 }
0x1a28   :  { %19477 = vmatprep.subr.bf16.mxu0 %v23224_v4 }
0x1a2b   :  { %19479 = vmatpush3.bf16.msra.mxu0 %v22062_v31 }
0x1a2c   :  { %19516 = vmatprep.subr.bf16.mxu0 %v23224_v4 }
0x1a2e   :  { %17828 = vmatmul.mubr.f32.vlgmr.msra.gmra.mrb[10].mxu0 %v5522_v33 }
0x1a2f   :  { %19518 = vmatpush3.bf16.msra.mxu0 %v21970_v19  ;;  %17904 = vmatprep.mubr.msk.f32.mxu0 %vm21077_vm0, %v23216_v7 }
0x1a30   :  { %19519 = vmatprep.subr.bf16.mxu0 %v23224_v4 }
0x1a33   :  { %19521 = vmatpush3.bf16.msra.mxu0 %v21974_v29 }
0x1a34   :  { %19522 = vmatprep.subr.bf16.mxu0 %v23224_v4 }
0x1a73   :  { %v6440_v31 = vpop.permute.xlu1 %6439 }
0x1b01   :  { %v5934_v0 = vpop.f32.mrb[10].mxu0 }
0x1b02   :  { %v22132_v1 = vadd.f32 %v16213_v61, %v5934_v0  ;;  %v17829_v2 = vpop.f32.mrb[11].mxu0 }
0x1b04   :  { %v22135_v3 = vadd.f32 %v22132_v1, %v5942_v62 }
0x1b06   :  { %v6430_v13 = vadd.f32 %v6426_v52, %v22135_v3 }
0x1b08   :  { %v16214_v18 = vmul.f32 -1.442695, %v6430_v13 }
0x1b0a   :  { %20614 = vpow2.f32 %v16214_v18 }
0x1b14   :  { %v20615_v25 = vpop.eup %20614 }
0x1b15   :  { %v6434_v30 = vadd.f32 1.0, %v20615_v25 }
0x1b17   :  { %20616 = vrcp.f32 %v6434_v30 }
0x1b21   :  { %v20617_v63 = vpop.eup %20616 }
0x1b22   :  { %v6442_v32 = vmul.f32 %v20617_v63, %v6440_v31  ;;  %v6449_v8 = vsub.f32 1.0, %v20617_v63  ;;  %v6455_v10 = vmul.f32 0.0, %v20617_v63 }
0x1b24   :  { %6444 = vrot.lane.b32.xlu0 %v6442_v32, %s21079_s18 }
0x1b96   :  { %v6445_v50 = vpop.permute.xlu0 %6444 }
0x1b97   :  { %v6447_v51 = vadd.f32 %v22132_v1, %v6445_v50 }
0x1b99   :  { %20618 = vtanh.f32 %v6447_v51 }
0x1ba3   :  { %v20619_v5 = vpop.eup %20618 }
0x1ba4   :  { %6451 = vrot.lane.b32.xlu1 %v20619_v5, %s21080_s23 }
0x1c16   :  { %v6452_v9 = vpop.permute.xlu1 %6451 }
0x1c17   :  { %v6454_v55 = vmul.f32 %v6452_v9, %v6449_v8 }
0x1c19   :  { %v22141_v11 = vadd.f32 %v6455_v10, %v6454_v55 }
0x1c1b   :  { %6458 = vrot.lane.b32.xlu0 %v22141_v11, %s21080_s23  ;;  %v6976_v33 = vrot.slane %v22141_v11, 7 }
0x1c8d   :  { %v6459_v12 = vpop.permute.xlu0 %6458 }
0x1c8e   :  { %v6460_v20 = vsel %vm716_vm3, %v6459_v12, 0 }
0x1c8f   :  { %v6531_v6 = vand.u32 4294901760, %v6460_v20 }
0x1c91   :  { %v6532_v15 = vsub.f32 %v6460_v20, %v6531_v6 }
0x1c93   :  { %v6533_v16 = vand.u32 4294901760, %v6532_v15 }
0x1c95   :  { %v6534_v17 = vsub.f32 %v6532_v15, %v6533_v16 }
0x1c97   :  { %v6535_v23 = vand.u32 4294901760, %v6534_v17 }
0x1c99   :  { %17905 = vmatmul.mubr.f32.vlgmr.msra.gmra.mrb[12].mxu0 %v6535_v23 }
0x1c9a   :  { %19524 = vmatpush3.bf16.msra.mxu0 %v21978_v35  ;;  %17915 = vmatprep.mubr.msk.f32.mxu0 %vm21077_vm0, %v23216_v7 }
0x1c9b   :  { %19525 = vmatprep.subr.bf16.mxu0 %v23224_v4 }
0x1c9e   :  { %19527 = vmatpush3.bf16.msra.mxu0 %v21986_v53 }
0x1c9f   :  { %19528 = vmatprep.subr.bf16.mxu0 %v23224_v4 }
0x1ca1   :  { %17916 = vmatmul.mubr.f32.vlgmr.msra.gmra.mrb[12].mxu0 %v6531_v6 }
0x1ca2   :  { %19530 = vmatpush3.bf16.msra.mxu0 %v21991_v56  ;;  %17926 = vmatprep.mubr.msk.f32.mxu0 %vm21077_vm0, %v23216_v7 }
0x1ca3   :  { %19531 = vmatprep.subr.bf16.mxu0 %v23224_v4 }
0x1ca6   :  { %19533 = vmatpush3.bf16.msra.mxu0 %v21998_v57 }
0x1ca7   :  { %19534 = vmatprep.subr.bf16.mxu0 %v23224_v4 }
0x1ca9   :  { %17927 = vmatmul.mubr.f32.vlgmr.msra.gmra.mrb[12].mxu0 %v6532_v15 }
0x1caa   :  { %19536 = vmatpush3.bf16.msra.mxu0 %v21970_v19  ;;  %17937 = vmatprep.mubr.msk.f32.mxu0 %vm21077_vm0, %v23216_v7 }
0x1cab   :  { %19537 = vmatprep.subr.bf16.mxu0 %v23224_v4 }
0x1cae   :  { %19539 = vmatpush3.bf16.msra.mxu0 %v21974_v29 }
0x1caf   :  { %19540 = vmatprep.subr.bf16.mxu0 %v23224_v4 }
0x1cb1   :  { %17938 = vmatmul.mubr.f32.vlgmr.msra.gmra.mrb[12].mxu0 %v6533_v16 }
0x1cb2   :  { %19542 = vmatpush3.bf16.msra.mxu0 %v22013_v22  ;;  %17948 = vmatprep.mubr.msk.f32.mxu0 %vm21077_vm0, %v23216_v7 }
0x1cb3   :  { %19543 = vmatprep.subr.bf16.mxu0 %v23224_v4 }
0x1cb6   :  { %19545 = vmatpush3.bf16.msra.mxu0 %v22018_v41 }
0x1cb7   :  { %19546 = vmatprep.subr.bf16.mxu0 %v23224_v4 }
0x1cb9   :  { %17949 = vmatmul.mubr.f32.vlgmr.msra.gmra.mrb[12].mxu0 %v6531_v6 }
0x1cba   :  { %19548 = vmatpush3.bf16.msra.mxu0 %v21970_v19  ;;  %17959 = vmatprep.mubr.msk.f32.mxu0 %vm21077_vm0, %v23216_v7 }
0x1cbb   :  { %19549 = vmatprep.subr.bf16.mxu0 %v23224_v4 }
0x1cbe   :  { %19551 = vmatpush3.bf16.msra.mxu0 %v21974_v29 }
0x1cbf   :  { %19588 = vmatprep.subr.bf16.mxu0 %v23224_v4 }
0x1cc1   :  { %17960 = vmatmul.mubr.f32.vlgmr.msra.gmra.mrb[12].mxu0 %v6531_v6 }
0x1cc2   :  { %19590 = vmatpush3.bf16.msra.mxu0 %v21970_v19  ;;  %18036 = vmatprep.mubr.msk.f32.mxu0 %vm21077_vm0, %v23216_v7 }
0x1cc3   :  { %19591 = vmatprep.subr.bf16.mxu0 %v23224_v4 }
0x1cc6   :  { %19593 = vmatpush3.bf16.msra.mxu0 %v21974_v29 }
0x1cc7   :  { %19594 = vmatprep.subr.bf16.mxu0 %v23224_v4 }
0x1d94   :  { %v6943_v43 = vpop.f32.mrb[12].mxu0 }
0x1d95   :  { %v6957_v60 = vadd.f32 %v6943_v43, %v22092_v44  ;;  %v17961_v24 = vpop.f32.mrb[13].mxu0  ;;  %v6948_v26 = vrot.slane %v6943_v43, 7 }
0x1d97   :  { %v6959_v14 = vrot.slane %v6957_v60, 7  ;;  %v6950_v54 = vadd.f32 %v6948_v26, %v22135_v3 }
0x1d99   :  { %6960 = vrot.lane.b32.xlu1 %v6959_v14, %s21079_s18  ;;  %v16215_v27 = vmul.f32 -1.442695, %v6950_v54 }
0x1d9b   :  { %20620 = vpow2.f32 %v16215_v27 }
0x1da5   :  { %v20621_v28 = vpop.eup %20620 }
0x1da6   :  { %v6954_v36 = vadd.f32 1.0, %v20621_v28 }
0x1da8   :  { %20622 = vrcp.f32 %v6954_v36 }
0x1db2   :  { %v20623_v37 = vpop.eup %20622 }
0x1db3   :  { %v6970_v34 = vsub.f32 1.0, %v20623_v37  ;;  %v6978_v47 = vmul.f32 %v20623_v37, %v6976_v33 }
0x1e0b   :  { %v6961_v38 = vpop.permute.xlu1 %6960 }
0x1e0c   :  { %v6963_v39 = vmul.f32 %v20623_v37, %v6961_v38 }
0x1e0e   :  { %6965 = vrot.lane.b32.xlu0 %v6963_v39, %s21079_s18 }
0x1e80   :  { %v6966_v40 = vpop.permute.xlu0 %6965 }
0x1e81   :  { %v6968_v45 = vadd.f32 %v22132_v1, %v6966_v40 }
0x1e83   :  { %20624 = vtanh.f32 %v6968_v45 }
0x1e8d   :  { %v20625_v46 = vpop.eup %20624 }
0x1e8e   :  { %6972 = vrot.lane.b32.xlu1 %v20625_v46, %s21080_s23 }
0x1f00   :  { %v6973_v42 = vpop.permute.xlu1 %6972 }
0x1f01   :  { %v6975_v49 = vmul.f32 %v6973_v42, %v6970_v34 }
0x1f03   :  { %v22189_v52 = vadd.f32 %v6978_v47, %v6975_v49 }
0x1f05   :  { %v6981_v58 = vrot.slane %v22189_v52, 1  ;;  %v7500_v6 = vrot.slane %v22189_v52, 7 }
0x1f07   :  { %6982 = vrot.lane.b32.xlu0 %v6981_v58, %s21080_s23 }
0x1f79   :  { %v6983_v59 = vpop.permute.xlu0 %6982 }
0x1f7a   :  { %v6984_v61 = vsel %vm716_vm3, %v6983_v59, 0 }
0x1f7b   :  { %v7055_v62 = vand.u32 4294901760, %v6984_v61 }
0x1f7d   :  { %v7056_v0 = vsub.f32 %v6984_v61, %v7055_v62 }
0x1f7f   :  { %v7057_v2 = vand.u32 4294901760, %v7056_v0 }
0x1f81   :  { %v7058_v13 = vsub.f32 %v7056_v0, %v7057_v2 }
0x1f83   :  { %v7059_v18 = vand.u32 4294901760, %v7058_v13 }
0x1f85   :  { %17971 = vmatmul.mubr.f32.vlgmr.msra.gmra.mrb[14].mxu1 %v7059_v18 }
0x1f86   :  { %19560 = vmatpush3.bf16.msra.mxu1 %v21978_v35  ;;  %17981 = vmatprep.mubr.msk.f32.mxu1 %vm21077_vm0, %v23216_v7 }
0x1f87   :  { %19561 = vmatprep.subr.bf16.mxu1 %v23224_v4 }
0x1f8a   :  { %19563 = vmatpush3.bf16.msra.mxu1 %v21986_v53 }
0x1f8b   :  { %19564 = vmatprep.subr.bf16.mxu1 %v23224_v4 }
0x1f8d   :  { %17982 = vmatmul.mubr.f32.vlgmr.msra.gmra.mrb[14].mxu1 %v7055_v62 }
0x1f8e   :  { %19566 = vmatpush3.bf16.msra.mxu1 %v21991_v56  ;;  %17992 = vmatprep.mubr.msk.f32.mxu1 %vm21077_vm0, %v23216_v7 }
0x1f8f   :  { %19567 = vmatprep.subr.bf16.mxu1 %v23224_v4 }
0x1f92   :  { %19569 = vmatpush3.bf16.msra.mxu1 %v21998_v57 }
0x1f93   :  { %19570 = vmatprep.subr.bf16.mxu1 %v23224_v4 }
0x1f95   :  { %17993 = vmatmul.mubr.f32.vlgmr.msra.gmra.mrb[14].mxu1 %v7056_v0 }
0x1f96   :  { %19572 = vmatpush3.bf16.msra.mxu1 %v21970_v19  ;;  %18003 = vmatprep.mubr.msk.f32.mxu1 %vm21077_vm0, %v23216_v7 }
0x1f97   :  { %19573 = vmatprep.subr.bf16.mxu1 %v23224_v4 }
0x1f9a   :  { %19575 = vmatpush3.bf16.msra.mxu1 %v21974_v29 }
0x1f9b   :  { %19576 = vmatprep.subr.bf16.mxu1 %v23224_v4 }
0x1f9d   :  { %18004 = vmatmul.mubr.f32.vlgmr.msra.gmra.mrb[14].mxu1 %v7057_v2 }
0x1f9e   :  { %19578 = vmatpush3.bf16.msra.mxu1 %v22013_v22  ;;  %18014 = vmatprep.mubr.msk.f32.mxu1 %vm21077_vm0, %v23216_v7 }
0x1f9f   :  { %19579 = vmatprep.subr.bf16.mxu1 %v23224_v4 }
0x1fa2   :  { %19581 = vmatpush3.bf16.msra.mxu1 %v22018_v41 }
0x1fa3   :  { %19582 = vmatprep.subr.bf16.mxu1 %v23224_v4 }
0x1fa5   :  { %18015 = vmatmul.mubr.f32.vlgmr.msra.gmra.mrb[14].mxu1 %v7055_v62 }
0x1fa6   :  { %19584 = vmatpush3.bf16.msra.mxu1 %v21970_v19  ;;  %18025 = vmatprep.mubr.msk.f32.mxu1 %vm21077_vm0, %v23216_v7 }
0x1fa7   :  { %19585 = vmatprep.subr.bf16.mxu1 %v23224_v4 }
0x1faa   :  { %19587 = vmatpush3.bf16.msra.mxu1 %v21974_v29 }
0x1fab   :  { %19624 = vmatprep.subr.bf16.mxu1 %v23224_v4 }
0x1fad   :  { %18026 = vmatmul.mubr.f32.vlgmr.msra.gmra.mrb[14].mxu1 %v7055_v62 }
0x1fae   :  { %19626 = vmatpush3.bf16.msra.mxu1 %v21970_v19  ;;  %18102 = vmatprep.mubr.msk.f32.mxu1 %vm21077_vm0, %v23216_v7 }
0x1faf   :  { %19627 = vmatprep.subr.bf16.mxu1 %v23224_v4 }
0x1fb2   :  { %19629 = vmatpush3.bf16.msra.mxu1 %v21974_v29 }
0x1fb3   :  { %19630 = vmatprep.subr.bf16.mxu1 %v23224_v4 }
0x2080   :  { %v7467_v25 = vpop.f32.mrb[14].mxu1 }
0x2081   :  { %v7481_v30 = vadd.f32 %v7467_v25, %v22092_v44  ;;  %v18027_v63 = vpop.f32.mrb[15].mxu1  ;;  %v7472_v32 = vrot.slane %v7467_v25, 6 }
0x2083   :  { %v7483_v31 = vrot.slane %v7481_v30, 6  ;;  %v7474_v50 = vadd.f32 %v7472_v32, %v22135_v3 }
0x2085   :  { %7484 = vrot.lane.b32.xlu1 %v7483_v31, %s21079_s18  ;;  %v16216_v51 = vmul.f32 -1.442695, %v7474_v50 }
0x2087   :  { %20626 = vpow2.f32 %v16216_v51 }
0x2091   :  { %v20627_v5 = vpop.eup %20626 }
0x2092   :  { %v7478_v8 = vadd.f32 1.0, %v20627_v5 }
0x2094   :  { %20628 = vrcp.f32 %v7478_v8 }
0x209e   :  { %v20629_v9 = vpop.eup %20628 }
0x209f   :  { %v7494_v15 = vsub.f32 1.0, %v20629_v9  ;;  %v7502_v17 = vmul.f32 %v20629_v9, %v7500_v6 }
0x20f7   :  { %v7485_v10 = vpop.permute.xlu1 %7484 }
0x20f8   :  { %v7487_v55 = vmul.f32 %v20629_v9, %v7485_v10 }
0x20fa   :  { %7489 = vrot.lane.b32.xlu0 %v7487_v55, %s21079_s18 }
0x216c   :  { %v7490_v11 = vpop.permute.xlu0 %7489 }
0x216d   :  { %v7492_v12 = vadd.f32 %v22132_v1, %v7490_v11 }
0x216f   :  { %20630 = vtanh.f32 %v7492_v12 }
0x2179   :  { %v20631_v20 = vpop.eup %20630 }
0x217a   :  { %7496 = vrot.lane.b32.xlu1 %v20631_v20, %s21080_s23 }
0x21ec   :  { %v7497_v16 = vpop.permute.xlu1 %7496 }
0x21ed   :  { %v7499_v23 = vmul.f32 %v7497_v16, %v7494_v15 }
0x21ef   :  { %v22237_v43 = vadd.f32 %v7502_v17, %v7499_v23 }
0x21f1   :  { %v7505_v60 = vrot.slane %v22237_v43, 2  ;;  %v8024_v62 = vrot.slane %v22237_v43, 7 }
0x21f3   :  { %7506 = vrot.lane.b32.xlu0 %v7505_v60, %s21080_s23 }
0x2265   :  { %v7507_v24 = vpop.permute.xlu0 %7506 }
0x2266   :  { %v7508_v14 = vsel %vm716_vm3, %v7507_v24, 0 }
0x2267   :  { %v7579_v26 = vand.u32 4294901760, %v7508_v14 }
0x2269   :  { %v7580_v54 = vsub.f32 %v7508_v14, %v7579_v26 }
0x226b   :  { %v7581_v27 = vand.u32 4294901760, %v7580_v54 }
0x226d   :  { %v7582_v28 = vsub.f32 %v7580_v54, %v7581_v27 }
0x226f   :  { %v7583_v36 = vand.u32 4294901760, %v7582_v28 }
0x2271   :  { %18037 = vmatmul.mubr.f32.vlgmr.msra.gmra.mrb[14].mxu0 %v7583_v36 }
0x2272   :  { %19596 = vmatpush3.bf16.msra.mxu0 %v21978_v35  ;;  %18047 = vmatprep.mubr.msk.f32.mxu0 %vm21077_vm0, %v23216_v7 }
0x2273   :  { %19597 = vmatprep.subr.bf16.mxu0 %v23224_v4 }
0x2276   :  { %19599 = vmatpush3.bf16.msra.mxu0 %v21986_v53 }
0x2277   :  { %19600 = vmatprep.subr.bf16.mxu0 %v23224_v4 }
0x2279   :  { %18048 = vmatmul.mubr.f32.vlgmr.msra.gmra.mrb[14].mxu0 %v7579_v26 }
0x227a   :  { %19602 = vmatpush3.bf16.msra.mxu0 %v21991_v56  ;;  %18058 = vmatprep.mubr.msk.f32.mxu0 %vm21077_vm0, %v23216_v7 }
0x227b   :  { %19603 = vmatprep.subr.bf16.mxu0 %v23224_v4 }
0x227e   :  { %19605 = vmatpush3.bf16.msra.mxu0 %v21998_v57 }
0x227f   :  { %19606 = vmatprep.subr.bf16.mxu0 %v23224_v4 }
0x2281   :  { %18059 = vmatmul.mubr.f32.vlgmr.msra.gmra.mrb[14].mxu0 %v7580_v54 }
0x2282   :  { %19608 = vmatpush3.bf16.msra.mxu0 %v21970_v19  ;;  %18069 = vmatprep.mubr.msk.f32.mxu0 %vm21077_vm0, %v23216_v7 }
0x2283   :  { %19609 = vmatprep.subr.bf16.mxu0 %v23224_v4 }
0x2286   :  { %19611 = vmatpush3.bf16.msra.mxu0 %v21974_v29 }
0x2287   :  { %19612 = vmatprep.subr.bf16.mxu0 %v23224_v4 }
0x2289   :  { %18070 = vmatmul.mubr.f32.vlgmr.msra.gmra.mrb[14].mxu0 %v7581_v27 }
0x228a   :  { %19614 = vmatpush3.bf16.msra.mxu0 %v22013_v22  ;;  %18080 = vmatprep.mubr.msk.f32.mxu0 %vm21077_vm0, %v23216_v7 }
0x228b   :  { %19615 = vmatprep.subr.bf16.mxu0 %v23224_v4 }
0x228e   :  { %19617 = vmatpush3.bf16.msra.mxu0 %v22018_v41 }
0x228f   :  { %19618 = vmatprep.subr.bf16.mxu0 %v23224_v4 }
0x2291   :  { %18081 = vmatmul.mubr.f32.vlgmr.msra.gmra.mrb[14].mxu0 %v7579_v26 }
0x2292   :  { %19620 = vmatpush3.bf16.msra.mxu0 %v21970_v19  ;;  %18091 = vmatprep.mubr.msk.f32.mxu0 %vm21077_vm0, %v23216_v7 }
0x2293   :  { %19621 = vmatprep.subr.bf16.mxu0 %v23224_v4 }
0x2296   :  { %19623 = vmatpush3.bf16.msra.mxu0 %v21974_v29 }
0x2297   :  { %19660 = vmatprep.subr.bf16.mxu0 %v23224_v4 }
0x2299   :  { %18092 = vmatmul.mubr.f32.vlgmr.msra.gmra.mrb[14].mxu0 %v7579_v26 }
0x229a   :  { %19662 = vmatpush3.bf16.msra.mxu0 %v21970_v19  ;;  %18168 = vmatprep.mubr.msk.f32.mxu0 %vm21077_vm0, %v23216_v7 }
0x229b   :  { %19663 = vmatprep.subr.bf16.mxu0 %v23224_v4 }
0x229e   :  { %19665 = vmatpush3.bf16.msra.mxu0 %v21974_v29 }
0x229f   :  { %19666 = vmatprep.subr.bf16.mxu0 %v23224_v4 }
0x236c   :  { %v7991_v37 = vpop.f32.mrb[14].mxu0 }
0x236d   :  { %v8005_v38 = vadd.f32 %v7991_v37, %v22092_v44  ;;  %v18093_v39 = vpop.f32.mrb[15].mxu0  ;;  %v7996_v45 = vrot.slane %v7991_v37, 5 }
0x236f   :  { %v8007_v40 = vrot.slane %v8005_v38, 5  ;;  %v7998_v46 = vadd.f32 %v7996_v45, %v22135_v3 }
0x2371   :  { %8008 = vrot.lane.b32.xlu1 %v8007_v40, %s21079_s18  ;;  %v16217_v33 = vmul.f32 -1.442695, %v7998_v46 }
0x2373   :  { %20632 = vpow2.f32 %v16217_v33 }
0x237d   :  { %v20633_v34 = vpop.eup %20632 }
0x237e   :  { %v8002_v42 = vadd.f32 1.0, %v20633_v34 }
0x2380   :  { %20634 = vrcp.f32 %v8002_v42 }
0x238a   :  { %v20635_v47 = vpop.eup %20634 }
0x238b   :  { %v8018_v0 = vsub.f32 1.0, %v20635_v47  ;;  %v8026_v13 = vmul.f32 %v20635_v47, %v8024_v62 }
0x23e3   :  { %v8009_v49 = vpop.permute.xlu1 %8008 }
0x23e4   :  { %v8011_v52 = vmul.f32 %v20635_v47, %v8009_v49 }
0x23e6   :  { %8013 = vrot.lane.b32.xlu0 %v8011_v52, %s21079_s18 }
0x2458   :  { %v8014_v58 = vpop.permute.xlu0 %8013 }
0x2459   :  { %v8016_v59 = vadd.f32 %v22132_v1, %v8014_v58 }
0x245b   :  { %20636 = vtanh.f32 %v8016_v59 }
0x2465   :  { %v20637_v61 = vpop.eup %20636 }
0x2466   :  { %8020 = vrot.lane.b32.xlu1 %v20637_v61, %s21080_s23 }
0x24d8   :  { %v8021_v2 = vpop.permute.xlu1 %8020 }
0x24d9   :  { %v8023_v18 = vmul.f32 %v8021_v2, %v8018_v0 }
0x24db   :  { %v22285_v25 = vadd.f32 %v8026_v13, %v8023_v18 }
0x24dd   :  { %v8029_v30 = vrot.slane %v22285_v25, 3  ;;  %v8548_v26 = vrot.slane %v22285_v25, 7 }
0x24df   :  { %8030 = vrot.lane.b32.xlu0 %v8029_v30, %s21080_s23 }
0x2551   :  { %v8031_v63 = vpop.permute.xlu0 %8030 }
0x2552   :  { %v8032_v31 = vsel %vm716_vm3, %v8031_v63, 0 }
0x2553   :  { %v8103_v32 = vand.u32 4294901760, %v8032_v31 }
0x2555   :  { %v8104_v50 = vsub.f32 %v8032_v31, %v8103_v32 }
0x2557   :  { %v8105_v51 = vand.u32 4294901760, %v8104_v50 }
0x2559   :  { %v8106_v5 = vsub.f32 %v8104_v50, %v8105_v51 }
0x255b   :  { %v8107_v8 = vand.u32 4294901760, %v8106_v5 }
0x255d   :  { %18103 = vmatmul.mubr.f32.vlgmr.msra.gmra.mrb[16].mxu1 %v8107_v8 }
0x255e   :  { %19632 = vmatpush3.bf16.msra.mxu1 %v21978_v35  ;;  %18113 = vmatprep.mubr.msk.f32.mxu1 %vm21077_vm0, %v23216_v7 }
0x255f   :  { %19633 = vmatprep.subr.bf16.mxu1 %v23224_v4 }
0x2562   :  { %19635 = vmatpush3.bf16.msra.mxu1 %v21986_v53 }
0x2563   :  { %19636 = vmatprep.subr.bf16.mxu1 %v23224_v4 }
0x2565   :  { %18114 = vmatmul.mubr.f32.vlgmr.msra.gmra.mrb[16].mxu1 %v8103_v32 }
0x2566   :  { %19638 = vmatpush3.bf16.msra.mxu1 %v21991_v56  ;;  %18124 = vmatprep.mubr.msk.f32.mxu1 %vm21077_vm0, %v23216_v7 }
0x2567   :  { %19639 = vmatprep.subr.bf16.mxu1 %v23224_v4 }
0x256a   :  { %19641 = vmatpush3.bf16.msra.mxu1 %v21998_v57 }
0x256b   :  { %19642 = vmatprep.subr.bf16.mxu1 %v23224_v4 }
0x256d   :  { %18125 = vmatmul.mubr.f32.vlgmr.msra.gmra.mrb[16].mxu1 %v8104_v50 }
0x256e   :  { %19644 = vmatpush3.bf16.msra.mxu1 %v21970_v19  ;;  %18135 = vmatprep.mubr.msk.f32.mxu1 %vm21077_vm0, %v23216_v7 }
0x256f   :  { %19645 = vmatprep.subr.bf16.mxu1 %v23224_v4 }
0x2572   :  { %19647 = vmatpush3.bf16.msra.mxu1 %v21974_v29 }
0x2573   :  { %19648 = vmatprep.subr.bf16.mxu1 %v23224_v4 }
0x2575   :  { %18136 = vmatmul.mubr.f32.vlgmr.msra.gmra.mrb[16].mxu1 %v8105_v51 }
0x2576   :  { %19650 = vmatpush3.bf16.msra.mxu1 %v22013_v22  ;;  %18146 = vmatprep.mubr.msk.f32.mxu1 %vm21077_vm0, %v23216_v7 }
0x2577   :  { %19651 = vmatprep.subr.bf16.mxu1 %v23224_v4 }
0x257a   :  { %19653 = vmatpush3.bf16.msra.mxu1 %v22018_v41 }
0x257b   :  { %19654 = vmatprep.subr.bf16.mxu1 %v23224_v4 }
0x257d   :  { %18147 = vmatmul.mubr.f32.vlgmr.msra.gmra.mrb[16].mxu1 %v8103_v32 }
0x257e   :  { %19656 = vmatpush3.bf16.msra.mxu1 %v21970_v19  ;;  %18157 = vmatprep.mubr.msk.f32.mxu1 %vm21077_vm0, %v23216_v7 }
0x257f   :  { %19657 = vmatprep.subr.bf16.mxu1 %v23224_v4 }
0x2582   :  { %19659 = vmatpush3.bf16.msra.mxu1 %v21974_v29 }
0x2583   :  { %19696 = vmatprep.subr.bf16.mxu1 %v23224_v4 }
0x2585   :  { %18158 = vmatmul.mubr.f32.vlgmr.msra.gmra.mrb[16].mxu1 %v8103_v32 }
0x2586   :  { %19698 = vmatpush3.bf16.msra.mxu1 %v21970_v19  ;;  %18234 = vmatprep.mubr.msk.f32.mxu1 %vm21077_vm0, %v23216_v7 }
0x2587   :  { %19699 = vmatprep.subr.bf16.mxu1 %v23224_v4 }
0x258a   :  { %19701 = vmatpush3.bf16.msra.mxu1 %v21974_v29 }
0x258b   :  { %19702 = vmatprep.subr.bf16.mxu1 %v23224_v4 }
0x2658   :  { %v8515_v9 = vpop.f32.mrb[16].mxu1 }
0x2659   :  { %v8529_v10 = vadd.f32 %v8515_v9, %v22092_v44  ;;  %v18159_v55 = vpop.f32.mrb[17].mxu1  ;;  %v8520_v12 = vrot.slane %v8515_v9, 4 }
0x265b   :  { %v8531_v11 = vrot.slane %v8529_v10, 4  ;;  %v8522_v20 = vadd.f32 %v8520_v12, %v22135_v3 }
0x265d   :  { %8532 = vrot.lane.b32.xlu1 %v8531_v11, %s21079_s18  ;;  %v16218_v6 = vmul.f32 -1.442695, %v8522_v20 }
0x265f   :  { %20638 = vpow2.f32 %v16218_v6 }
0x2669   :  { %v20639_v15 = vpop.eup %20638 }
0x266a   :  { %v8526_v16 = vadd.f32 1.0, %v20639_v15 }
0x266c   :  { %20640 = vrcp.f32 %v8526_v16 }
0x2676   :  { %v20641_v17 = vpop.eup %20640 }
0x2677   :  { %v8542_v54 = vsub.f32 1.0, %v20641_v17  ;;  %v8550_v28 = vmul.f32 %v20641_v17, %v8548_v26 }
0x26cf   :  { %v8533_v23 = vpop.permute.xlu1 %8532 }
0x26d0   :  { %v8535_v43 = vmul.f32 %v20641_v17, %v8533_v23 }
0x26d2   :  { %8537 = vrot.lane.b32.xlu0 %v8535_v43, %s21079_s18 }
0x2744   :  { %v8538_v60 = vpop.permute.xlu0 %8537 }
0x2745   :  { %v8540_v24 = vadd.f32 %v22132_v1, %v8538_v60 }
0x2747   :  { %20642 = vtanh.f32 %v8540_v24 }
0x2751   :  { %v20643_v14 = vpop.eup %20642 }
0x2752   :  { %8544 = vrot.lane.b32.xlu1 %v20643_v14, %s21080_s23 }
0x27c4   :  { %v8545_v27 = vpop.permute.xlu1 %8544 }
0x27c5   :  { %v8547_v36 = vmul.f32 %v8545_v27, %v8542_v54 }
0x27c7   :  { %v22333_v37 = vadd.f32 %v8550_v28, %v8547_v36 }
0x27c9   :  { %v8553_v38 = vrot.slane %v22333_v37, 4  ;;  %v9072_v32 = vrot.slane %v22333_v37, 7 }
0x27cb   :  { %8554 = vrot.lane.b32.xlu0 %v8553_v38, %s21080_s23  ;;  %v10130_v38 = vld [vmem:[#allocation8] sm:$0xff] }
0x283d   :  { %v8555_v39 = vpop.permute.xlu0 %8554 }
0x283e   :  { %v8556_v40 = vsel %vm716_vm3, %v8555_v39, 0  ;;  %v10131_v39 = vld [vmem:[#allocation8 + $0x8] sm:$0xff] }
0x283f   :  { %v8627_v45 = vand.u32 4294901760, %v8556_v40 }
0x2841   :  { %v8628_v46 = vsub.f32 %v8556_v40, %v8627_v45 }
0x2843   :  { %v8629_v33 = vand.u32 4294901760, %v8628_v46 }
0x2845   :  { %v8630_v34 = vsub.f32 %v8628_v46, %v8629_v33 }
0x2847   :  { %v8631_v42 = vand.u32 4294901760, %v8630_v34 }
0x2849   :  { %18169 = vmatmul.mubr.f32.vlgmr.msra.gmra.mrb[16].mxu0 %v8631_v42 }
0x284a   :  { %19668 = vmatpush3.bf16.msra.mxu0 %v21978_v35  ;;  %18179 = vmatprep.mubr.msk.f32.mxu0 %vm21077_vm0, %v23216_v7 }
0x284b   :  { %19669 = vmatprep.subr.bf16.mxu0 %v23224_v4 }
0x284e   :  { %19671 = vmatpush3.bf16.msra.mxu0 %v21986_v53 }
0x284f   :  { %19672 = vmatprep.subr.bf16.mxu0 %v23224_v4 }
0x2851   :  { %18180 = vmatmul.mubr.f32.vlgmr.msra.gmra.mrb[16].mxu0 %v8627_v45 }
0x2852   :  { %19674 = vmatpush3.bf16.msra.mxu0 %v21991_v56  ;;  %18190 = vmatprep.mubr.msk.f32.mxu0 %vm21077_vm0, %v23216_v7 }
0x2853   :  { %19675 = vmatprep.subr.bf16.mxu0 %v23224_v4 }
0x2856   :  { %19677 = vmatpush3.bf16.msra.mxu0 %v21998_v57 }
0x2857   :  { %19678 = vmatprep.subr.bf16.mxu0 %v23224_v4 }
0x2859   :  { %18191 = vmatmul.mubr.f32.vlgmr.msra.gmra.mrb[16].mxu0 %v8628_v46  ;;  %v10168_v46 = vand.u32 4294901760, %v10131_v39 }
0x285a   :  { %19680 = vmatpush3.bf16.msra.mxu0 %v21970_v19  ;;  %18201 = vmatprep.mubr.msk.f32.mxu0 %vm21077_vm0, %v23216_v7 }
0x285b   :  { %19681 = vmatprep.subr.bf16.mxu0 %v23224_v4 }
0x285e   :  { %19683 = vmatpush3.bf16.msra.mxu0 %v21974_v29 }
0x285f   :  { %19684 = vmatprep.subr.bf16.mxu0 %v23224_v4 }
0x2861   :  { %18202 = vmatmul.mubr.f32.vlgmr.msra.gmra.mrb[16].mxu0 %v8629_v33 }
0x2862   :  { %19686 = vmatpush3.bf16.msra.mxu0 %v22013_v22  ;;  %18212 = vmatprep.mubr.msk.f32.mxu0 %vm21077_vm0, %v23216_v7 }
0x2863   :  { %19687 = vmatprep.subr.bf16.mxu0 %v23224_v4 }
0x2866   :  { %19689 = vmatpush3.bf16.msra.mxu0 %v22018_v41 }
0x2867   :  { %19690 = vmatprep.subr.bf16.mxu0 %v23224_v4 }
0x2869   :  { %18213 = vmatmul.mubr.f32.vlgmr.msra.gmra.mrb[16].mxu0 %v8627_v45 }
0x286a   :  { %19692 = vmatpush3.bf16.msra.mxu0 %v21970_v19  ;;  %18223 = vmatprep.mubr.msk.f32.mxu0 %vm21077_vm0, %v23216_v7 }
0x286b   :  { %19693 = vmatprep.subr.bf16.mxu0 %v23224_v4 }
0x286e   :  { %19695 = vmatpush3.bf16.msra.mxu0 %v21974_v29 }
0x286f   :  { %19732 = vmatprep.subr.bf16.mxu0 %v23224_v4 }
0x2871   :  { %18224 = vmatmul.mubr.f32.vlgmr.msra.gmra.mrb[16].mxu0 %v8627_v45  ;;  %v10165_v45 = vand.u32 4294901760, %v10130_v38 }
0x2872   :  { %19734 = vmatpush3.bf16.msra.mxu0 %v21970_v19  ;;  %18300 = vmatprep.mubr.msk.f32.mxu0 %vm21077_vm0, %v23216_v7 }
0x2873   :  { %19735 = vmatprep.subr.bf16.mxu0 %v23224_v4  ;;  %v22428_v34 = vpack.c.bf16 %v10168_v46, %v10165_v45  ;;  %v10243_v42 = vsub.f32 %v10130_v38, %v10165_v45  ;;  %v11111_v38 = vrot.slane %v22070_v48, 7 }
0x2876   :  { %19737 = vmatpush3.bf16.msra.mxu0 %v21974_v29 }
0x2877   :  { %19738 = vmatprep.subr.bf16.mxu0 %v23224_v4 }
0x2944   :  { %v9039_v47 = vpop.f32.mrb[16].mxu0 }
0x2945   :  { %v9053_v49 = vadd.f32 %v9039_v47, %v22092_v44  ;;  %v18225_v52 = vpop.f32.mrb[17].mxu0  ;;  %v9044_v59 = vrot.slane %v9039_v47, 3  ;;  %v10250_v47 = vsub.f32 %v10131_v39, %v10168_v46 }
0x2947   :  { %v9055_v58 = vrot.slane %v9053_v49, 3  ;;  %v9046_v61 = vadd.f32 %v9044_v59, %v22135_v3  ;;  %v10251_v59 = vand.u32 4294901760, %v10250_v47 }
0x2949   :  { %9056 = vrot.lane.b32.xlu1 %v9055_v58, %s21079_s18  ;;  %v16219_v62 = vmul.f32 -1.442695, %v9046_v61  ;;  %v10244_v58 = vand.u32 4294901760, %v10243_v42 }
0x294b   :  { %20644 = vpow2.f32 %v16219_v62  ;;  %v10245_v62 = vsub.f32 %v10243_v42, %v10244_v58 }
0x2955   :  { %v20645_v0 = vpop.eup %20644 }
0x2956   :  { %v9050_v2 = vadd.f32 1.0, %v20645_v0  ;;  %v10252_v0 = vsub.f32 %v10250_v47, %v10251_v59 }
0x2958   :  { %20646 = vrcp.f32 %v9050_v2  ;;  %v10246_v2 = vand.u32 4294901760, %v10245_v62 }
0x2962   :  { %v20647_v13 = vpop.eup %20646 }
0x2963   :  { %v9066_v50 = vsub.f32 1.0, %v20647_v13  ;;  %v9074_v5 = vmul.f32 %v20647_v13, %v9072_v32  ;;  %v10136_v32 = vld [vmem:[#allocation11] sm:$0xff] }
0x29bb   :  { %v9057_v18 = vpop.permute.xlu1 %9056 }
0x29bc   :  { %v9059_v25 = vmul.f32 %v20647_v13, %v9057_v18  ;;  %v10253_v13 = vand.u32 4294901760, %v10252_v0 }
0x29be   :  { %9061 = vrot.lane.b32.xlu0 %v9059_v25, %s21079_s18  ;;  %v22434_v18 = vpack.c.bf16 %v10253_v13, %v10246_v2  ;;  %v22438_v25 = vpack.c.bf16 %v10250_v47, %v10243_v42 }
0x2a30   :  { %v9062_v30 = vpop.permute.xlu0 %9061 }
0x2a31   :  { %v9064_v63 = vadd.f32 %v22132_v1, %v9062_v30  ;;  %v22449_v30 = vpack.c.bf16 %v10251_v59, %v10244_v58 }
0x2a33   :  { %20648 = vtanh.f32 %v9064_v63 }
0x2a3d   :  { %v20649_v31 = vpop.eup %20648 }
0x2a3e   :  { %9068 = vrot.lane.b32.xlu1 %v20649_v31, %s21080_s23 }
0x2ab0   :  { %v9069_v51 = vpop.permute.xlu1 %9068 }
0x2ab1   :  { %v9071_v8 = vmul.f32 %v9069_v51, %v9066_v50  ;;  %v10137_v50 = vld [vmem:[#allocation11 + $0x8] sm:$0xff]  ;;  %v11117_v51 = vand.u32 4294901760, %v10136_v32 }
0x2ab3   :  { %v22381_v9 = vadd.f32 %v9074_v5, %v9071_v8  ;;  %v11120_v5 = vand.u32 4294901760, %v10137_v50 }
0x2ab5   :  { %v9077_v10 = vrot.slane %v22381_v9, 5  ;;  %v22464_v8 = vpack.c.bf16 %v11120_v5, %v11117_v51 }
0x2ab7   :  { %9078 = vrot.lane.b32.xlu0 %v9077_v10, %s21080_s23  ;;  %v11197_v10 = vsub.f32 %v10136_v32, %v11117_v51 }
0x2b29   :  { %v9079_v55 = vpop.permute.xlu0 %9078 }
0x2b2a   :  { %v9080_v11 = vsel %vm716_vm3, %v9079_v55, 0  ;;  %v11204_v55 = vsub.f32 %v10137_v50, %v11120_v5 }
0x2b2b   :  { %v9151_v12 = vand.u32 4294901760, %v9080_v11 }
0x2b2d   :  { %v9152_v20 = vsub.f32 %v9080_v11, %v9151_v12  ;;  %v10138_v11 = vld [vmem:[#allocation11 + $0x10] sm:$0xff] }
0x2b2f   :  { %v9153_v6 = vand.u32 4294901760, %v9152_v20 }
0x2b31   :  { %v9154_v15 = vsub.f32 %v9152_v20, %v9153_v6 }
0x2b33   :  { %v9155_v16 = vand.u32 4294901760, %v9154_v15  ;;  %v11198_v15 = vand.u32 4294901760, %v11197_v10 }
0x2b35   :  { %18235 = vmatmul.mubr.f32.vlgmr.msra.gmra.mrb[18].mxu1 %v9155_v16  ;;  %v11205_v16 = vand.u32 4294901760, %v11204_v55 }
0x2b36   :  { %19704 = vmatpush3.bf16.msra.mxu1 %v21978_v35  ;;  %18245 = vmatprep.mubr.msk.f32.mxu1 %vm21077_vm0, %v23216_v7 }
0x2b37   :  { %19705 = vmatprep.subr.bf16.mxu1 %v23224_v4  ;;  %v22485_v47 = vpack.c.bf16 %v11205_v16, %v11198_v15 }
0x2b3a   :  { %19707 = vmatpush3.bf16.msra.mxu1 %v21986_v53 }
0x2b3b   :  { %19708 = vmatprep.subr.bf16.mxu1 %v23224_v4 }
0x2b3d   :  { %18246 = vmatmul.mubr.f32.vlgmr.msra.gmra.mrb[18].mxu1 %v9151_v12 }
0x2b3e   :  { %19710 = vmatpush3.bf16.msra.mxu1 %v21991_v56  ;;  %18256 = vmatprep.mubr.msk.f32.mxu1 %vm21077_vm0, %v23216_v7 }
0x2b3f   :  { %19711 = vmatprep.subr.bf16.mxu1 %v23224_v4 }
0x2b42   :  { %19713 = vmatpush3.bf16.msra.mxu1 %v21998_v57 }
0x2b43   :  { %19714 = vmatprep.subr.bf16.mxu1 %v23224_v4 }
0x2b45   :  { %18257 = vmatmul.mubr.f32.vlgmr.msra.gmra.mrb[18].mxu1 %v9152_v20  ;;  %v11123_v20 = vand.u32 4294901760, %v10138_v11 }
0x2b46   :  { %19716 = vmatpush3.bf16.msra.mxu1 %v21970_v19  ;;  %18267 = vmatprep.mubr.msk.f32.mxu1 %vm21077_vm0, %v23216_v7 }
0x2b47   :  { %19717 = vmatprep.subr.bf16.mxu1 %v23224_v4 }
0x2b4a   :  { %19719 = vmatpush3.bf16.msra.mxu1 %v21974_v29 }
0x2b4b   :  { %19720 = vmatprep.subr.bf16.mxu1 %v23224_v4 }
0x2b4d   :  { %18268 = vmatmul.mubr.f32.vlgmr.msra.gmra.mrb[18].mxu1 %v9153_v6 }
0x2b4e   :  { %19722 = vmatpush3.bf16.msra.mxu1 %v22013_v22  ;;  %18278 = vmatprep.mubr.msk.f32.mxu1 %vm21077_vm0, %v23216_v7 }
0x2b4f   :  { %19723 = vmatprep.subr.bf16.mxu1 %v23224_v4 }
0x2b52   :  { %19725 = vmatpush3.bf16.msra.mxu1 %v22018_v41 }
0x2b53   :  { %19726 = vmatprep.subr.bf16.mxu1 %v23224_v4 }
0x2b55   :  { %18279 = vmatmul.mubr.f32.vlgmr.msra.gmra.mrb[18].mxu1 %v9151_v12 }
0x2b56   :  { %19728 = vmatpush3.bf16.msra.mxu1 %v21970_v19  ;;  %18289 = vmatprep.mubr.msk.f32.mxu1 %vm21077_vm0, %v23216_v7 }
0x2b57   :  { %19729 = vmatprep.subr.bf16.mxu1 %v23224_v4 }
0x2b5a   :  { %19731 = vmatpush3.bf16.msra.mxu1 %v21974_v29 }
0x2b5b   :  { %19768 = vmatprep.subr.bf16.mxu1 %v23224_v4 }
0x2b5d   :  { %18290 = vmatmul.mubr.f32.vlgmr.msra.gmra.mrb[18].mxu1 %v9151_v12  ;;  %v10139_v12 = vld [vmem:[#allocation11 + $0x18] sm:$0xff] }
0x2b5e   :  { %18362 = vmatprep.mubr.msk.f32.mxu1 %vm21077_vm0, %v23216_v7  ;;  %19770 = vmatpush3.bf16.msra.mxu1 %v22428_v34  ;;  %v11126_v6 = vand.u32 4294901760, %v10139_v12 }
0x2b5f   :  { %19771 = vmatprep.subr.bf16.mxu1 %v23224_v4 }
0x2c30   :  { %v9563_v17 = vpop.f32.mrb[18].mxu1 }
0x2c31   :  { %v9577_v23 = vadd.f32 %v9563_v17, %v22092_v44  ;;  %v18291_v43 = vpop.f32.mrb[19].mxu1  ;;  %v9568_v24 = vrot.slane %v9563_v17, 2  ;;  %v16222_v44 = vsel %vm10158_vm12, 1.0, %v23216_v7  ;;  %v22468_v17 = vpack.c.bf16 %v11126_v6, %v11123_v20 }
0x2c32   :  { %v10162_v40 = vsel %vm237_vm1, %v16222_v44, 0  ;;  %v11218_v43 = vsub.f32 %v10139_v12, %v11126_v6 }
0x2c33   :  { %v9579_v60 = vrot.slane %v9577_v23, 2  ;;  %v9570_v14 = vadd.f32 %v9568_v24, %v22135_v3  ;;  %v10232_v33 = vsub.f32 %v10162_v40, %v10162_v40  ;;  %v11211_v23 = vsub.f32 %v10138_v11, %v11123_v20 }
0x2c34   :  { %v11206_v24 = vsub.f32 %v11204_v55, %v11205_v16 }
0x2c35   :  { %9580 = vrot.lane.b32.xlu1 %v9579_v60, %s21079_s18  ;;  %v16220_v26 = vmul.f32 -1.442695, %v9570_v14  ;;  %v10233_v49 = vand.u32 4294901760, %v10232_v33  ;;  %v11199_v60 = vsub.f32 %v11197_v10, %v11198_v15  ;;  %v22483_v42 = vpack.c.bf16 %v11218_v43, %v11211_v23 }
0x2c37   :  { %20650 = vpow2.f32 %v16220_v26  ;;  %v10234_v52 = vsub.f32 %v10232_v33, %v10233_v49  ;;  %v11200_v26 = vand.u32 4294901760, %v11199_v60 }
0x2c39   :  { %v10235_v61 = vand.u32 4294901760, %v10234_v52  ;;  %v9596_v52 = vrot.slane %v22381_v9, 7 }
0x2c3b   :  { %18363 = vmatmul.mubr.f32.vlgmr.msra.gmra.mrb[20].mxu1 %v10235_v61 }
0x2c3c   :  { %18369 = vmatprep.mubr.msk.f32.mxu1 %vm21077_vm0, %v23216_v7  ;;  %19773 = vmatpush3.bf16.msra.mxu1 %v22434_v18 }
0x2c3d   :  { %19774 = vmatprep.subr.bf16.mxu1 %v23224_v4 }
0x2c41   :  { %v20651_v54 = vpop.eup %20650 }
0x2c42   :  { %v9574_v27 = vadd.f32 1.0, %v20651_v54  ;;  %v11212_v54 = vand.u32 4294901760, %v11211_v23 }
0x2c43   :  { %18370 = vmatmul.mubr.msk.f32.vlgmr.msra.gmra.mrb[20].mxu1 %vm237_vm1, %v16222_v44 }
0x2c44   :  { %20652 = vrcp.f32 %v9574_v27  ;;  %19776 = vmatpush3.bf16.msra.mxu1 %v22438_v25  ;;  %18376 = vmatprep.mubr.msk.f32.mxu1 %vm21077_vm0, %v23216_v7  ;;  %v11219_v27 = vand.u32 4294901760, %v11218_v43 }
0x2c45   :  { %19777 = vmatprep.subr.bf16.mxu1 %v23224_v4 }
0x2c4b   :  { %18377 = vmatmul.mubr.f32.vlgmr.msra.gmra.mrb[20].mxu1 %v10232_v33  ;;  %v22481_v33 = vpack.c.bf16 %v11204_v55, %v11197_v10 }
0x2c4c   :  { %19779 = vmatpush3.bf16.msra.mxu1 %v22428_v34  ;;  %18383 = vmatprep.mubr.msk.f32.mxu1 %vm21077_vm0, %v23216_v7 }
0x2c4d   :  { %19780 = vmatprep.subr.bf16.mxu1 %v23224_v4 }
0x2c4e   :  { %v22421_v28 = vpop.eup %20652 }
0x2c4f   :  { %v9590_v58 = vsub.f32 1.0, %v22421_v28  ;;  %v9598_v61 = vmul.f32 %v22421_v28, %v9596_v52 }
0x2c53   :  { %18384 = vmatmul.mubr.f32.vlgmr.msra.gmra.mrb[20].mxu1 %v10233_v49  ;;  %v22487_v49 = vpack.c.bf16 %v11219_v27, %v11212_v54 }
0x2c54   :  { %19782 = vmatpush3.bf16.msra.mxu1 %v22449_v30  ;;  %18390 = vmatprep.mubr.msk.f32.mxu1 %vm21077_vm0, %v23216_v7 }
0x2c55   :  { %19783 = vmatprep.subr.bf16.mxu1 %v23224_v4 }
0x2c5b   :  { %18391 = vmatmul.mubr.msk.f32.vlgmr.msra.gmra.mrb[20].mxu1 %vm237_vm1, %v16222_v44 }
0x2c5c   :  { %19785 = vmatpush3.bf16.msra.mxu1 %v22428_v34  ;;  %18397 = vmatprep.mubr.msk.f32.mxu1 %vm21077_vm0, %v23216_v7 }
0x2c5d   :  { %19822 = vmatprep.subr.bf16.mxu1 %v23224_v4 }
0x2c63   :  { %18398 = vmatmul.mubr.msk.f32.vlgmr.msra.gmra.mrb[20].mxu1 %vm237_vm1, %v16222_v44  ;;  %v11220_v44 = vsub.f32 %v11218_v43, %v11219_v27  ;;  %v10135_v43 = vld [vmem:[#allocation9 + $0x18] sm:$0xff] }
0x2c64   :  { %18474 = vmatprep.mubr.msk.f32.mxu1 %vm21077_vm0, %v23216_v7  ;;  %19824 = vmatpush3.bf16.msra.mxu1 %v22464_v8 }
0x2c65   :  { %19825 = vmatprep.subr.bf16.mxu1 %v23224_v4  ;;  %v11221_v45 = vand.u32 4294901760, %v11220_v44 }
0x2c68   :  { %19827 = vmatpush3.bf16.msra.mxu1 %v22468_v17 }
0x2c69   :  { %19828 = vmatprep.subr.bf16.mxu1 %v23224_v4 }
0x2ca7   :  { %v9581_v36 = vpop.permute.xlu1 %9580 }
0x2ca8   :  { %v9583_v37 = vmul.f32 %v22421_v28, %v9581_v36  ;;  %v11207_v36 = vand.u32 4294901760, %v11206_v24 }
0x2caa   :  { %9585 = vrot.lane.b32.xlu0 %v9583_v37, %s21079_s18  ;;  %v11213_v37 = vsub.f32 %v11211_v23, %v11212_v54  ;;  %v22474_v39 = vpack.c.bf16 %v11207_v36, %v11200_v26  ;;  %v10134_v23 = vld [vmem:[#allocation9 + $0x10] sm:$0xff]  ;;  %v10636_v54 = vand.u32 4294901760, %v10135_v43 }
0x2cab   :  { %v10633_v26 = vand.u32 4294901760, %v10134_v23 }
0x2cac   :  { %v11214_v40 = vand.u32 4294901760, %v11213_v37  ;;  %v10728_v36 = vsub.f32 %v10135_v43, %v10636_v54 }
0x2cad   :  { %v10721_v27 = vsub.f32 %v10134_v23, %v10633_v26 }
0x2cae   :  { %v22479_v46 = vpack.c.bf16 %v11221_v45, %v11214_v40 }
0x2d1c   :  { %v9586_v63 = vpop.permute.xlu0 %9585 }
0x2d1d   :  { %v9588_v31 = vadd.f32 %v22132_v1, %v9586_v63 }
0x2d1f   :  { %20654 = vtanh.f32 %v9588_v31 }
0x2d29   :  { %v20655_v14 = vpop.eup %20654 }
0x2d2a   :  { %9592 = vrot.lane.b32.xlu1 %v20655_v14, %s21080_s23 }
0x2d2e   :  { %11112 = vrot.lane.b32.xlu1 %v11111_v38, %s21080_s23 }
0x2d36   :  { %v10619_v28 = vpop.f32.mrb[20].mxu1 }
0x2d37   :  { %v18399_v5 = vpop.f32.mrb[21].mxu1 }
0x2d9c   :  { %v9593_v59 = vpop.permute.xlu1 %9592 }
0x2d9d   :  { %v9595_v62 = vmul.f32 %v9593_v59, %v9590_v58  ;;  %v10722_v58 = vand.u32 4294901760, %v10721_v27  ;;  %v10729_v59 = vand.u32 4294901760, %v10728_v36 }
0x2d9f   :  { %v22492_v0 = vadd.f32 %v9598_v61, %v9595_v62  ;;  %v22566_v61 = vpack.c.bf16 %v10636_v54, %v10633_v26 }
0x2da0   :  { %v11113_v2 = vpop.permute.xlu1 %11112 }
0x2da1   :  { %v11114_v13 = vsel %vm716_vm3, %v11113_v2, 0  ;;  %v9601_v63 = vrot.slane %v22492_v0, 6 }
0x2da2   :  { %v11185_v31 = vand.u32 4294901760, %v11114_v13 }
0x2da3   :  { %9602 = vrot.lane.b32.xlu0 %v9601_v63, %s21080_s23  ;;  %v10730_v63 = vsub.f32 %v10728_v36, %v10729_v59 }
0x2da4   :  { %v11186_v32 = vsub.f32 %v11114_v13, %v11185_v31  ;;  %v10723_v13 = vsub.f32 %v10721_v27, %v10722_v58 }
0x2da6   :  { %v11187_v50 = vand.u32 4294901760, %v11186_v32 }
0x2da8   :  { %v11188_v51 = vsub.f32 %v11186_v32, %v11187_v50 }
0x2daa   :  { %v11189_v9 = vand.u32 4294901760, %v11188_v51 }
0x2dac   :  { %18475 = vmatmul.mubr.f32.vlgmr.msra.gmra.mrb[22].mxu1 %v11189_v9 }
0x2dad   :  { %19830 = vmatpush3.bf16.msra.mxu1 %v22474_v39  ;;  %18485 = vmatprep.mubr.msk.f32.mxu1 %vm21077_vm0, %v23216_v7 }
0x2dae   :  { %19831 = vmatprep.subr.bf16.mxu1 %v23224_v4 }
0x2db1   :  { %19833 = vmatpush3.bf16.msra.mxu1 %v22479_v46 }
0x2db2   :  { %19834 = vmatprep.subr.bf16.mxu1 %v23224_v4 }
0x2db4   :  { %18486 = vmatmul.mubr.f32.vlgmr.msra.gmra.mrb[22].mxu1 %v11185_v31 }
0x2db5   :  { %19836 = vmatpush3.bf16.msra.mxu1 %v22481_v33  ;;  %18496 = vmatprep.mubr.msk.f32.mxu1 %vm21077_vm0, %v23216_v7 }
0x2db6   :  { %19837 = vmatprep.subr.bf16.mxu1 %v23224_v4 }
0x2db9   :  { %19839 = vmatpush3.bf16.msra.mxu1 %v22483_v42 }
0x2dba   :  { %19840 = vmatprep.subr.bf16.mxu1 %v23224_v4 }
0x2dbc   :  { %18497 = vmatmul.mubr.f32.vlgmr.msra.gmra.mrb[22].mxu1 %v11186_v32  ;;  %v10724_v32 = vand.u32 4294901760, %v10723_v13 }
0x2dbd   :  { %19842 = vmatpush3.bf16.msra.mxu1 %v22464_v8  ;;  %18507 = vmatprep.mubr.msk.f32.mxu1 %vm21077_vm0, %v23216_v7 }
0x2dbe   :  { %19843 = vmatprep.subr.bf16.mxu1 %v23224_v4 }
0x2dc1   :  { %19845 = vmatpush3.bf16.msra.mxu1 %v22468_v17 }
0x2dc2   :  { %19846 = vmatprep.subr.bf16.mxu1 %v23224_v4 }
0x2dc4   :  { %18508 = vmatmul.mubr.f32.vlgmr.msra.gmra.mrb[22].mxu1 %v11187_v50  ;;  %v10731_v50 = vand.u32 4294901760, %v10730_v63 }
0x2dc5   :  { %19848 = vmatpush3.bf16.msra.mxu1 %v22485_v47  ;;  %18518 = vmatprep.mubr.msk.f32.mxu1 %vm21077_vm0, %v23216_v7 }
0x2dc6   :  { %19849 = vmatprep.subr.bf16.mxu1 %v23224_v4  ;;  %v22577_v51 = vpack.c.bf16 %v10731_v50, %v10724_v32  ;;  %v10143_v32 = vld [vmem:[#allocation15 + $0x8] sm:$0xff] }
0x2dc9   :  { %19851 = vmatpush3.bf16.msra.mxu1 %v22487_v49 }
0x2dca   :  { %19852 = vmatprep.subr.bf16.mxu1 %v23224_v4 }
0x2dcc   :  { %18519 = vmatmul.mubr.f32.vlgmr.msra.gmra.mrb[22].mxu1 %v11185_v31 }
0x2dcd   :  { %19854 = vmatpush3.bf16.msra.mxu1 %v22464_v8  ;;  %18529 = vmatprep.mubr.msk.f32.mxu1 %vm21077_vm0, %v23216_v7 }
0x2dce   :  { %19855 = vmatprep.subr.bf16.mxu1 %v23224_v4 }
0x2dd1   :  { %19857 = vmatpush3.bf16.msra.mxu1 %v22468_v17 }
0x2dd2   :  { %19894 = vmatprep.subr.bf16.mxu1 %v23224_v4 }
0x2dd4   :  { %18530 = vmatmul.mubr.f32.vlgmr.msra.gmra.mrb[22].mxu1 %v11185_v31 }
0x2dd5   :  { %18606 = vmatprep.mubr.msk.f32.mxu1 %vm21077_vm0, %v23216_v7 }
0x2e15   :  { %v9603_v10 = vpop.permute.xlu0 %9602 }
0x2e16   :  { %v9604_v55 = vsel %vm716_vm3, %v9603_v10, 0  ;;  %v22604_v10 = vpack.c.bf16 %v10729_v59, %v10722_v58 }
0x2e17   :  { %v9675_v11 = vand.u32 4294901760, %v9604_v55 }
0x2e19   :  { %v9676_v12 = vsub.f32 %v9604_v55, %v9675_v11  ;;  %v22621_v55 = vld [vmem:[#allocation14] sm:$0x1] }
0x2e1b   :  { %v9677_v20 = vand.u32 4294901760, %v9676_v12 }
0x2e1d   :  { %v9678_v6 = vsub.f32 %v9676_v12, %v9677_v20 }
0x2e1f   :  { %v9679_v15 = vand.u32 4294901760, %v9678_v6 }
0x2e21   :  { %18301 = vmatmul.mubr.f32.vlgmr.msra.gmra.mrb[18].mxu0 %v9679_v15  ;;  %v20674_v15 = vld [vmem:[%s23195_s9] sm:$0x1] }
0x2e22   :  { %19740 = vmatpush3.bf16.msra.mxu0 %v21978_v35  ;;  %18311 = vmatprep.mubr.msk.f32.mxu0 %vm21077_vm0, %v23216_v7  ;;  %v10132_v35 = vld [vmem:[#allocation9] sm:$0xff] }
0x2e23   :  { %19741 = vmatprep.subr.bf16.mxu0 %v23224_v4 }
0x2e26   :  { %19743 = vmatpush3.bf16.msra.mxu0 %v21986_v53  ;;  %v10133_v53 = vld [vmem:[#allocation9 + $0x8] sm:$0xff] }
0x2e27   :  { %19744 = vmatprep.subr.bf16.mxu0 %v23224_v4  ;;  %v10630_v16 = vand.u32 4294901760, %v10133_v53 }
0x2e29   :  { %18312 = vmatmul.mubr.f32.vlgmr.msra.gmra.mrb[18].mxu0 %v9675_v11  ;;  %v10714_v14 = vsub.f32 %v10133_v53, %v10630_v16 }
0x2e2a   :  { %19746 = vmatpush3.bf16.msra.mxu0 %v21991_v56  ;;  %18322 = vmatprep.mubr.msk.f32.mxu0 %vm21077_vm0, %v23216_v7  ;;  %v10624_v56 = vsel %vm716_vm3, %v10619_v28, 0  ;;  %v22588_v28 = vpack.c.bf16 %v10728_v36, %v10721_v27 }
0x2e2b   :  { %19747 = vmatprep.subr.bf16.mxu0 %v23224_v4  ;;  %v22553_v60 = vand.u32 4294901760, %v10624_v56  ;;  %v10715_v44 = vand.u32 4294901760, %v10714_v14 }
0x2e2d   :  { %v10716_v52 = vsub.f32 %v10714_v14, %v10715_v44 }
0x2e2e   :  { %19749 = vmatpush3.bf16.msra.mxu0 %v21998_v57  ;;  %v10627_v57 = vand.u32 4294901760, %v10132_v35 }
0x2e2f   :  { %19750 = vmatprep.subr.bf16.mxu0 %v23224_v4  ;;  %v10717_v2 = vand.u32 4294901760, %v10716_v52 }
0x2e30   :  { %v10707_v24 = vsub.f32 %v10132_v35, %v10627_v57  ;;  %v22562_v40 = vpack.c.bf16 %v10630_v16, %v10627_v57  ;;  %v22629_v57 = vld [vmem:[#allocation12] sm:$0x1] }
0x2e31   :  { %18323 = vmatmul.mubr.f32.vlgmr.msra.gmra.mrb[18].mxu0 %v9676_v12 }
0x2e32   :  { %19752 = vmatpush3.bf16.msra.mxu0 %v21970_v19  ;;  %18333 = vmatprep.mubr.msk.f32.mxu0 %vm21077_vm0, %v23216_v7  ;;  %v10708_v37 = vand.u32 4294901760, %v10707_v24  ;;  %v22583_v9 = vpack.c.bf16 %v10714_v14, %v10707_v24 }
0x2e33   :  { %19753 = vmatprep.subr.bf16.mxu0 %v23224_v4 }
0x2e34   :  { %v10709_v45 = vsub.f32 %v10707_v24, %v10708_v37  ;;  %v22600_v5 = vpack.c.bf16 %v10715_v44, %v10708_v37 }
0x2e36   :  { %19755 = vmatpush3.bf16.msra.mxu0 %v21974_v29  ;;  %v10710_v62 = vand.u32 4294901760, %v10709_v45  ;;  %23251 = vst [vmem:[#allocation35_spill] sm:$0xff] %v22600_v5 }
0x2e37   :  { %19756 = vmatprep.subr.bf16.mxu0 %v23224_v4 }
0x2e38   :  { %v22573_v31 = vpack.c.bf16 %v10717_v2, %v10710_v62 }
0x2e39   :  { %18334 = vmatmul.mubr.f32.vlgmr.msra.gmra.mrb[18].mxu0 %v9677_v20 }
0x2e3a   :  { %19758 = vmatpush3.bf16.msra.mxu0 %v22013_v22  ;;  %18344 = vmatprep.mubr.msk.f32.mxu0 %vm21077_vm0, %v23216_v7  ;;  %v10696_v22 = vsub.f32 %v10624_v56, %v22553_v60 }
0x2e3b   :  { %19759 = vmatprep.subr.bf16.mxu0 %v23224_v4 }
0x2e3e   :  { %19761 = vmatpush3.bf16.msra.mxu0 %v22018_v41  ;;  %v10697_v41 = vand.u32 4294901760, %v10696_v22 }
0x2e3f   :  { %19762 = vmatprep.subr.bf16.mxu0 %v23224_v4 }
0x2e41   :  { %18345 = vmatmul.mubr.f32.vlgmr.msra.gmra.mrb[18].mxu0 %v9675_v11 }
0x2e42   :  { %19764 = vmatpush3.bf16.msra.mxu0 %v21970_v19  ;;  %18355 = vmatprep.mubr.msk.f32.mxu0 %vm21077_vm0, %v23216_v7  ;;  %v10698_v19 = vsub.f32 %v10696_v22, %v10697_v41 }
0x2e43   :  { %19765 = vmatprep.subr.bf16.mxu0 %v23224_v4 }
0x2e46   :  { %19767 = vmatpush3.bf16.msra.mxu0 %v21974_v29  ;;  %v10699_v29 = vand.u32 4294901760, %v10698_v19 }
0x2e47   :  { %19786 = vmatprep.subr.bf16.mxu0 %v23224_v4 }
0x2e49   :  { %18356 = vmatmul.mubr.f32.vlgmr.msra.gmra.mrb[18].mxu0 %v9675_v11 }
0x2e4a   :  { %19788 = vmatpush3.bf16.msra.mxu0 %v22562_v40  ;;  %18408 = vmatprep.mubr.msk.f32.mxu0 %vm21077_vm0, %v23216_v7 }
0x2e4b   :  { %19789 = vmatprep.subr.bf16.mxu0 %v23224_v4 }
0x2e4e   :  { %19791 = vmatpush3.bf16.msra.mxu0 %v22566_v61 }
0x2e4f   :  { %19792 = vmatprep.subr.bf16.mxu0 %v23224_v4 }
0x2e51   :  { %18409 = vmatmul.mubr.f32.vlgmr.msra.gmra.mrb[20].mxu0 %v10699_v29  ;;  %v10142_v29 = vld [vmem:[#allocation15] sm:$0xff] }
0x2e52   :  { %19794 = vmatpush3.bf16.msra.mxu0 %v22573_v31  ;;  %18419 = vmatprep.mubr.msk.f32.mxu0 %vm21077_vm0, %v23216_v7  ;;  %v11634_v50 = vand.u32 4294901760, %v10142_v29 }
0x2e53   :  { %19795 = vmatprep.subr.bf16.mxu0 %v23224_v4 }
0x2e56   :  { %19797 = vmatpush3.bf16.msra.mxu0 %v22577_v51 }
0x2e57   :  { %19798 = vmatprep.subr.bf16.mxu0 %v23224_v4 }
0x2e59   :  { %18420 = vmatmul.mubr.f32.vlgmr.msra.gmra.mrb[20].mxu0 %v22553_v60 }
0x2e5a   :  { %19800 = vmatpush3.bf16.msra.mxu0 %v22583_v9  ;;  %18430 = vmatprep.mubr.msk.f32.mxu0 %vm21077_vm0, %v23216_v7 }
0x2e5b   :  { %19801 = vmatprep.subr.bf16.mxu0 %v23224_v4 }
0x2e5e   :  { %19803 = vmatpush3.bf16.msra.mxu0 %v22588_v28 }
0x2e5f   :  { %19804 = vmatprep.subr.bf16.mxu0 %v23224_v4 }
0x2e61   :  { %18431 = vmatmul.mubr.f32.vlgmr.msra.gmra.mrb[20].mxu0 %v10696_v22 }
0x2e62   :  { %19806 = vmatpush3.bf16.msra.mxu0 %v22562_v40  ;;  %18441 = vmatprep.mubr.msk.f32.mxu0 %vm21077_vm0, %v23216_v7 }
0x2e63   :  { %19807 = vmatprep.subr.bf16.mxu0 %v23224_v4 }
0x2e66   :  { %19809 = vmatpush3.bf16.msra.mxu0 %v22566_v61 }
0x2e67   :  { %19810 = vmatprep.subr.bf16.mxu0 %v23224_v4 }
0x2e69   :  { %18442 = vmatmul.mubr.f32.vlgmr.msra.gmra.mrb[20].mxu0 %v10697_v41 }
0x2e6a   :  { %19812 = vmatpush3.bf16.msra.mxu0 %v22600_v5  ;;  %18452 = vmatprep.mubr.msk.f32.mxu0 %vm21077_vm0, %v23216_v7 }
0x2e6b   :  { %19813 = vmatprep.subr.bf16.mxu0 %v23224_v4 }
0x2e6e   :  { %19815 = vmatpush3.bf16.msra.mxu0 %v22604_v10 }
0x2e6f   :  { %19816 = vmatprep.subr.bf16.mxu0 %v23224_v4 }
0x2e71   :  { %18453 = vmatmul.mubr.f32.vlgmr.msra.gmra.mrb[20].mxu0 %v22553_v60 }
0x2e72   :  { %19818 = vmatpush3.bf16.msra.mxu0 %v22562_v40  ;;  %18463 = vmatprep.mubr.msk.f32.mxu0 %vm21077_vm0, %v23216_v7 }
0x2e73   :  { %19819 = vmatprep.subr.bf16.mxu0 %v23224_v4 }
0x2e76   :  { %19821 = vmatpush3.bf16.msra.mxu0 %v22566_v61 }
0x2e77   :  { %19858 = vmatprep.subr.bf16.mxu0 %v23224_v4 }
0x2e79   :  { %18464 = vmatmul.mubr.f32.vlgmr.msra.gmra.mrb[20].mxu0 %v22553_v60 }
0x2e7a   :  { %18540 = vmatprep.mubr.msk.f32.mxu0 %vm21077_vm0, %v23216_v7 }
0x2ea7   :  { %v11597_v11 = vpop.f32.mrb[22].mxu1 }
0x2ea8   :  { %v20168_v12 = vadd.f32 %v11597_v11, %v22621_v55  ;;  %v18531_v20 = vpop.f32.mrb[23].mxu1  ;;  %v11637_v11 = vand.u32 4294901760, %v10143_v32 }
0x2ea9   :  { %v11714_v20 = vsub.f32 %v10142_v29, %v11634_v50  ;;  %v10146_v29 = vld [vmem:[#allocation17] sm:$0xff] }
0x2eaa   :  { %11609 = vrot.lane.b32.xlu1 %v20168_v12, %s21079_s18 }
0x2f1c   :  { %v10087_v6 = vpop.f32.mrb[18].mxu0  ;;  %v11610_v22 = vpop.permute.xlu1 %11609 }
0x2f1d   :  { %v10101_v35 = vadd.f32 %v20674_v15, %v10087_v6  ;;  %v18357_v53 = vpop.f32.mrb[19].mxu0  ;;  %v10092_v36 = vrot.slane %v10087_v6, 1  ;;  %v11721_v6 = vsub.f32 %v10143_v32, %v11637_v11  ;;  %v10144_v15 = vld [vmem:[#allocation15 + $0x10] sm:$0xff]  ;;  %v10147_v32 = vld [vmem:[#allocation17 + $0x8] sm:$0xff] }
0x2f1e   :  { %v11640_v53 = vand.u32 4294901760, %v10144_v15 }
0x2f1f   :  { %v10103_v56 = vrot.slane %v10101_v35, 1  ;;  %v10094_v37 = vadd.f32 %v10092_v36, %v22135_v3  ;;  %v10145_v35 = vld [vmem:[#allocation15 + $0x18] sm:$0xff] }
0x2f21   :  { %10104 = vrot.lane.b32.xlu0 %v10103_v56, %s21079_s18  ;;  %v16221_v44 = vmul.f32 -1.442695, %v10094_v37  ;;  %v11643_v56 = vand.u32 4294901760, %v10145_v35 }
0x2f4c   :  { %v11107_v16 = vpop.f32.mrb[20].mxu0 }
0x2f4d   :  { %v20167_v23 = vadd.f32 %v11107_v16, %v22629_v57  ;;  %v18465_v43 = vpop.f32.mrb[21].mxu0  ;;  %v11715_v16 = vand.u32 4294901760, %v11714_v20 }
0x2f4e   :  { %v11728_v43 = vsub.f32 %v10144_v15, %v11640_v53 }
0x2f4f   :  { %v11601_v60 = vadd.f32 %v20168_v12, %v20167_v23  ;;  %v22641_v12 = vpack.c.bf16 %v11637_v11, %v11634_v50  ;;  %v12124_v50 = vand.u32 4294901760, %v10146_v29  ;;  %v12127_v11 = vand.u32 4294901760, %v10147_v32 }
0x2f50   :  { %v11729_v36 = vand.u32 4294901760, %v11728_v43 }
0x2f51   :  { %v16226_v24 = vmul.f32 -1.442695, %v11601_v60  ;;  %19860 = vmatpush3.bf16.msra.mxu0 %v22641_v12  ;;  %v11735_v60 = vsub.f32 %v10145_v35, %v11643_v56  ;;  %v22667_v15 = vpack.c.bf16 %v12127_v11, %v12124_v50  ;;  %v12204_v35 = vsub.f32 %v10146_v29, %v12124_v50 }
0x2f52   :  { %19861 = vmatprep.subr.bf16.mxu0 %v23224_v4 }
0x2f53   :  { %20656 = vpow2.f32 %v16226_v24  ;;  %v11716_v24 = vsub.f32 %v11714_v20, %v11715_v16  ;;  %v11736_v37 = vand.u32 4294901760, %v11735_v60  ;;  %v22661_v48 = vpack.c.bf16 %v11735_v60, %v11728_v43  ;;  %19896 = vmatpush3.bf16.msra.mxu1 %v22667_v15 }
0x2f54   :  { %19897 = vmatprep.subr.bf16.mxu1 %v23224_v4 }
0x2f55   :  { %23255 = vst [vmem:[#allocation39_spill] sm:$0xff] %v22661_v48 }
0x2f5d   :  { %v20657_v14 = vpop.eup %20656 }
0x2f5e   :  { %v11605_v26 = vadd.f32 1.0, %v20657_v14 }
0x2f60   :  { %20658 = vrcp.f32 %v11605_v26 }
0x2f61   :  { %20660 = vpow2.f32 %v16221_v44 }
0x2f6a   :  { %v20659_v54 = vpop.eup %20658 }
0x2f6b   :  { %v11612_v27 = vmul.f32 %v20659_v54, %v11610_v22  ;;  %v20661_v41 = vpop.eup %20660  ;;  %v11619_v14 = vsub.f32 1.0, %v20659_v54  ;;  %v11626_v44 = vmul.f32 %v20659_v54, %v11111_v38  ;;  %v22665_v54 = vpack.c.bf16 %v11736_v37, %v11729_v36 }
0x2f6c   :  { %v10098_v45 = vadd.f32 1.0, %v20661_v41 }
0x2f6d   :  { %11614 = vrot.lane.b32.xlu1 %v11612_v27, %s21079_s18  ;;  %v11717_v27 = vand.u32 4294901760, %v11716_v24  ;;  %23257 = vst [vmem:[#allocation41_spill] sm:$0xff] %v22665_v54 }
0x2f6e   :  { %20662 = vrcp.f32 %v10098_v45 }
0x2f78   :  { %v22634_v52 = vpop.eup %20662 }
0x2f79   :  { %v10114_v24 = vsub.f32 1.0, %v22634_v52 }
0x2f93   :  { %v10105_v58 = vpop.permute.xlu0 %10104 }
0x2f94   :  { %v10107_v59 = vmul.f32 %v22634_v52, %v10105_v58  ;;  %v11730_v58 = vsub.f32 %v11728_v43, %v11729_v36  ;;  %v12205_v43 = vand.u32 4294901760, %v12204_v35 }
0x2f96   :  { %10109 = vrot.lane.b32.xlu0 %v10107_v59, %s21079_s18  ;;  %v11737_v59 = vsub.f32 %v11735_v60, %v11736_v37  ;;  %v12206_v37 = vsub.f32 %v12204_v35, %v12205_v43 }
0x2fdf   :  { %v11615_v19 = vpop.permute.xlu1 %11614 }
0x2fe0   :  { %v11617_v62 = vadd.f32 %v20167_v23, %v11615_v19  ;;  %v22645_v23 = vpack.c.bf16 %v11643_v56, %v11640_v53  ;;  %v12211_v53 = vsub.f32 %v10147_v32, %v12127_v11  ;;  %v10120_v56 = vrot.slane %v22492_v0, 7 }
0x2fe2   :  { %20664 = vtanh.f32 %v11617_v62  ;;  %19863 = vmatpush3.bf16.msra.mxu0 %v22645_v23  ;;  %v12212_v60 = vand.u32 4294901760, %v12211_v53 }
0x2fe3   :  { %19864 = vmatprep.subr.bf16.mxu0 %v23224_v4 }
0x2fec   :  { %v20665_v2 = vpop.eup %20664 }
0x2fed   :  { %11621 = vrot.lane.b32.xlu1 %v20665_v2, %s21080_s23  ;;  %v11731_v2 = vand.u32 4294901760, %v11730_v58 }
0x3008   :  { %v10110_v13 = vpop.permute.xlu0 %10109 }
0x3009   :  { %v10112_v3 = vadd.f32 %v22132_v1, %v10110_v13  ;;  %v11722_v1 = vand.u32 4294901760, %v11721_v6  ;;  %v11738_v13 = vand.u32 4294901760, %v11737_v59  ;;  %v12207_v59 = vand.u32 4294901760, %v12206_v37 }
0x300b   :  { %20666 = vtanh.f32 %v10112_v3  ;;  %v11723_v26 = vsub.f32 %v11721_v6, %v11722_v1  ;;  %v22657_v3 = vpack.c.bf16 %v11738_v13, %v11731_v2  ;;  %v22663_v38 = vpack.c.bf16 %v11722_v1, %v11715_v16 }
0x300d   :  { %v11724_v45 = vand.u32 4294901760, %v11723_v26  ;;  %23253 = vst [vmem:[#allocation37_spill] sm:$0xff] %v22657_v3  ;;  %23256 = vst [vmem:[#allocation40_spill] sm:$0xff] %v22663_v38 }
0x300f   :  { %v22653_v62 = vpack.c.bf16 %v11724_v45, %v11717_v27 }
0x3011   :  { %23252 = vst [vmem:[#allocation36_spill] sm:$0xff] %v22653_v62 }
0x3015   :  { %v20667_v63 = vpop.eup %20666 }
0x3016   :  { %10116 = vrot.lane.b32.xlu0 %v20667_v63, %s21080_s23  ;;  %v22659_v63 = vpack.c.bf16 %v11721_v6, %v11714_v20  ;;  %v10148_v20 = vld [vmem:[#allocation17 + $0x10] sm:$0xff]  ;;  %v10149_v6 = vld [vmem:[#allocation17 + $0x18] sm:$0xff] }
0x3017   :  { %v12130_v16 = vand.u32 4294901760, %v10148_v20  ;;  %v12133_v1 = vand.u32 4294901760, %v10149_v6 }
0x3018   :  { %23254 = vst [vmem:[#allocation38_spill] sm:$0xff] %v22659_v63 }
0x3019   :  { %v22674_v27 = vpack.c.bf16 %v12133_v1, %v12130_v16  ;;  %v12218_v36 = vsub.f32 %v10148_v20, %v12130_v16  ;;  %v12225_v0 = vsub.f32 %v10149_v6, %v12133_v1  ;;  %v22692_v6 = vpack.c.bf16 %v12212_v60, %v12205_v43 }
0x301b   :  { %19899 = vmatpush3.bf16.msra.mxu1 %v22674_v27  ;;  %v12219_v45 = vand.u32 4294901760, %v12218_v36  ;;  %v12226_v58 = vand.u32 4294901760, %v12225_v0  ;;  %v22690_v20 = vpack.c.bf16 %v12225_v0, %v12218_v36  ;;  %23258 = vst [vmem:[#allocation42_spill] sm:$0xff] %v22692_v6 }
0x301c   :  { %19900 = vmatprep.subr.bf16.mxu1 %v23224_v4 }
0x301d   :  { %v12220_v13 = vsub.f32 %v12218_v36, %v12219_v45  ;;  %v12227_v29 = vsub.f32 %v12225_v0, %v12226_v58  ;;  %v22694_v16 = vpack.c.bf16 %v12226_v58, %v12219_v45 }
0x301f   :  { %v12221_v50 = vand.u32 4294901760, %v12220_v13  ;;  %v12228_v11 = vand.u32 4294901760, %v12227_v29  ;;  %v22759_v13 = vld [vmem:[#allocation20] sm:$0x1] }
0x305f   :  { %v11622_v22 = vpop.permute.xlu1 %11621 }
0x3060   :  { %v11624_v41 = vmul.f32 %v11622_v22, %v11619_v14  ;;  %v10122_v14 = vmul.f32 %v22634_v52, %v10120_v56  ;;  %v22686_v56 = vpack.c.bf16 %v12228_v11, %v12221_v50 }
0x3062   :  { %v22651_v19 = vadd.f32 %v11626_v44, %v11624_v41   ;;  %v12213_v44 = vsub.f32 %v12211_v53, %v12212_v60 }
0x3064   :  { %11629 = vrot.lane.b32.xlu1 %v22651_v19, %s21080_s23  ;;  %v12214_v52 = vand.u32 4294901760, %v12213_v44 }
0x3066   :  { %v22681_v32 = vpack.c.bf16 %v12214_v52, %v12207_v59 }
0x3088   :  { %v10117_v26 = vpop.permute.xlu0 %10116 }
0x3089   :  { %v10119_v22 = vmul.f32 %v10117_v26, %v10114_v24  ;;  %v22688_v24 = vpack.c.bf16 %v12211_v53, %v12204_v35 }
0x308b   :  { %v22676_v41 = vadd.f32 %v10122_v14, %v10119_v22 }
0x308d   :  { %v12118_v2 = vrot.slane %v22676_v41, 7 }
0x308f   :  { %12119 = vrot.lane.b32.xlu0 %v12118_v2, %s21080_s23 }
0x30d6   :  { %v11630_v1 = vpop.permute.xlu1 %11629 }
0x30d7   :  { %v11631_v14 = vsel %vm716_vm3, %v11630_v1, 0  ;;  %v22763_v1 = vld [vmem:[#allocation18] sm:$0x1] }
0x30d8   :  { %v11702_v26 = vand.u32 4294901760, %v11631_v14  ;;  %23259 = vst [vmem:[#allocation43_spill] sm:$0xff] %v22763_v1 }
0x30da   :  { %v11703_v22 = vsub.f32 %v11631_v14, %v11702_v26 }
0x30dc   :  { %v11704_v37 = vand.u32 4294901760, %v11703_v22 }
0x30de   :  { %v11705_v44 = vsub.f32 %v11703_v22, %v11704_v37 }
0x30e0   :  { %v11706_v59 = vand.u32 4294901760, %v11705_v44 }
0x30e2   :  { %18541 = vmatmul.mubr.f32.vlgmr.msra.gmra.mrb[22].mxu0 %v11706_v59 }
0x30e3   :  { %19866 = vmatpush3.bf16.msra.mxu0 %v22653_v62  ;;  %18551 = vmatprep.mubr.msk.f32.mxu0 %vm21077_vm0, %v23216_v7 }
0x30e4   :  { %19867 = vmatprep.subr.bf16.mxu0 %v23224_v4 }
0x30e7   :  { %19869 = vmatpush3.bf16.msra.mxu0 %v22657_v3 }
0x30e8   :  { %19870 = vmatprep.subr.bf16.mxu0 %v23224_v4 }
0x30ea   :  { %18552 = vmatmul.mubr.f32.vlgmr.msra.gmra.mrb[22].mxu0 %v11702_v26 }
0x30eb   :  { %19872 = vmatpush3.bf16.msra.mxu0 %v22659_v63  ;;  %18562 = vmatprep.mubr.msk.f32.mxu0 %vm21077_vm0, %v23216_v7 }
0x30ec   :  { %19873 = vmatprep.subr.bf16.mxu0 %v23224_v4 }
0x30ef   :  { %19875 = vmatpush3.bf16.msra.mxu0 %v22661_v48 }
0x30f0   :  { %19876 = vmatprep.subr.bf16.mxu0 %v23224_v4 }
0x30f2   :  { %18563 = vmatmul.mubr.f32.vlgmr.msra.gmra.mrb[22].mxu0 %v11703_v22 }
0x30f3   :  { %19878 = vmatpush3.bf16.msra.mxu0 %v22641_v12  ;;  %18573 = vmatprep.mubr.msk.f32.mxu0 %vm21077_vm0, %v23216_v7 }
0x30f4   :  { %19879 = vmatprep.subr.bf16.mxu0 %v23224_v4 }
0x30f7   :  { %19881 = vmatpush3.bf16.msra.mxu0 %v22645_v23 }
0x30f8   :  { %19882 = vmatprep.subr.bf16.mxu0 %v23224_v4 }
0x30fa   :  { %18574 = vmatmul.mubr.f32.vlgmr.msra.gmra.mrb[22].mxu0 %v11704_v37 }
0x30fb   :  { %19884 = vmatpush3.bf16.msra.mxu0 %v22663_v38  ;;  %18584 = vmatprep.mubr.msk.f32.mxu0 %vm21077_vm0, %v23216_v7 }
0x30fc   :  { %19885 = vmatprep.subr.bf16.mxu0 %v23224_v4 }
0x30ff   :  { %19887 = vmatpush3.bf16.msra.mxu0 %v22665_v54 }
0x3100   :  { %19888 = vmatprep.subr.bf16.mxu0 %v23224_v4 }
0x3101   :  { %v12120_v35 = vpop.permute.xlu0 %12119 }
0x3102   :  { %v12121_v53 = vsel %vm716_vm3, %v12120_v35, 0  ;;  %18585 = vmatmul.mubr.f32.vlgmr.msra.gmra.mrb[22].mxu0 %v11702_v26 }
0x3103   :  { %v12192_v43 = vand.u32 4294901760, %v12121_v53  ;;  %19890 = vmatpush3.bf16.msra.mxu0 %v22641_v12  ;;  %18595 = vmatprep.mubr.msk.f32.mxu0 %vm21077_vm0, %v23216_v7 }
0x3104   :  { %19891 = vmatprep.subr.bf16.mxu0 %v23224_v4 }
0x3105   :  { %v12193_v60 = vsub.f32 %v12121_v53, %v12192_v43 }
0x3107   :  { %v12194_v36 = vand.u32 4294901760, %v12193_v60  ;;  %19893 = vmatpush3.bf16.msra.mxu0 %v22645_v23 }
0x3108   :  { %19930 = vmatprep.subr.bf16.mxu0 %v23224_v4 }
0x3109   :  { %v12195_v0 = vsub.f32 %v12193_v60, %v12194_v36 }
0x310a   :  { %18596 = vmatmul.mubr.f32.vlgmr.msra.gmra.mrb[22].mxu0 %v11702_v26 }
0x310b   :  { %v12196_v45 = vand.u32 4294901760, %v12195_v0  ;;  %18672 = vmatprep.mubr.msk.f32.mxu0 %vm21077_vm0, %v23216_v7  ;;  %v10152_v0 = vld [vmem:[%s23205_s19] sm:$0xff] }
0x310d   :  { %18607 = vmatmul.mubr.f32.vlgmr.msra.gmra.mrb[24].mxu1 %v12196_v45  ;;  %v10153_v45 = vld [vmem:[%s23205_s19 + $0x8] sm:$0xff] }
0x310e   :  { %19902 = vmatpush3.bf16.msra.mxu1 %v22681_v32  ;;  %18617 = vmatprep.mubr.msk.f32.mxu1 %vm21077_vm0, %v23216_v7 }
0x310f   :  { %19903 = vmatprep.subr.bf16.mxu1 %v23224_v4 }
0x3112   :  { %19905 = vmatpush3.bf16.msra.mxu1 %v22686_v56 }
0x3113   :  { %19906 = vmatprep.subr.bf16.mxu1 %v23224_v4 }
0x3115   :  { %18618 = vmatmul.mubr.f32.vlgmr.msra.gmra.mrb[24].mxu1 %v12192_v43 }
0x3116   :  { %19908 = vmatpush3.bf16.msra.mxu1 %v22688_v24  ;;  %18628 = vmatprep.mubr.msk.f32.mxu1 %vm21077_vm0, %v23216_v7 }
0x3117   :  { %19909 = vmatprep.subr.bf16.mxu1 %v23224_v4 }
0x311a   :  { %19911 = vmatpush3.bf16.msra.mxu1 %v22690_v20 }
0x311b   :  { %19912 = vmatprep.subr.bf16.mxu1 %v23224_v4 }
0x311d   :  { %18629 = vmatmul.mubr.f32.vlgmr.msra.gmra.mrb[24].mxu1 %v12193_v60 }
0x311e   :  { %19914 = vmatpush3.bf16.msra.mxu1 %v22667_v15  ;;  %18639 = vmatprep.mubr.msk.f32.mxu1 %vm21077_vm0, %v23216_v7 }
0x311f   :  { %19915 = vmatprep.subr.bf16.mxu1 %v23224_v4 }
0x3122   :  { %19917 = vmatpush3.bf16.msra.mxu1 %v22674_v27 }
0x3123   :  { %19918 = vmatprep.subr.bf16.mxu1 %v23224_v4 }
0x3125   :  { %18640 = vmatmul.mubr.f32.vlgmr.msra.gmra.mrb[24].mxu1 %v12194_v36 }
0x3126   :  { %19920 = vmatpush3.bf16.msra.mxu1 %v22692_v6  ;;  %18650 = vmatprep.mubr.msk.f32.mxu1 %vm21077_vm0, %v23216_v7 }
0x3127   :  { %19921 = vmatprep.subr.bf16.mxu1 %v23224_v4 }
0x312a   :  { %19923 = vmatpush3.bf16.msra.mxu1 %v22694_v16 }
0x312b   :  { %19924 = vmatprep.subr.bf16.mxu1 %v23224_v4 }
0x312d   :  { %18651 = vmatmul.mubr.f32.vlgmr.msra.gmra.mrb[24].mxu1 %v12192_v43 }
0x312e   :  { %19926 = vmatpush3.bf16.msra.mxu1 %v22667_v15  ;;  %18661 = vmatprep.mubr.msk.f32.mxu1 %vm21077_vm0, %v23216_v7 }
0x312f   :  { %19927 = vmatprep.subr.bf16.mxu1 %v23224_v4 }
0x3132   :  { %19929 = vmatpush3.bf16.msra.mxu1 %v22674_v27 }
0x3135   :  { %18662 = vmatmul.mubr.f32.vlgmr.msra.gmra.mrb[24].mxu1 %v12192_v43 }
0x31dd   :  { %v12114_v58 = vpop.f32.mrb[22].mxu0 }
0x31de   :  { %v18597_v52 = vpop.f32.mrb[23].mxu0  ;;  %v20169_v14 = vadd.f32 %v12114_v58, %v22763_v1  ;;  %v12641_v58 = vand.u32 4294901760, %v10152_v0 }
0x31df   :  { %v12644_v52 = vand.u32 4294901760, %v10153_v45 }
0x3208   :  { %v12604_v29 = vpop.f32.mrb[24].mxu1 }
0x3209   :  { %v20170_v50 = vadd.f32 %v12604_v29, %v22759_v13  ;;  %v18663_v11 = vpop.f32.mrb[25].mxu1  ;;  %v22774_v29 = vpack.c.bf16 %v12644_v52, %v12641_v58 }
0x320a   :  { %v12728_v11 = vsub.f32 %v10153_v45, %v12644_v52 }
0x320b   :  { %12616 = vrot.lane.b32.xlu0 %v20170_v50, %s21079_s18  ;;  %v12608_v26 = vadd.f32 %v20170_v50, %v20169_v14  ;;  %v12721_v50 = vsub.f32 %v10152_v0, %v12641_v58  ;;  %19932 = vmatpush3.bf16.msra.mxu0 %v22774_v29 }
0x320c   :  { %19933 = vmatprep.subr.bf16.mxu0 %v23224_v4 }
0x320d   :  { %v16227_v22 = vmul.f32 -1.442695, %v12608_v26  ;;  %v10155_v26 = vld [vmem:[%s23205_s19 + $0x18] sm:$0xff] }
0x320f   :  { %20668 = vpow2.f32 %v16227_v22 }
0x3219   :  { %v20669_v37 = vpop.eup %20668 }
0x321a   :  { %v12612_v44 = vadd.f32 1.0, %v20669_v37  ;;  %v12650_v37 = vand.u32 4294901760, %v10155_v26 }
0x321c   :  { %20670 = vrcp.f32 %v12612_v44  ;;  %v12722_v44 = vand.u32 4294901760, %v12721_v50 }
0x321e   :  { %v12723_v0 = vsub.f32 %v12721_v50, %v12722_v44 }
0x3220   :  { %v12724_v1 = vand.u32 4294901760, %v12723_v0 }
0x3226   :  { %v20671_v59 = vpop.eup %20670 }
0x3227   :  { %v12633_v45 = vmul.f32 %v20671_v59, %v12118_v2 }
0x327d   :  { %v12617_v35 = vpop.permute.xlu0 %12616 }
0x327e   :  { %v12619_v53 = vmul.f32 %v20671_v59, %v12617_v35  ;;  %v12729_v35 = vand.u32 4294901760, %v12728_v11 }
0x3280   :  { %12621 = vrot.lane.b32.xlu1 %v12619_v53, %s21079_s18  ;;  %v12626_v53 = vsub.f32 1.0, %v20671_v59  ;;  %v12730_v52 = vsub.f32 %v12728_v11, %v12729_v35  ;;  %v22802_v0 = vpack.c.bf16 %v12729_v35, %v12722_v44  ;;  %v23227_v44 = vcvt.s32.f32 %v21421_v21 }
0x3282   :  { %v12731_v48 = vand.u32 4294901760, %v12730_v52 }
0x32f2   :  { %v12622_v43 = vpop.permute.xlu1 %12621 }
0x32f3   :  { %v12624_v60 = vadd.f32 %v20169_v14, %v12622_v43  ;;  %v10154_v14 = vld [vmem:[%s23205_s19 + $0x10] sm:$0xff]  ;;  %s22859_s19 = smov 0  }
0x32f4   :  { %v12647_v22 = vand.u32 4294901760, %v10154_v14 }
0x32f5   :  { %20672 = vtanh.f32 %v12624_v60 }
0x32f6   :  { %v22784_v43 = vpack.c.bf16 %v12650_v37, %v12647_v22  ;;  %v12735_v60 = vsub.f32 %v10154_v14, %v12647_v22 }
0x32f8   :  { %19935 = vmatpush3.bf16.msra.mxu0 %v22784_v43  ;;  %v12736_v54 = vand.u32 4294901760, %v12735_v60 }
0x32f9   :  { %19936 = vmatprep.subr.bf16.mxu0 %v23224_v4 }
0x32fa   :  { %v12737_v3 = vsub.f32 %v12735_v60, %v12736_v54 }
0x32fc   :  { %v12738_v2 = vand.u32 4294901760, %v12737_v3  ;;  %v23260_v3 = vmov 0.0  }
0x32ff   :  { %v20673_v36 = vpop.eup %20672 }
0x3300   :  { %12628 = vrot.lane.b32.xlu0 %v20673_v36, %s21080_s23  ;;  %v12742_v36 = vsub.f32 %v10155_v26, %v12650_v37  ;;  %v22792_v26 = vpack.c.bf16 %v12731_v48, %v12724_v1  ;;  %v22798_v37 = vpack.c.bf16 %v12728_v11, %v12721_v50  ;;  %v23261_v50 = vmov 0.0|0.0  }
0x3302   :  { %v12743_v38 = vand.u32 4294901760, %v12742_v36 }
0x3304   :  { %v12744_v14 = vsub.f32 %v12742_v36, %v12743_v38 }
0x3306   :  { %v12745_v59 = vand.u32 4294901760, %v12744_v14 }
0x3308   :  { %v22796_v22 = vpack.c.bf16 %v12745_v59, %v12738_v2 }
0x3372   :  { %v12629_v58 = vpop.permute.xlu0 %12628 }
0x3373   :  { %v12631_v7 = vmul.f32 %v12629_v58, %v12626_v53  ;;  %v22800_v53 = vpack.c.bf16 %v12742_v36, %v12735_v60  ;;  %v22804_v58 = vpack.c.bf16 %v12743_v38, %v12736_v54 }
0x3375   :  { %v22790_v63 = vadd.f32 %v12633_v45, %v12631_v7  }
0x3377   :  { %12636 = vrot.lane.b32.xlu1 %v22790_v63, %s21080_s23 }
0x33e9   :  { %v12637_v7 = vpop.permute.xlu1 %12636 }
0x33ea   :  { %v12638_v45 = vsel %vm716_vm3, %v12637_v7, 0 }
0x33eb   :  { %v12709_v48 = vand.u32 4294901760, %v12638_v45 }
0x33ed   :  { %v12710_v1 = vsub.f32 %v12638_v45, %v12709_v48  ;;  %v22847_v45 = vmov 0  }
0x33ef   :  { %v12711_v52 = vand.u32 4294901760, %v12710_v1 }
0x33f1   :  { %v12712_v4 = vsub.f32 %v12710_v1, %v12711_v52 }
0x33f3   :  { %v12713_v62 = vand.u32 4294901760, %v12712_v4  ;;  %v22836_v4 = vld [vmem:[#allocation21] sm:$0x1] }
0x33f5   :  { %18673 = vmatmul.mubr.f32.vlgmr.msra.gmra.mrb[24].mxu0 %v12713_v62 }
0x33f6   :  { %19938 = vmatpush3.bf16.msra.mxu0 %v22792_v26  ;;  %18683 = vmatprep.mubr.msk.f32.mxu0 %vm21077_vm0, %v23260_v3 }
0x33f7   :  { %19939 = vmatprep.subr.bf16.mxu0 %v23261_v50 }
0x33fa   :  { %19941 = vmatpush3.bf16.msra.mxu0 %v22796_v22 }
0x33fb   :  { %19942 = vmatprep.subr.bf16.mxu0 %v23261_v50 }
0x33fd   :  { %18684 = vmatmul.mubr.f32.vlgmr.msra.gmra.mrb[24].mxu0 %v12709_v48 }
0x33fe   :  { %19944 = vmatpush3.bf16.msra.mxu0 %v22798_v37  ;;  %18694 = vmatprep.mubr.msk.f32.mxu0 %vm21077_vm0, %v23260_v3 }
0x33ff   :  { %19945 = vmatprep.subr.bf16.mxu0 %v23261_v50 }
0x3402   :  { %19947 = vmatpush3.bf16.msra.mxu0 %v22800_v53 }
0x3403   :  { %19948 = vmatprep.subr.bf16.mxu0 %v23261_v50 }
0x3405   :  { %18695 = vmatmul.mubr.f32.vlgmr.msra.gmra.mrb[24].mxu0 %v12710_v1 }
0x3406   :  { %19950 = vmatpush3.bf16.msra.mxu0 %v22774_v29  ;;  %18705 = vmatprep.mubr.msk.f32.mxu0 %vm21077_vm0, %v23260_v3 }
0x3407   :  { %19951 = vmatprep.subr.bf16.mxu0 %v23261_v50 }
0x340a   :  { %19953 = vmatpush3.bf16.msra.mxu0 %v22784_v43 }
0x340b   :  { %19954 = vmatprep.subr.bf16.mxu0 %v23261_v50 }
0x340d   :  { %18706 = vmatmul.mubr.f32.vlgmr.msra.gmra.mrb[24].mxu0 %v12711_v52 }
0x340e   :  { %19956 = vmatpush3.bf16.msra.mxu0 %v22802_v0  ;;  %18716 = vmatprep.mubr.msk.f32.mxu0 %vm21077_vm0, %v23260_v3 }
0x340f   :  { %19957 = vmatprep.subr.bf16.mxu0 %v23261_v50 }
0x3412   :  { %19959 = vmatpush3.bf16.msra.mxu0 %v22804_v58 }
0x3413   :  { %19960 = vmatprep.subr.bf16.mxu0 %v23261_v50 }
0x3415   :  { %18717 = vmatmul.mubr.f32.vlgmr.msra.gmra.mrb[24].mxu0 %v12709_v48 }
0x3416   :  { %19962 = vmatpush3.bf16.msra.mxu0 %v22774_v29  ;;  %18727 = vmatprep.mubr.msk.f32.mxu0 %vm21077_vm0, %v23260_v3 }
0x3417   :  { %19963 = vmatprep.subr.bf16.mxu0 %v23261_v50 }
0x341a   :  { %19965 = vmatpush3.bf16.msra.mxu0 %v22784_v43 }
0x341d   :  { %18728 = vmatmul.mubr.f32.vlgmr.msra.gmra.mrb[24].mxu0 %v12709_v48  ;;  %v22849_v48 = vmov 0  }
0x34f0   :  { %v13121_v62 = vpop.f32.mrb[24].mxu0 }
0x34f1   :  { %v20171_v38 = vadd.f32 %v13121_v62, %v22836_v4  ;;  %v18729_v54 = vpop.f32.mrb[25].mxu0 }
0x34f3   :  { %v13126_v11 = vsel %vm13125_vm13, %v20171_v38, -inf }
0x34f4   :  { %13127 = vmax.xlane.f32.xlu0 %v13126_v11 }
0x350a   :  { %10126 = vrot.lane.b32.xlu0 %v22676_v41, %s21080_s23 }
0x3581   :  { %v13128_v35 = vpop.xlane.xlu0 %13127 }
0x3582   :  { %vm13129_vm14 = vcmp.ge.f32.partialorder %v20171_v38, %v13128_v35 }
0x3583   :  { %v13130_v60 = vsel %vm13129_vm14, %v23227_v44, 16.0 }
0x3584   :  { %v13131_v36 = vsel %vm13125_vm13, %v13130_v60, inf }
0x3585   :  { %13132 = vmin.xlane.f32.xlu1 %v13131_v36  ;;  %v10127_v14 = vpop.permute.xlu0 %10126 }
0x3586   :  { %10129 = vst.msk [vmem:[#allocation24 - $0x6] sm:$0x80] %vm5431_vm11, %v10127_v14 }
0x3612   :  { %v13133_v2 = vpop.xlane.xlu1 %13132 }
0x3613   :  { %v20484_v59 = vtrunc.f32 %v13133_v2 }
0x3615   :  { %v20485_v7 = vcvt.f32.s32 %v20484_v59  }
0x3616 LB: > { %v23228_v41 = vmov 0.0|0.0   ;;  %vm21082_vm15 = vmmov 0   ;;  %v23230_v1 = vmov 0.0   ;;  %vm13146_vm0 = vcmp.eq.s32.totalorder %v21421_v21, %v21055_v7  ;;  %s21084_s18 = smov 96   ;;  %v23262_v5 = vld [vmem:[#allocation35_spill] sm:$0xff]  ;;  %s21085_s30 = smov 64   ;;  %s21059_s19 = sphi %s22859_s19, %s13140_s19   ;;  %v21055_v7 = vphi %v20485_v7, %v16129_v7   ;;  %v21051_v19 = vphi %v22651_v19, %v23048_v19   ;;  %v21047_v63 = vphi %v22790_v63, %v23097_v63   ;;  %v21043_v48 = vphi %v22849_v48, %v16135_v48   ;;  %v21039_v45 = vphi %v22847_v45, %v23274_v45  }
0x3617   : > { %19966 = vmatprep.subr.bf16.mxu0 %v23228_v41  ;;  %18734 = vmatprep.mubr.msk.f32.mxu0 %vm21082_vm15, %v23230_v1  ;;  %v16228_v52 = vsel %vm13146_vm0, 1.0, %v23230_v1  ;;  %v23265_v6 = vld [vmem:[#allocation42_spill] sm:$0xff]  ;;  %vm16120_vm2 = vcmp.gt.s32.totalorder %v21043_v48, 0  ;;  %vm21086_vm5 = vmmov 1   ;;  %s16126_s23 = scalar_lea.vmem %s23207_s21, %s21059_s19  ;;  %vm16127_vm8 = vcmask 0   ;;  %s13140_s19 = sadd.s32 1, %s21059_s19  }
0x3618   : > { %19968 = vmatpush3.bf16.msra.mxu0 %v22428_v34  ;;  %19990 = vmatprep.subr.bf16.mxu1 %v23228_v41  ;;  %v13150_v3 = vsel %vm237_vm1, %v16228_v52, 0  ;;  %vm16122_vm6 = vmxor %vm16120_vm2, %vm21086_vm5  ;;  %p13137_p12 = scmp.ge.s32.totalorder %s13140_s19, 50  }
0x3619   : > { %19969 = vmatprep.subr.bf16.mxu0 %v23228_v41  ;;  %14100 = vrot.lane.b32.xlu0 %v21051_v19, %s21084_s18  ;;  %v13220_v50 = vsub.f32 %v13150_v3, %v13150_v3  ;;  %s21088_s20 = smov (%p13137_p12), [#allocation23]   ;;  %s21089_s17 = smov (%p13137_p12), [#allocation24]  }
0x361a   : > { %19992 = vmatpush3.bf16.msra.mxu1 %v22573_v31  ;;  %18791 = vmatprep.mubr.msk.f32.mxu1 %vm21082_vm15, %v23230_v1  ;;  %s16148_s2 = sshll.u32 (%p13137_p12), %s21088_s20, 4  ;;  %s16158_s12 = sshll.u32 (%p13137_p12), %s21089_s17, 4  ;;  %s16149_s2 = int_to_ptr.vmem [resolvable:$true] %s16148_s2  ;;  %s16159_s12 = int_to_ptr.vmem [resolvable:$true] %s16158_s12 }
0x361b   : > { %19993 = vmatprep.subr.bf16.mxu1 %v23228_v41  ;;  %v13221_v62 = vand.u32 4294901760, %v13220_v50  ;;  %s20951_s1 = scalar_lea.vmem (%p13137_p12), %s16149_s2, 16  ;;  %s20955_s11 = scalar_lea.vmem (%p13137_p12), %s16149_s2, 32 }
0x361c   :  { %p20952_p13 = scmp.ne.s32.totalorder (%p13137_p12), %s16149_s2, %s20951_s1  ;;  %p20956_p0 = scmp.lt.s32.totalorder (%p13137_p12), %s16149_s2, %s16149_s2 }
0x361d   : > { %v13222_v38 = vsub.f32 %v13220_v50, %v13221_v62  ;;  %p20957_p1 = scmp.lt.s32.totalorder (%p13137_p12), %s20955_s11, %s20951_s1 }
0x361e   : > { %19995 = vmatpush3.bf16.msra.mxu1 %v22577_v51 }
0x361f   : > { %19996 = vmatprep.subr.bf16.mxu1 %v23228_v41  ;;  %v13223_v54 = vand.u32 4294901760, %v13222_v38  ;;  %p20958_p2 = por (%p13137_p12), %p20957_p1, %p20956_p0 }
0x3621   : > { %18735 = vmatmul.mubr.f32.vlgmr.msra.gmra.mrb[0].mxu0 %v13223_v54  ;;  %p20959_p3 = pnand (%p13137_p12), %p20958_p2, %p20952_p13 }
0x3622   : > { %19971 = vmatpush3.bf16.msra.mxu0 %v22434_v18  ;;  %18741 = vmatprep.mubr.msk.f32.mxu0 %vm21082_vm15, %v23230_v1 }
0x3623   : > { %19972 = vmatprep.subr.bf16.mxu0 %v23228_v41 }
0x3629   : > { %18742 = vmatmul.mubr.msk.f32.vlgmr.msra.gmra.mrb[0].mxu0 %vm237_vm1, %v16228_v52 }
0x362a   : > { %19974 = vmatpush3.bf16.msra.mxu0 %v22438_v25  ;;  %18748 = vmatprep.mubr.msk.f32.mxu0 %vm21082_vm15, %v23230_v1 }
0x362b   : > { %19975 = vmatprep.subr.bf16.mxu0 %v23228_v41 }
0x3631   : > { %18749 = vmatmul.mubr.f32.vlgmr.msra.gmra.mrb[0].mxu0 %v13220_v50 }
0x3632   : > { %19977 = vmatpush3.bf16.msra.mxu0 %v22428_v34  ;;  %18755 = vmatprep.mubr.msk.f32.mxu0 %vm21082_vm15, %v23230_v1 }
0x3633   : > { %19978 = vmatprep.subr.bf16.mxu0 %v23228_v41 }
0x3639   : > { %18756 = vmatmul.mubr.f32.vlgmr.msra.gmra.mrb[0].mxu0 %v13221_v62 }
0x363a   : > { %19980 = vmatpush3.bf16.msra.mxu0 %v22449_v30  ;;  %18762 = vmatprep.mubr.msk.f32.mxu0 %vm21082_vm15, %v23230_v1 }
0x363b   : > { %19981 = vmatprep.subr.bf16.mxu0 %v23228_v41 }
0x3641   : > { %18763 = vmatmul.mubr.msk.f32.vlgmr.msra.gmra.mrb[0].mxu0 %vm237_vm1, %v16228_v52 }
0x3642   : > { %19983 = vmatpush3.bf16.msra.mxu0 %v22428_v34  ;;  %18769 = vmatprep.mubr.msk.f32.mxu0 %vm21082_vm15, %v23230_v1 }
0x3643   : > { %19984 = vmatprep.subr.bf16.mxu0 %v23228_v41 }
0x3649   : > { %18770 = vmatmul.mubr.msk.f32.vlgmr.msra.gmra.mrb[0].mxu0 %vm237_vm1, %v16228_v52 }
0x364a   : > { %19986 = vmatpush3.bf16.msra.mxu0 %v22562_v40  ;;  %18780 = vmatprep.mubr.msk.f32.mxu0 %vm21082_vm15, %v23230_v1 }
0x364b   : > { %19987 = vmatprep.subr.bf16.mxu0 %v23228_v41 }
0x364e   : > { %19989 = vmatpush3.bf16.msra.mxu0 %v22566_v61 }
0x364f   : > { %20020 = vmatprep.subr.bf16.mxu0 %v23228_v41 }
0x368b   : > { %v14101_v11 = vpop.permute.xlu0 %14100 }
0x368c   : > { %v14102_v35 = vsel %vm716_vm3, %v14101_v11, 0 }
0x368d   : > { %v22928_v59 = vand.u32 4294901760, %v14102_v35 }
0x368f   : > { %v14174_v50 = vsub.f32 %v14102_v35, %v22928_v59 }
0x3691   : > { %v14175_v54 = vand.u32 4294901760, %v14174_v50 }
0x3693   : > { %v14176_v11 = vsub.f32 %v14174_v50, %v14175_v54 }
0x3695   : > { %v14177_v35 = vand.u32 4294901760, %v14176_v11 }
0x371c   : > { %v13607_v60 = vpop.f32.mrb[0].mxu0 }
0x371d   : > { %v13612_v36 = vsel %vm716_vm3, %v13607_v60, 0  ;;  %v18771_v14 = vpop.f32.mrb[1].mxu0 }
0x371e   : > { %v13683_v2 = vand.u32 4294901760, %v13612_v36 }
0x3720   : > { %v13684_v52 = vsub.f32 %v13612_v36, %v13683_v2  ;;  %18792 = vmatmul.mubr.f32.vlgmr.msra.gmra.mrb[0].mxu1 %v13683_v2 }
0x3721   : > { %19998 = vmatpush3.bf16.msra.mxu1 %v22583_v9  ;;  %18802 = vmatprep.mubr.msk.f32.mxu1 %vm21082_vm15, %v23230_v1 }
0x3722   : > { %v13685_v3 = vand.u32 4294901760, %v13684_v52  ;;  %19999 = vmatprep.subr.bf16.mxu1 %v23228_v41 }
0x3724   : > { %v13686_v62 = vsub.f32 %v13684_v52, %v13685_v3 }
0x3725   : > { %20001 = vmatpush3.bf16.msra.mxu1 %v22588_v28 }
0x3726   : > { %v13687_v38 = vand.u32 4294901760, %v13686_v62  ;;  %20002 = vmatprep.subr.bf16.mxu1 %v23228_v41 }
0x3728   : > { %18781 = vmatmul.mubr.f32.vlgmr.msra.gmra.mrb[2].mxu0 %v13687_v38  ;;  %18803 = vmatmul.mubr.f32.vlgmr.msra.gmra.mrb[0].mxu1 %v13684_v52 }
0x3729   : > { %20022 = vmatpush3.bf16.msra.mxu0 %v22464_v8  ;;  %20004 = vmatpush3.bf16.msra.mxu1 %v22562_v40 }
0x372a   : > { %20023 = vmatprep.subr.bf16.mxu0 %v23228_v41  ;;  %20005 = vmatprep.subr.bf16.mxu1 %v23228_v41 }
0x372b   : > { %18846 = vmatprep.mubr.msk.f32.mxu0 %vm21082_vm15, %v23230_v1  ;;  %18813 = vmatprep.mubr.msk.f32.mxu1 %vm21082_vm15, %v23230_v1 }
0x372d   : > { %20025 = vmatpush3.bf16.msra.mxu0 %v22468_v17  ;;  %20007 = vmatpush3.bf16.msra.mxu1 %v22566_v61 }
0x372e   : > { %20026 = vmatprep.subr.bf16.mxu0 %v23228_v41  ;;  %20008 = vmatprep.subr.bf16.mxu1 %v23228_v41 }
0x3730   : > { %18847 = vmatmul.mubr.f32.vlgmr.msra.gmra.mrb[4].mxu0 %v14177_v35  ;;  %18814 = vmatmul.mubr.f32.vlgmr.msra.gmra.mrb[0].mxu1 %v13685_v3 }
0x3731   : > { %20028 = vmatpush3.bf16.msra.mxu0 %v22474_v39  ;;  %20010 = vmatpush3.bf16.msra.mxu1 %v23262_v5 }
0x3732   : > { %20029 = vmatprep.subr.bf16.mxu0 %v23228_v41  ;;  %20011 = vmatprep.subr.bf16.mxu1 %v23228_v41 }
0x3733   : > { %18857 = vmatprep.mubr.msk.f32.mxu0 %vm21082_vm15, %v23230_v1  ;;  %18824 = vmatprep.mubr.msk.f32.mxu1 %vm21082_vm15, %v23230_v1 }
0x3735   : > { %20031 = vmatpush3.bf16.msra.mxu0 %v22479_v46  ;;  %20013 = vmatpush3.bf16.msra.mxu1 %v22604_v10 }
0x3736   : > { %20032 = vmatprep.subr.bf16.mxu0 %v23228_v41  ;;  %20014 = vmatprep.subr.bf16.mxu1 %v23228_v41 }
0x3738   : > { %18858 = vmatmul.mubr.f32.vlgmr.msra.gmra.mrb[4].mxu0 %v22928_v59  ;;  %18825 = vmatmul.mubr.f32.vlgmr.msra.gmra.mrb[0].mxu1 %v13683_v2 }
0x3739   : > { %20034 = vmatpush3.bf16.msra.mxu0 %v22481_v33  ;;  %20016 = vmatpush3.bf16.msra.mxu1 %v22562_v40 }
0x373a   : > { %20035 = vmatprep.subr.bf16.mxu0 %v23228_v41  ;;  %20017 = vmatprep.subr.bf16.mxu1 %v23228_v41 }
0x373b   : > { %18868 = vmatprep.mubr.msk.f32.mxu0 %vm21082_vm15, %v23230_v1  ;;  %18835 = vmatprep.mubr.msk.f32.mxu1 %vm21082_vm15, %v23230_v1 }
0x373d   : > { %20037 = vmatpush3.bf16.msra.mxu0 %v22483_v42  ;;  %20019 = vmatpush3.bf16.msra.mxu1 %v22566_v61 }
0x373e   : > { %20038 = vmatprep.subr.bf16.mxu0 %v23228_v41  ;;  %20056 = vmatprep.subr.bf16.mxu1 %v23228_v41 }
0x3740   : > { %18869 = vmatmul.mubr.f32.vlgmr.msra.gmra.mrb[4].mxu0 %v14174_v50  ;;  %18836 = vmatmul.mubr.f32.vlgmr.msra.gmra.mrb[0].mxu1 %v13683_v2 }
0x3741   : > { %20040 = vmatpush3.bf16.msra.mxu0 %v22464_v8  ;;  %18879 = vmatprep.mubr.msk.f32.mxu0 %vm21082_vm15, %v23230_v1 }
0x3742   : > { %20041 = vmatprep.subr.bf16.mxu0 %v23228_v41  ;;  %20058 = vmatpush3.bf16.msra.mxu1 %v22641_v12 }
0x3743   : > { %20059 = vmatprep.subr.bf16.mxu1 %v23228_v41  ;;  %18912 = vmatprep.mubr.msk.f32.mxu1 %vm21082_vm15, %v23230_v1 }
0x3745   : > { %20043 = vmatpush3.bf16.msra.mxu0 %v22468_v17 }
0x3746   : > { %20044 = vmatprep.subr.bf16.mxu0 %v23228_v41  ;;  %20061 = vmatpush3.bf16.msra.mxu1 %v22645_v23 }
0x3747   : > { %20062 = vmatprep.subr.bf16.mxu1 %v23228_v41 }
0x3748   : > { %18880 = vmatmul.mubr.f32.vlgmr.msra.gmra.mrb[4].mxu0 %v14175_v54 }
0x3749   : > { %20046 = vmatpush3.bf16.msra.mxu0 %v22485_v47  ;;  %18890 = vmatprep.mubr.msk.f32.mxu0 %vm21082_vm15, %v23230_v1 }
0x374a   : > { %20047 = vmatprep.subr.bf16.mxu0 %v23228_v41 }
0x374d   : > { %20049 = vmatpush3.bf16.msra.mxu0 %v22487_v49 }
0x374e   : > { %20050 = vmatprep.subr.bf16.mxu0 %v23228_v41 }
0x3750   : > { %18891 = vmatmul.mubr.f32.vlgmr.msra.gmra.mrb[4].mxu0 %v22928_v59 }
0x3751   : > { %20052 = vmatpush3.bf16.msra.mxu0 %v22464_v8  ;;  %18901 = vmatprep.mubr.msk.f32.mxu0 %vm21082_vm15, %v23230_v1 }
0x3752   : > { %20053 = vmatprep.subr.bf16.mxu0 %v23228_v41 }
0x3755   : > { %20055 = vmatpush3.bf16.msra.mxu0 %v22468_v17 }
0x3756   : > { %20092 = vmatprep.subr.bf16.mxu0 %v23228_v41 }
0x3758   : > { %18902 = vmatmul.mubr.f32.vlgmr.msra.gmra.mrb[4].mxu0 %v22928_v59 }
0x3759   : > { %20094 = vmatpush3.bf16.msra.mxu0 %v22667_v15  ;;  %18978 = vmatprep.mubr.msk.f32.mxu0 %vm21082_vm15, %v23230_v1 }
0x375a   : > { %20095 = vmatprep.subr.bf16.mxu0 %v23228_v41 }
0x375d   : > { %20097 = vmatpush3.bf16.msra.mxu0 %v22674_v27 }
0x375e   : > { %20098 = vmatprep.subr.bf16.mxu0 %v23228_v41 }
0x37fb   : > { %v13689_v60 = vpop.f32.mrb[2].mxu0 }
0x37fc   : > { %v18782_v36 = vpop.f32.mrb[3].mxu0  ;;  %v13690_v14 = vadd.f32 %v13689_v60, %v22629_v57 }
0x3813   : > { %v14095_v2 = vpop.f32.mrb[0].mxu1 }
0x3814   : > { %v20421_v52 = vadd.f32 %v14095_v2, %v13690_v14  ;;  %v18837_v3 = vpop.f32.mrb[1].mxu1 }
0x382b   : > { %v14585_v50 = vpop.f32.mrb[4].mxu0 }
0x382c   : > { %v20422_v59 = vadd.f32 %v14585_v50, %v22621_v55  ;;  %v18903_v62 = vpop.f32.mrb[5].mxu0 }
0x382e   : > { %14597 = vrot.lane.b32.xlu0 %v20422_v59, %s21085_s30  ;;  %v14589_v38 = vadd.f32 %v20422_v59, %v20421_v52  ;;  %v23263_v59 = vmov 0.0  }
0x3830   : > { %v16232_v54 = vmul.f32 -1.442695, %v14589_v38  ;;  %v23264_v38 = vmov 0.0|0.0  }
0x3832   : > { %15106 = vrot.lane.b32.xlu0 %v21047_v63, %s21084_s18  ;;  %20675 = vpow2.f32 %v16232_v54 }
0x383c   : > { %v20676_v11 = vpop.eup %20675 }
0x383d   : > { %v14593_v35 = vadd.f32 1.0, %v20676_v11 }
0x383f   : > { %20677 = vrcp.f32 %v14593_v35 }
0x3849   : > { %v20678_v60 = vpop.eup %20677 }
0x384a   : > { %v14607_v54 = vsub.f32 1.0, %v20678_v60  ;;  %v14613_v35 = vmul.f32 %v21051_v19, %v20678_v60 }
0x38a0   : > { %v14598_v36 = vpop.permute.xlu0 %14597 }
0x38a1   : > { %v14600_v14 = vmul.f32 %v20678_v60, %v14598_v36 }
0x38a3   : > { %14602 = vrot.lane.b32.xlu1 %v14600_v14, %s21085_s30 }
0x38a4   : > { %v15107_v2 = vpop.permute.xlu0 %15106 }
0x38a5   : > { %v15108_v3 = vsel %vm716_vm3, %v15107_v2, 0 }
0x38a6   : > { %v15179_v50 = vand.u32 4294901760, %v15108_v3 }
0x38a8   : > { %v15180_v62 = vsub.f32 %v15108_v3, %v15179_v50 }
0x38aa   : > { %v15181_v44 = vand.u32 4294901760, %v15180_v62 }
0x38ac   : > { %v15182_v41 = vsub.f32 %v15180_v62, %v15181_v44 }
0x38ae   : > { %v15183_v1 = vand.u32 4294901760, %v15182_v41 }
0x38b0   : > { %18979 = vmatmul.mubr.f32.vlgmr.msra.gmra.mrb[6].mxu0 %v15183_v1 }
0x38b1   : > { %20100 = vmatpush3.bf16.msra.mxu0 %v22681_v32  ;;  %18989 = vmatprep.mubr.msk.f32.mxu0 %vm21082_vm15, %v23263_v59 }
0x38b2   : > { %20101 = vmatprep.subr.bf16.mxu0 %v23264_v38 }
0x38b5   : > { %20103 = vmatpush3.bf16.msra.mxu0 %v22686_v56 }
0x38b6   : > { %20104 = vmatprep.subr.bf16.mxu0 %v23264_v38 }
0x38b8   : > { %18990 = vmatmul.mubr.f32.vlgmr.msra.gmra.mrb[6].mxu0 %v15179_v50 }
0x38b9   : > { %20106 = vmatpush3.bf16.msra.mxu0 %v22688_v24  ;;  %19000 = vmatprep.mubr.msk.f32.mxu0 %vm21082_vm15, %v23263_v59 }
0x38ba   : > { %20107 = vmatprep.subr.bf16.mxu0 %v23264_v38 }
0x38bd   : > { %20109 = vmatpush3.bf16.msra.mxu0 %v22690_v20 }
0x38be   : > { %20110 = vmatprep.subr.bf16.mxu0 %v23264_v38 }
0x38c0   : > { %19001 = vmatmul.mubr.f32.vlgmr.msra.gmra.mrb[6].mxu0 %v15180_v62 }
0x38c1   : > { %20112 = vmatpush3.bf16.msra.mxu0 %v22667_v15  ;;  %19011 = vmatprep.mubr.msk.f32.mxu0 %vm21082_vm15, %v23263_v59 }
0x38c2   : > { %20113 = vmatprep.subr.bf16.mxu0 %v23264_v38 }
0x38c5   : > { %20115 = vmatpush3.bf16.msra.mxu0 %v22674_v27 }
0x38c6   : > { %20116 = vmatprep.subr.bf16.mxu0 %v23264_v38 }
0x38c8   : > { %19012 = vmatmul.mubr.f32.vlgmr.msra.gmra.mrb[6].mxu0 %v15181_v44 }
0x38c9   : > { %20118 = vmatpush3.bf16.msra.mxu0 %v23265_v6  ;;  %19022 = vmatprep.mubr.msk.f32.mxu0 %vm21082_vm15, %v23263_v59 }
0x38ca   : > { %20119 = vmatprep.subr.bf16.mxu0 %v23264_v38 }
0x38cd   : > { %20121 = vmatpush3.bf16.msra.mxu0 %v22694_v16 }
0x38ce   : > { %20122 = vmatprep.subr.bf16.mxu0 %v23264_v38 }
0x38d0   : > { %19023 = vmatmul.mubr.f32.vlgmr.msra.gmra.mrb[6].mxu0 %v15179_v50 }
0x38d1   : > { %20124 = vmatpush3.bf16.msra.mxu0 %v22667_v15  ;;  %19033 = vmatprep.mubr.msk.f32.mxu0 %vm21082_vm15, %v23263_v59 }
0x38d2   : > { %20125 = vmatprep.subr.bf16.mxu0 %v23264_v38 }
0x38d5   : > { %20127 = vmatpush3.bf16.msra.mxu0 %v22674_v27 }
0x38d8   : > { %19034 = vmatmul.mubr.f32.vlgmr.msra.gmra.mrb[6].mxu0 %v15179_v50 }
0x3915   : > { %v14603_v44 = vpop.permute.xlu1 %14602 }
0x3916   : > { %v14605_v41 = vadd.f32 %v20421_v52, %v14603_v44 }
0x3918   : > { %20679 = vtanh.f32 %v14605_v41 }
0x3922   : > { %v20680_v1 = vpop.eup %20679 }
0x3923   : > { %14609 = vrot.lane.b32.xlu1 %v20680_v1, %s21084_s18 }
0x3995   : > { %v14610_v11 = vpop.permute.xlu1 %14609 }
0x3996   : > { %v14612_v36 = vmul.f32 %v14610_v11, %v14607_v54  ;;  %v23266_v11 = vld [vmem:[#allocation36_spill] sm:$0xff] }
0x3998   : > { %v14614_v14 = vadd.f32 %v14613_v35, %v14612_v36  ;;  %v23267_v35 = vld [vmem:[#allocation37_spill] sm:$0xff]  ;;  %v23268_v36 = vld [vmem:[#allocation38_spill] sm:$0xff] }
0x399a   : > { %v23048_v19 = vsel %vm16120_vm2, %v21051_v19, %v14614_v14   ;;  %14616 = vrot.lane.b32.xlu1 %v14614_v14, %s21084_s18  ;;  %v23269_v14 = vld [vmem:[#allocation39_spill] sm:$0xff] }
0x39ab   : > { %v15591_v52 = vpop.f32.mrb[6].mxu0 }
0x39ac   : > { %v20424_v2 = vadd.f32 %v15591_v52, %v22759_v13  ;;  %v19035_v3 = vpop.f32.mrb[7].mxu0  ;;  %v23270_v52 = vld [vmem:[#allocation40_spill] sm:$0xff] }
0x39ad   : > { %v23271_v3 = vld [vmem:[#allocation41_spill] sm:$0xff] }
0x39ae   : > { %15603 = vrot.lane.b32.xlu0 %v20424_v2, %s21085_s30 }
0x3a0c   : > { %v14617_v50 = vpop.permute.xlu1 %14616 }
0x3a0d   : > { %v14618_v60 = vsel %vm716_vm3, %v14617_v50, 0 }
0x3a0e   : > { %v14689_v62 = vand.u32 4294901760, %v14618_v60 }
0x3a10   : > { %v14690_v44 = vsub.f32 %v14618_v60, %v14689_v62  ;;  %v23272_v60 = vld [vmem:[#allocation43_spill] sm:$0xff] }
0x3a12   : > { %v14691_v41 = vand.u32 4294901760, %v14690_v44 }
0x3a14   : > { %v14692_v1 = vsub.f32 %v14690_v44, %v14691_v41 }
0x3a16   : > { %v14693_v54 = vand.u32 4294901760, %v14692_v1 }
0x3a18   : > { %18913 = vmatmul.mubr.f32.vlgmr.msra.gmra.mrb[2].mxu1 %v14693_v54 }
0x3a19   : > { %20064 = vmatpush3.bf16.msra.mxu1 %v23266_v11  ;;  %18923 = vmatprep.mubr.msk.f32.mxu1 %vm21082_vm15, %v23263_v59 }
0x3a1a   : > { %20065 = vmatprep.subr.bf16.mxu1 %v23264_v38 }
0x3a1d   : > { %20067 = vmatpush3.bf16.msra.mxu1 %v23267_v35 }
0x3a1e   : > { %20068 = vmatprep.subr.bf16.mxu1 %v23264_v38 }
0x3a20   : > { %18924 = vmatmul.mubr.f32.vlgmr.msra.gmra.mrb[2].mxu1 %v14689_v62 }
0x3a21   : > { %20070 = vmatpush3.bf16.msra.mxu1 %v23268_v36  ;;  %18934 = vmatprep.mubr.msk.f32.mxu1 %vm21082_vm15, %v23263_v59  ;;  %v15604_v36 = vpop.permute.xlu0 %15603 }
0x3a22   : > { %20071 = vmatprep.subr.bf16.mxu1 %v23264_v38 }
0x3a25   : > { %20073 = vmatpush3.bf16.msra.mxu1 %v23269_v14 }
0x3a26   : > { %20074 = vmatprep.subr.bf16.mxu1 %v23264_v38 }
0x3a28   : > { %18935 = vmatmul.mubr.f32.vlgmr.msra.gmra.mrb[2].mxu1 %v14690_v44 }
0x3a29   : > { %20076 = vmatpush3.bf16.msra.mxu1 %v22641_v12  ;;  %18945 = vmatprep.mubr.msk.f32.mxu1 %vm21082_vm15, %v23263_v59 }
0x3a2a   : > { %20077 = vmatprep.subr.bf16.mxu1 %v23264_v38 }
0x3a2d   : > { %20079 = vmatpush3.bf16.msra.mxu1 %v22645_v23 }
0x3a2e   : > { %20080 = vmatprep.subr.bf16.mxu1 %v23264_v38 }
0x3a30   : > { %18946 = vmatmul.mubr.f32.vlgmr.msra.gmra.mrb[2].mxu1 %v14691_v41 }
0x3a31   : > { %20082 = vmatpush3.bf16.msra.mxu1 %v23270_v52  ;;  %18956 = vmatprep.mubr.msk.f32.mxu1 %vm21082_vm15, %v23263_v59 }
0x3a32   : > { %20083 = vmatprep.subr.bf16.mxu1 %v23264_v38 }
0x3a35   : > { %20085 = vmatpush3.bf16.msra.mxu1 %v23271_v3 }
0x3a36   : > { %20086 = vmatprep.subr.bf16.mxu1 %v23264_v38 }
0x3a38   : > { %18957 = vmatmul.mubr.f32.vlgmr.msra.gmra.mrb[2].mxu1 %v14689_v62 }
0x3a39   : > { %20088 = vmatpush3.bf16.msra.mxu1 %v22641_v12  ;;  %18967 = vmatprep.mubr.msk.f32.mxu1 %vm21082_vm15, %v23263_v59 }
0x3a3a   : > { %20089 = vmatprep.subr.bf16.mxu1 %v23264_v38 }
0x3a3d   : > { %20091 = vmatpush3.bf16.msra.mxu1 %v22645_v23 }
0x3a3e   : > { %20128 = vmatprep.subr.bf16.mxu1 %v23264_v38 }
0x3a40   : > { %18968 = vmatmul.mubr.f32.vlgmr.msra.gmra.mrb[2].mxu1 %v14689_v62 }
0x3a41   : > { %20130 = vmatpush3.bf16.msra.mxu1 %v22774_v29  ;;  %19044 = vmatprep.mubr.msk.f32.mxu1 %vm21082_vm15, %v23263_v59 }
0x3a42   : > { %20131 = vmatprep.subr.bf16.mxu1 %v23264_v38 }
0x3a45   : > { %20133 = vmatpush3.bf16.msra.mxu1 %v22784_v43 }
0x3a46   : > { %20134 = vmatprep.subr.bf16.mxu1 %v23264_v38 }
0x3b13   : > { %v15101_v50 = vpop.f32.mrb[2].mxu1 }
0x3b14   : > { %v20423_v44 = vadd.f32 %v15101_v50, %v23272_v60  ;;  %v18969_v41 = vpop.f32.mrb[3].mxu1 }
0x3b16   : > { %v15595_v1 = vadd.f32 %v20424_v2, %v20423_v44 }
0x3b18   : > { %v16233_v54 = vmul.f32 -1.442695, %v15595_v1 }
0x3b1a   : > { %20681 = vpow2.f32 %v16233_v54 }
0x3b24   : > { %v20682_v11 = vpop.eup %20681 }
0x3b25   : > { %v15599_v62 = vadd.f32 1.0, %v20682_v11 }
0x3b27   : > { %20683 = vrcp.f32 %v15599_v62 }
0x3b31   : > { %v20684_v35 = vpop.eup %20683 }
0x3b32   : > { %v15606_v14 = vmul.f32 %v20684_v35, %v15604_v36  ;;  %v15613_v6 = vsub.f32 1.0, %v20684_v35  ;;  %v15619_v2 = vmul.f32 %v21047_v63, %v20684_v35 }
0x3b34   : > { %15608 = vrot.lane.b32.xlu1 %v15606_v14, %s21085_s30 }
0x3ba6   : > { %v15609_v52 = vpop.permute.xlu1 %15608 }
0x3ba7   : > { %v15611_v3 = vadd.f32 %v20423_v44, %v15609_v52 }
0x3ba9   : > { %20685 = vtanh.f32 %v15611_v3 }
0x3bb3   : > { %v20686_v5 = vpop.eup %20685 }
0x3bb4   : > { %15615 = vrot.lane.b32.xlu0 %v20686_v5, %s21084_s18 }
0x3c26   : > { %v15616_v50 = vpop.permute.xlu0 %15615 }
0x3c27   : > { %v15618_v60 = vmul.f32 %v15616_v50, %v15613_v6  ;;  %v23273_v50 = vcvt.s32.f32 %v21421_v21 }
0x3c29   : > { %v15620_v41 = vadd.f32 %v15619_v2, %v15618_v60 }
0x3c2b   : > { %v23097_v63 = vsel %vm16120_vm2, %v21047_v63, %v15620_v41   ;;  %15622 = vrot.lane.b32.xlu1 %v15620_v41, %s21084_s18 }
0x3c9d   : > { %v15623_v1 = vpop.permute.xlu1 %15622 }
0x3c9e   : > { %v15624_v44 = vsel %vm716_vm3, %v15623_v1, 0 }
0x3c9f   : > { %v15695_v54 = vand.u32 4294901760, %v15624_v44 }
0x3ca1   : > { %v15696_v11 = vsub.f32 %v15624_v44, %v15695_v54  ;;  %v21087_v44 = vmov 0  }
0x3ca3   : > { %v15697_v62 = vand.u32 4294901760, %v15696_v11 }
0x3ca5   : > { %v15698_v5 = vsub.f32 %v15696_v11, %v15697_v62 }
0x3ca7   : > { %v15699_v36 = vand.u32 4294901760, %v15698_v5 }
0x3ca9   : > { %19045 = vmatmul.mubr.f32.vlgmr.msra.gmra.mrb[4].mxu1 %v15699_v36 }
0x3caa   : > { %20136 = vmatpush3.bf16.msra.mxu1 %v22792_v26  ;;  %19055 = vmatprep.mubr.msk.f32.mxu1 %vm21082_vm15, %v23263_v59 }
0x3cab   : > { %20137 = vmatprep.subr.bf16.mxu1 %v23264_v38 }
0x3cae   : > { %20139 = vmatpush3.bf16.msra.mxu1 %v22796_v22 }
0x3caf   : > { %20140 = vmatprep.subr.bf16.mxu1 %v23264_v38 }
0x3cb1   : > { %19056 = vmatmul.mubr.f32.vlgmr.msra.gmra.mrb[4].mxu1 %v15695_v54 }
0x3cb2   : > { %20142 = vmatpush3.bf16.msra.mxu1 %v22798_v37  ;;  %19066 = vmatprep.mubr.msk.f32.mxu1 %vm21082_vm15, %v23263_v59 }
0x3cb3   : > { %20143 = vmatprep.subr.bf16.mxu1 %v23264_v38 }
0x3cb6   : > { %20145 = vmatpush3.bf16.msra.mxu1 %v22800_v53 }
0x3cb7   : > { %20146 = vmatprep.subr.bf16.mxu1 %v23264_v38 }
0x3cb9   : > { %19067 = vmatmul.mubr.f32.vlgmr.msra.gmra.mrb[4].mxu1 %v15696_v11 }
0x3cba   : > { %20148 = vmatpush3.bf16.msra.mxu1 %v22774_v29  ;;  %19077 = vmatprep.mubr.msk.f32.mxu1 %vm21082_vm15, %v23263_v59 }
0x3cbb   : > { %20149 = vmatprep.subr.bf16.mxu1 %v23264_v38 }
0x3cbe   : > { %20151 = vmatpush3.bf16.msra.mxu1 %v22784_v43 }
0x3cbf   : > { %20152 = vmatprep.subr.bf16.mxu1 %v23264_v38 }
0x3cc1   : > { %19078 = vmatmul.mubr.f32.vlgmr.msra.gmra.mrb[4].mxu1 %v15697_v62 }
0x3cc2   : > { %20154 = vmatpush3.bf16.msra.mxu1 %v22802_v0  ;;  %19088 = vmatprep.mubr.msk.f32.mxu1 %vm21082_vm15, %v23263_v59 }
0x3cc3   : > { %20155 = vmatprep.subr.bf16.mxu1 %v23264_v38 }
0x3cc6   : > { %20157 = vmatpush3.bf16.msra.mxu1 %v22804_v58 }
0x3cc7   : > { %20158 = vmatprep.subr.bf16.mxu1 %v23264_v38 }
0x3cc9   : > { %19089 = vmatmul.mubr.f32.vlgmr.msra.gmra.mrb[4].mxu1 %v15695_v54 }
0x3cca   : > { %20160 = vmatpush3.bf16.msra.mxu1 %v22774_v29  ;;  %19099 = vmatprep.mubr.msk.f32.mxu1 %vm21082_vm15, %v23263_v59 }
0x3ccb   : > { %20161 = vmatprep.subr.bf16.mxu1 %v23264_v38 }
0x3cce   : > { %20163 = vmatpush3.bf16.msra.mxu1 %v22784_v43 }
0x3cd1   : > { %19100 = vmatmul.mubr.f32.vlgmr.msra.gmra.mrb[4].mxu1 %v15695_v54 }
0x3da4   : > { %v16107_v6 = vpop.f32.mrb[4].mxu1 }
0x3da5   : > { %v20425_v35 = vadd.f32 %v16107_v6, %v22836_v4  ;;  %v19101_v14 = vpop.f32.mrb[5].mxu1 }
0x3da7   : > { %v16111_v52 = vsel %vm13125_vm13, %v20425_v35, -inf }
0x3da8   : > { %16112 = vmax.xlane.f32.xlu0 %v16111_v52 }
0x3e35   : > { %v16113_v3 = vpop.xlane.xlu0 %16112 }
0x3e36   : > { %vm16114_vm4 = vcmp.ge.f32.partialorder %v20425_v35, %v16113_v3 }
0x3e37   : > { %v16115_v2 = vsel %vm16114_vm4, %v23273_v50, 16.0 }
0x3e38   : > { %v16116_v59 = vsel %vm13125_vm13, %v16115_v2, inf }
0x3e39   : > { %16117 = vmin.xlane.f32.xlu1 %v16116_v59 }
0x3ec6   : > { %v16118_v38 = vpop.xlane.xlu1 %16117 }
0x3ec7   : > { %v20486_v60 = vtrunc.f32 %v16118_v38 }
0x3ec9   : > { %v20487_v41 = vcvt.f32.s32 %v20486_v60 }
0x3ecb   : > { %vm16121_vm7 = vcmp.eq.s32.totalorder %v20487_v41, 1  ;;  %13139 = sbr.rel (!%p13137_p12) target bundleno = 13846 (0x3616), region = 176 }
0x3ecc   : > { %vm16123_vm9 = vmxor %vm16121_vm7, %vm21086_vm5 }
0x3ecd   : > { %vm16124_vm10 = vmand %vm16122_vm6, %vm16123_vm9 }
0x3ece   : > { %v16125_v1 = vsel %vm16124_vm10, %v20487_v41, 4294967295  ;;  %v16129_v7 = vsel %vm16124_vm10, %v20487_v41, %v21055_v7   ;;  %vm16134_vm11 = vmor %vm16120_vm2, %vm16121_vm7  ;;  %v16136_v54 = vsel %vm16124_vm10, 1, %v21087_v44 }
0x3ecf   : > { %16128 = vst.msk [vmem:[%s16126_s23] sm:$0x1] %vm16127_vm8, %v16125_v1  ;;  %v16135_v48 = vsel %vm16134_vm11, 1, %v21087_v44   ;;  %v16137_v11 = vadd.s32 %v21039_v45, %v16136_v54  }
0x3ed1   : > { %v23274_v45 = vmov %v16137_v11  ;;  %16139 = vst.msk [vmem:[#allocation23] sm:$0x1] (%p13137_p12), %vm16127_vm8, %v16137_v11 }
0x3ed2   :  { %20962 = shalt.err (!%p20959_p3)
}
0x3ed3   :  { %s20963_s16 = scalar_lea.hbm %s23208_s22, 16 }
0x3ed4   :  { %p20964_p4 = scmp.ne.s32.totalorder %s23208_s22, %s20963_s16  ;;  %p20967_p5 = scmp.lt.u32.totalorder %s20963_s16, %s23208_s22 }
0x3ed6   :  { %p20969_p6 = pnand %p20967_p5, %p20964_p4 }
0x3ed8   :  { %20972 = shalt.err (!%p20969_p6)
}
0x3ed9   :  { %16151 = dma.vmem_to_hbm [thread:$0]  %s16149_s2, 16, %s23208_s22, [#allocation5]  }
0x3eda   :  { %s20973_s28 = scalar_lea.vmem %s16159_s12, 32  ;;  %p20978_p8 = scmp.lt.s32.totalorder %s16159_s12, %s16159_s12 }
0x3edb   :  { %p20974_p7 = scmp.ne.s32.totalorder %s16159_s12, %s20973_s28  ;;  %p20979_p9 = scmp.lt.s32.totalorder %s20973_s28, %s20973_s28 }
0x3edd   :  { %p20980_p10 = por %p20979_p9, %p20978_p8 }
0x3edf   :  { %p20981_p11 = pnand %p20980_p10, %p20974_p7 }
0x3ee1   :  { %20984 = shalt.err (!%p20981_p11)
}
0x3ee2   :  { %s23275_s27 = sld [smem:[#allocation52_spill]] }
0x3ee8   :  { %s20985_s13 = scalar_lea.hbm %s23275_s27, 32 }
0x3ee9   :  { %p20986_p12 = scmp.ne.s32.totalorder %s23275_s27, %s20985_s13  ;;  %p20989_p13 = scmp.lt.u32.totalorder %s20985_s13, %s23275_s27 }
0x3eeb   :  { %p20991_p0 = pnand %p20989_p13, %p20986_p12 }
0x3eed   :  { %20994 = shalt.err (!%p20991_p0)
}
0x3eee   :  { %16161 = dma.vmem_to_hbm [thread:$0]  %s16159_s12, 32, %s23275_s27, [#allocation25]  }
0x3eef   :  { %21033 = dma.done.wait [#allocation5], 16  }
0x3ef0   :  { %21034 = vsyncadd [#allocation5], 4294967280 }
0x3ef1   :  { %21035 = dma.done.wait [#allocation25], 32  }
0x3ef2   :  { %21036 = vsyncadd [#allocation25], 4294967264 }
0x3ef3   :  { %16170 = vsyncpa [#allocation4], 1 }
0x3ef4   :  { %16171 = vsyncpa [#allocation7], 1 }
0x3ef5   :  { %16172 = vsyncpa [#allocation10], 1 }
0x3ef6   :  { %16173 = vsyncpa [#allocation13], 1 }
0x3ef7   :  { %16174 = vsyncpa [#allocation16], 1 }
0x3ef8   :  { %16175 = vsyncpa [#allocation19], 1 }
0x3ef9   :  { %16176 = vsyncpa [#allocation22], 1 }
0x3efa   :  { %16177 = vsyncpa [#allocation5], 1 }
0x3efb   :  { %16178 = vsyncpa [#allocation25], 1 }

</bundles_post_ra>
